<compile_context>
chip_gen: v7x
topology: tpu7x:2x2x1
jax: 0.10.0
libtpu: 0.0.40
codegen_flags: <defaults>
</compile_context>

<pallas_src>
import math
import functools

import numpy as np
import jax
import jax.numpy as jnp
from jax.experimental import pallas as pl
from jax.experimental.pallas import tpu as pltpu

# -------------------- static hyper-params (small synthetic config) --------------------
STYLE_DIM = 32
N_MLP = 2
KERNEL_SIZE = 3
N_TAPS = 6
MARGIN = 2
BATCH = 2
LRELU_SLOPE = 0.2
LRELU_GAIN = math.sqrt(2.0)


def filter_parameters(n_layer, n_critical, sr_max, cutoff_0, cutoff_n,
                      stopband_0, stopband_n, channel_max, channel_base):
    cutoffs, stopbands, srs, band_halfs, channels = [], [], [], [], []
    for i in range(n_layer):
        f_c = cutoff_0 * (cutoff_n / cutoff_0) ** min(i / (n_layer - n_critical), 1)
        f_t = stopband_0 * (stopband_n / stopband_0) ** min(i / (n_layer - n_critical), 1)
        s_i = 2 ** math.ceil(math.log(min(2 * f_t, sr_max), 2))
        f_h = max(f_t, s_i / 2) - f_c
        c_i = min(round(channel_base / s_i), channel_max)
        cutoffs.append(f_c); stopbands.append(f_t); srs.append(s_i)
        band_halfs.append(f_h); channels.append(c_i)
    return {"cutoffs": cutoffs, "stopbands": stopbands, "srs": srs,
            "band_halfs": band_halfs, "channels": channels}


# -------------------- filter design (host-side numpy, init-time only) -----------------
def kaiser_attenuation(n_taps, f_h, sr):
    df = 2 * f_h / (sr / 2)
    return 2.285 * (n_taps - 1) * math.pi * df + 7.95


def kaiser_beta(n_taps, f_h, sr):
    atten = kaiser_attenuation(n_taps, f_h, sr)
    if atten > 50:
        return 0.1102 * (atten - 8.7)
    elif 50 >= atten >= 21:
        return 0.5842 * (atten - 21) ** 0.4 + 0.07886 * (atten - 21)
    return 0.0


def kaiser_window(n_taps, f_h, sr):
    beta = kaiser_beta(n_taps, f_h, sr)
    ind = np.arange(n_taps) - (n_taps - 1) / 2
    arg = np.clip(1 - (2 * ind / (n_taps - 1)) ** 2, 0.0, None)
    return np.i0(beta * np.sqrt(arg)) / np.i0(beta)


def lowpass_filter(n_taps, cutoff, band_half, sr):
    # TODO(synk): use_jinc=True (2-D jinc / bessel_j1) path not implemented; use_jinc=False here.
    window = kaiser_window(n_taps, band_half, sr)
    ind = np.arange(n_taps) - (n_taps - 1) / 2
    return (2 * cutoff / sr * np.sinc(2 * cutoff / sr * ind) * window).astype(np.float32)


def upfirdn1d_matrix(in_len, filt, up, down, pad0, pad1):
    """Dense matrix M so that upfirdn1d(x) == M @ x (zero-insert upsample -> pad ->
    convolve with flipped filter -> stride `down`)."""
    filt = np.asarray(filt, np.float64)
    K = len(filt)
    fk = filt[::-1]
    padded = in_len * up + pad0 + pad1
    out_len = (padded - K) // down + 1
    M = np.zeros((out_len, in_len), np.float64)
    for o in range(out_len):
        for t in range(K):
            i = o * down + t
            j_up = i - pad0
            if j_up < 0 or j_up % up != 0:
                continue
            j = j_up // up
            if 0 <= j < in_len:
                M[o, j] += fk[t]
    return M.astype(np.float32)


# ================================ the fused Pallas kernel ==============================
def generator_kernel(*refs, n_layers, cutoff0, half_sr0, rgb_gain):
    out_ref = refs[-1]
    (style_ref, mlp_w_ref, mlp_b_ref, aff_wT_ref, aff_b_ref,
     four_ref, rep0_ref, gxy_ref, w1blk_ref) = refs[0:9]
    NPER = 11
    base = 9
    rgb_base = base + n_layers * NPER
    (rgb_mod_w_ref, rgb_mod_b_ref, rgb_rep_ref,
     rgb_wblk_ref, rgb_brep_ref) = refs[rgb_base:rgb_base + 5]

    n_mlp = mlp_w_ref.shape[0]

    # ---- style mapping network: PixelNorm + n_mlp x (EqualLinear + fused lrelu) ------
    z = style_ref[0]                                                   # (1, D)
    x = z * jax.lax.rsqrt(jnp.mean(z * z, axis=1, keepdims=True) + 1e-8)
    for l in range(n_mlp):
        x = jnp.dot(x, mlp_w_ref[l], preferred_element_type=jnp.float32) + mlp_b_ref[l]
        x = jnp.where(x >= 0.0, x, LRELU_SLOPE * x) * LRELU_GAIN
    latent = x                                                         # (1, D)

    # ---- affine_fourier + per-sample frequency/phase/amplitude transform -------------
    # TODO(synk): truncation / external transform args not implemented (defaults).
    t = jnp.dot(latent, aff_wT_ref[...], preferred_element_type=jnp.float32) + aff_b_ref[...]
    a0, a1, a2, a3 = t[:, 0:1], t[:, 1:2], t[:, 2:3], t[:, 3:4]        # (1,1) each
    inv_n = jax.lax.rsqrt(a0 * a0 + a1 * a1)
    a0, a1, a2, a3 = a0 * inv_n, a1 * inv_n, a2 * inv_n, a3 * inv_n
    t02 = -a0 * a2 + a1 * a3                                           # (m_rot @ m_tra)[0,2]
    t12 = -a1 * a2 - a0 * a3                                           # (m_rot @ m_tra)[1,2]
    f0 = four_ref[0:1, :]                                              # (1, C0)
    f1 = four_ref[1:2, :]
    ph = four_ref[2:3, :]
    phase_b = ph + f0 * t02 + f1 * t12
    fb0 = f0 * a0 + f1 * a1
    fb1 = -f0 * a1 + f1 * a0
    amp = jnp.clip(1.0 - (jnp.sqrt(fb0 * fb0 + fb1 * fb1) - cutoff0)
                   / (half_sr0 - cutoff0), 0.0, 1.0)

    # ---- Fourier features in lane-dense (H0, C0*W0) layout (2 VPU FMAs + EUP sin) ----
    rep0 = rep0_ref[...]
    fb0_l = jnp.dot(fb0, rep0, preferred_element_type=jnp.float32)     # (1, C0*W0)
    fb1_l = jnp.dot(fb1, rep0, preferred_element_type=jnp.float32)
    ph_l = jnp.dot(phase_b, rep0, preferred_element_type=jnp.float32)
    amp_l = jnp.dot(amp, rep0, preferred_element_type=jnp.float32)
    gx = gxy_ref[0]                                                    # (H0, C0*W0)
    gy = gxy_ref[1]
    feat = jnp.sin((fb0_l * gx + fb1_l * gy + ph_l) * (2.0 * math.pi)) * amp_l

    # ---- conv1 (1x1 EqualConv2d, no bias) as a lane-block matmul ----------------------
    act = jnp.dot(feat, w1blk_ref[...], preferred_element_type=jnp.float32)

    # ---- alias-free conv stack (modconv + filtered leaky relu), fully in-kernel -------
    for li in range(n_layers):
        (mod_w_ref, mod_b_ref, wsqT_ref, repin_ref, repout_ref, g_ref,
         brep_ref, muy_ref, mdy_ref, muxblk_ref, mdxblk_ref) = refs[base + li * NPER:
                                                                    base + (li + 1) * NPER]
        K = g_ref.shape[0]
        hc = muy_ref.shape[1]

        # style modulation (EqualLinear) + demodulation via wsq matmul
        s = jnp.dot(latent, mod_w_ref[...], preferred_element_type=jnp.float32) + mod_b_ref[...]
        ssq = jnp.dot(s * s, wsqT_ref[...], preferred_element_type=jnp.float32)
        d = jax.lax.rsqrt(ssq + 1e-8)
        # TODO(synk): training-mode EMA variance update not implemented; eval semantics
        # (ema_var == 1  =>  input_gain == 1).
        s_l = jnp.dot(s, repin_ref[...], preferred_element_type=jnp.float32)    # (1, cin*Win)
        d_l = jnp.dot(d, repout_ref[...], preferred_element_type=jnp.float32)   # (1, cout*wc)

        # modulate the input channels (== modulating the conv weight), pad H by k-1
        xs = act * s_l
        zpad = jnp.zeros((K - 1, xs.shape[1]), jnp.float32)
        xs_p = jnp.concatenate([zpad, xs, zpad], axis=0)               # (Hin + 2(K-1), cin*Win)

        # modulated 3x3 conv: K block-Toeplitz MXU matmuls, contraction depth cin*Win
        y = jnp.dot(xs_p[0:hc, :], g_ref[0], preferred_element_type=jnp.float32)
        for ky in range(1, K):
            y = y + jnp.dot(xs_p[ky:ky + hc, :], g_ref[ky],
                            preferred_element_type=jnp.float32)
        # demodulate (per output channel) + bias (added before the filters)
        y = y * d_l + brep_ref[...]                                    # (hc, cout*wc)

        # filtered lrelu: separable FIR upsample -> lrelu(0.2)*sqrt(2) -> FIR downsample
        y = jnp.dot(muy_ref[...], y, preferred_element_type=jnp.float32)      # (hup, cout*wc)
        y = jnp.dot(y, muxblk_ref[...], preferred_element_type=jnp.float32)   # (hup, cout*wup)
        y = jnp.where(y >= 0.0, y, LRELU_SLOPE * y) * LRELU_GAIN
        y = jnp.dot(mdy_ref[...], y, preferred_element_type=jnp.float32)      # (hout, cout*wup)
        act = jnp.dot(y, mdxblk_ref[...], preferred_element_type=jnp.float32) # (hout, cout*wout)

    # ---- to_rgb: modulated 1x1 conv (no demod), + bias, then / 4 ----------------------
    s = (jnp.dot(latent, rgb_mod_w_ref[...], preferred_element_type=jnp.float32)
         + rgb_mod_b_ref[...]) * rgb_gain
    s_l = jnp.dot(s, rgb_rep_ref[...], preferred_element_type=jnp.float32)
    rgb = jnp.dot(act * s_l, rgb_wblk_ref[...], preferred_element_type=jnp.float32)
    rgb = (rgb + rgb_brep_ref[...]) * 0.25                             # (H_last, 3*W_last)

    W_last = out_ref.shape[3]
    for o in range(out_ref.shape[1]):
        out_ref[0, o, :, :] = rgb[:, o * W_last:(o + 1) * W_last]


# ================================ parameter / operator building ========================
def build_generator(key, fp, style_dim, n_mlp, k, n_taps, margin):
    cutoffs, srs = fp["cutoffs"], fp["srs"]
    band_halfs, channels = fp["band_halfs"], fp["channels"]
    n_layers = len(srs)
    sizes = [sr + margin * 2 for sr in srs]
    sizes[-1] = srs[-1]
    D = style_dim

    keys = iter(jax.random.split(key, 32))

    def randn(shape):
        return np.asarray(jax.random.normal(next(keys), shape, jnp.float32))

    def rand(shape):
        return np.asarray(jax.random.uniform(next(keys), shape, jnp.float32))

    consts = []

    # style mapping MLP: effective weight randn/sqrt(D) (lr_mul/scale folded), bias 0
    mlp_w = (randn((n_mlp, D, D)) / math.sqrt(D)).astype(np.float32)
    mlp_b = np.zeros((n_mlp, 1, D), np.float32)
    # affine_fourier: weight zeroed, bias [1,0,0,0] (as in the reference __init__)
    aff_wT = np.zeros((D, 4), np.float32)
    aff_b = np.array([[1.0, 0.0, 0.0, 0.0]], np.float32)

    # FourierFeature buffers + coordinate grids in (H, C*W) layout
    C0 = channels[0]
    H0 = W0 = sizes[0]
    sr0 = float(srs[0])
    cutoff0 = float(cutoffs[0])
    freqs = randn((C0, 2))
    radii = np.sqrt((freqs ** 2).sum(1, keepdims=True))
    freqs = (freqs / (radii * np.exp(radii ** 2) ** 0.25) * cutoff0).astype(np.float32)
    phases = (rand((C0,)) - 0.5).astype(np.float32)
    four_const = np.stack([freqs[:, 0], freqs[:, 1], phases], axis=0).astype(np.float32)
    rep0 = np.kron(np.eye(C0, dtype=np.float32), np.ones((1, W0), np.float32))
    coords = (np.arange(H0) * 2 + 1) / H0 - 1.0
    g1d = (0.5 * H0 / sr0 * coords).astype(np.float32)      # affine_grid (align_corners=False)
    gx_cl = np.broadcast_to(np.tile(g1d, C0)[None, :], (H0, C0 * W0))
    gy_cl = np.broadcast_to(g1d[:, None], (H0, C0 * W0))
    gxy = np.stack([gx_cl, gy_cl], axis=0).astype(np.float32)

    # conv1: EqualConv2d(C0, C0, 1, bias=False) -> block matmul kron(w.T, I_W)
    w1 = (randn((C0, C0)) / math.sqrt(C0)).astype(np.float32)
    w1_blk = np.kron(w1.T, np.eye(W0, dtype=np.float32)).astype(np.float32)

    consts += [jnp.asarray(mlp_w), jnp.asarray(mlp_b), jnp.asarray(aff_wT),
               jnp.asarray(aff_b), jnp.asarray(four_const), jnp.asarray(rep0),
               jnp.asarray(gxy), jnp.asarray(w1_blk)]

    for i in range(n_layers):
        prev = max(i - 1, 0)
        cin, cout = channels[prev], channels[i]
        in_size, out_size = sizes[prev], sizes[i]
        mid_sr = max(srs[i], srs[prev]) * 2
        up = round(mid_sr / srs[prev])
        down = round(mid_sr / srs[i])
        up_f = lowpass_filter(n_taps * up, cutoffs[prev], band_halfs[prev], mid_sr)
        down_f = lowpass_filter(n_taps * down, cutoffs[i], band_halfs[i], mid_sr)
        up_f = up_f / up_f.sum()
        down_f = down_f / down_f.sum()
        hc = in_size + k - 1                      # modulated-conv output size (padding = k-1)
        pad_total = (out_size - 1) * down + 1
        pad_total -= (in_size + k - 1) * up
        pad_total += n_taps * up + n_taps * down - 2
        pad_lo = (pad_total + up) // 2
        pad_hi = pad_total - pad_lo
        # separable upfirdn as dense linear operators (gain `up` per axis == up**2 total)
        muy = upfirdn1d_matrix(hc, up_f * up, up, 1, pad_lo, pad_hi)          # (hup, hc)
        mux = upfirdn1d_matrix(hc, up_f * up, up, 1, pad_lo, pad_hi)          # (wup, wc)
        mdy = upfirdn1d_matrix(muy.shape[0], down_f, 1, down, 0, 0)           # (hout, hup)
        mdx = upfirdn1d_matrix(mux.shape[0], down_f, 1, down, 0, 0)           # (wout, wup)

        w = randn((cout, cin, k, k))              # ModulatedConv2d weight (no equalized scale)
        # conv as block-Toeplitz matmuls in the (H, C*W) layout:
        #   g[ky][c*in_size + v, o*hc + x] = w[o, c, ky, v - x + (k-1)]
        g = np.zeros((k, cin * in_size, cout * hc), np.float32)
        for ky in range(k):
            for c in range(cin):
                for o in range(cout):
                    for xx in range(hc):
                        for kx in range(k):
                            v = xx + kx - (k - 1)
                            if 0 <= v < in_size:
                                g[ky, c * in_size + v, o * hc + xx] = w[o, c, ky, kx]
        wsqT = (w ** 2).sum(axis=(2, 3)).T.astype(np.float32)                  # (cin, cout)
        repin = np.kron(np.eye(cin, dtype=np.float32), np.ones((1, in_size), np.float32))
        repout = np.kron(np.eye(cout, dtype=np.float32), np.ones((1, hc), np.float32))
        muxblk = np.kron(np.eye(cout, dtype=np.float32), mux.T).astype(np.float32)
        mdxblk = np.kron(np.eye(cout, dtype=np.float32), mdx.T).astype(np.float32)
        mod_w = (randn((D, cin)) / math.sqrt(D)).astype(np.float32)            # EqualLinear eff.
        mod_b = np.ones((1, cin), np.float32)                                  # bias_init = 1
        bias = np.zeros((cout,), np.float32)
        brep = np.repeat(bias, hc)[None, :].astype(np.float32)
        consts += [jnp.asarray(mod_w), jnp.asarray(mod_b), jnp.asarray(wsqT),
                   jnp.asarray(repin), jnp.asarray(repout), jnp.asarray(g),
                   jnp.asarray(brep), jnp.asarray(muy), jnp.asarray(mdy),
                   jnp.asarray(muxblk), jnp.asarray(mdxblk)]

    # to_rgb: modulated 1x1 conv, demodulate=False, style_gain = 1/sqrt(c_last)
    c_last = channels[-1]
    W_last = sizes[-1]
    rgb_w = randn((3, c_last)).astype(np.float32)
    rgb_mod_w = (randn((D, c_last)) / math.sqrt(D)).astype(np.float32)
    rgb_mod_b = np.ones((1, c_last), np.float32)
    rgb_rep = np.kron(np.eye(c_last, dtype=np.float32), np.ones((1, W_last), np.float32))
    rgb_wblk = np.kron(rgb_w.T, np.eye(W_last, dtype=np.float32)).astype(np.float32)
    rgb_brep = np.zeros((1, 3 * W_last), np.float32)
    consts += [jnp.asarray(rgb_mod_w), jnp.asarray(rgb_mod_b), jnp.asarray(rgb_rep),
               jnp.asarray(rgb_wblk), jnp.asarray(rgb_brep)]

    static = dict(n_layers=n_layers, cutoff0=cutoff0, half_sr0=sr0 / 2.0,
                  rgb_gain=1.0 / math.sqrt(c_last),
                  out_c=3, out_h=W_last, out_w=W_last)
    return consts, static


# ================================ forward wrapper ======================================
def make_forward(consts, static):
    kernel = functools.partial(
        generator_kernel,
        n_layers=static["n_layers"],
        cutoff0=static["cutoff0"],
        half_sr0=static["half_sr0"],
        rgb_gain=static["rgb_gain"],
    )
    C_out, H_last, W_last = static["out_c"], static["out_h"], static["out_w"]

    def _full_spec(shape):
        nd = len(shape)
        return pl.BlockSpec(shape, lambda b, _nd=nd: (0,) * _nd)

    def forward(style):
        B, D = style.shape
        style3 = style.reshape(B, 1, D)
        in_specs = [pl.BlockSpec((1, 1, D), lambda b: (b, 0, 0))]
        in_specs += [_full_spec(tuple(c.shape)) for c in consts]
        out_spec = pl.BlockSpec((1, C_out, H_last, W_last), lambda b: (b, 0, 0, 0))
        return pl.pallas_call(
            kernel,
            grid=(B,),
            in_specs=in_specs,
            out_specs=out_spec,
            out_shape=jax.ShapeDtypeStruct((B, C_out, H_last, W_last), jnp.float32),
            compiler_params=pltpu.CompilerParams(
                dimension_semantics=("parallel",)),
        )(style3, *consts)

    return forward


if __name__ == "__main__":
    fp = filter_parameters(n_layer=3, n_critical=1, sr_max=16,
                           cutoff_0=2, cutoff_n=8,
                           stopband_0=2 ** 2.1, stopband_n=8 * 2 ** 0.3,
                           channel_max=8, channel_base=64)
    root = jax.random.PRNGKey(0)
    pkey, zkey = jax.random.split(root)
    consts, static = build_generator(pkey, fp, STYLE_DIM, N_MLP, KERNEL_SIZE,
                                     N_TAPS, MARGIN)
    style = jax.random.normal(zkey, (BATCH, STYLE_DIM), jnp.float32)

    forward = make_forward(consts, static)
    out = jax.block_until_ready(forward(style))
    expected = (BATCH, 3, fp["srs"][-1], fp["srs"][-1])
    assert out.shape == expected, (out.shape, expected)
    assert bool(jnp.all(jnp.isfinite(out)))
    print("KERNEL_OK")
</pallas_src>

<mosaic_0001>
module attributes {stable_mosaic.version = 11 : i64} {
  func.func @generator_kernel(%arg0: i32, %arg1: memref<1x1x32xf32, #tpu.memory_space<vmem>>, %arg2: memref<2x32x32xf32, #tpu.memory_space<vmem>>, %arg3: memref<2x1x32xf32, #tpu.memory_space<vmem>>, %arg4: memref<32x4xf32, #tpu.memory_space<vmem>>, %arg5: memref<1x4xf32, #tpu.memory_space<vmem>>, %arg6: memref<3x4xf32, #tpu.memory_space<vmem>>, %arg7: memref<4x80xf32, #tpu.memory_space<vmem>>, %arg8: memref<2x20x80xf32, #tpu.memory_space<vmem>>, %arg9: memref<80x80xf32, #tpu.memory_space<vmem>>, %arg10: memref<32x4xf32, #tpu.memory_space<vmem>>, %arg11: memref<1x4xf32, #tpu.memory_space<vmem>>, %arg12: memref<4x4xf32, #tpu.memory_space<vmem>>, %arg13: memref<4x80xf32, #tpu.memory_space<vmem>>, %arg14: memref<4x88xf32, #tpu.memory_space<vmem>>, %arg15: memref<3x80x88xf32, #tpu.memory_space<vmem>>, %arg16: memref<1x88xf32, #tpu.memory_space<vmem>>, %arg17: memref<50x22xf32, #tpu.memory_space<vmem>>, %arg18: memref<20x50xf32, #tpu.memory_space<vmem>>, %arg19: memref<88x200xf32, #tpu.memory_space<vmem>>, %arg20: memref<200x80xf32, #tpu.memory_space<vmem>>, %arg21: memref<32x4xf32, #tpu.memory_space<vmem>>, %arg22: memref<1x4xf32, #tpu.memory_space<vmem>>, %arg23: memref<4x4xf32, #tpu.memory_space<vmem>>, %arg24: memref<4x80xf32, #tpu.memory_space<vmem>>, %arg25: memref<4x88xf32, #tpu.memory_space<vmem>>, %arg26: memref<3x80x88xf32, #tpu.memory_space<vmem>>, %arg27: memref<1x88xf32, #tpu.memory_space<vmem>>, %arg28: memref<50x22xf32, #tpu.memory_space<vmem>>, %arg29: memref<20x50xf32, #tpu.memory_space<vmem>>, %arg30: memref<88x200xf32, #tpu.memory_space<vmem>>, %arg31: memref<200x80xf32, #tpu.memory_space<vmem>>, %arg32: memref<32x4xf32, #tpu.memory_space<vmem>>, %arg33: memref<1x4xf32, #tpu.memory_space<vmem>>, %arg34: memref<4x4xf32, #tpu.memory_space<vmem>>, %arg35: memref<4x80xf32, #tpu.memory_space<vmem>>, %arg36: memref<4x88xf32, #tpu.memory_space<vmem>>, %arg37: memref<3x80x88xf32, #tpu.memory_space<vmem>>, %arg38: memref<1x88xf32, #tpu.memory_space<vmem>>, %arg39: memref<42x22xf32, #tpu.memory_space<vmem>>, %arg40: memref<16x42xf32, #tpu.memory_space<vmem>>, %arg41: memref<88x168xf32, #tpu.memory_space<vmem>>, %arg42: memref<168x64xf32, #tpu.memory_space<vmem>>, %arg43: memref<32x4xf32, #tpu.memory_space<vmem>>, %arg44: memref<1x4xf32, #tpu.memory_space<vmem>>, %arg45: memref<4x64xf32, #tpu.memory_space<vmem>>, %arg46: memref<64x48xf32, #tpu.memory_space<vmem>>, %arg47: memref<1x48xf32, #tpu.memory_space<vmem>>, %arg48: memref<1x3x16x16xf32, #tpu.memory_space<vmem>>) attributes {dimension_semantics = [#tpu.dimension_semantics<parallel>], iteration_bounds = array<i64: 2>, scalar_prefetch = 0 : i64, scratch_operands = 0 : i64, tpu.core_type = #tpu.core_type<tc>, window_params = [{transform_indices = @transform_0, window_bounds = array<i64: 1, 1, 32>}, {pipeline_mode = #tpu.pipeline_mode<synchronous>, transform_indices = @transform_1, window_bounds = array<i64: 2, 32, 32>}, {pipeline_mode = #tpu.pipeline_mode<synchronous>, transform_indices = @transform_2, window_bounds = array<i64: 2, 1, 32>}, {pipeline_mode = #tpu.pipeline_mode<synchronous>, transform_indices = @transform_3, window_bounds = array<i64: 32, 4>}, {pipeline_mode = #tpu.pipeline_mode<synchronous>, transform_indices = @transform_4, window_bounds = array<i64: 1, 4>}, {pipeline_mode = #tpu.pipeline_mode<synchronous>, transform_indices = @transform_5, window_bounds = array<i64: 3, 4>}, {pipeline_mode = #tpu.pipeline_mode<synchronous>, transform_indices = @transform_6, window_bounds = array<i64: 4, 80>}, {pipeline_mode = #tpu.pipeline_mode<synchronous>, transform_indices = @transform_7, window_bounds = array<i64: 2, 20, 80>}, {pipeline_mode = #tpu.pipeline_mode<synchronous>, transform_indices = @transform_8, window_bounds = array<i64: 80, 80>}, {pipeline_mode = #tpu.pipeline_mode<synchronous>, transform_indices = @transform_9, window_bounds = array<i64: 32, 4>}, {pipeline_mode = #tpu.pipeline_mode<synchronous>, transform_indices = @transform_10, window_bounds = array<i64: 1, 4>}, {pipeline_mode = #tpu.pipeline_mode<synchronous>, transform_indices = @transform_11, window_bounds = array<i64: 4, 4>}, {pipeline_mode = #tpu.pipeline_mode<synchronous>, transform_indices = @transform_12, window_bounds = array<i64: 4, 80>}, {pipeline_mode = #tpu.pipeline_mode<synchronous>, transform_indices = @transform_13, window_bounds = array<i64: 4, 88>}, {pipeline_mode = #tpu.pipeline_mode<synchronous>, transform_indices = @transform_14, window_bounds = array<i64: 3, 80, 88>}, {pipeline_mode = #tpu.pipeline_mode<synchronous>, transform_indices = @transform_15, window_bounds = array<i64: 1, 88>}, {pipeline_mode = #tpu.pipeline_mode<synchronous>, transform_indices = @transform_16, window_bounds = array<i64: 50, 22>}, {pipeline_mode = #tpu.pipeline_mode<synchronous>, transform_indices = @transform_17, window_bounds = array<i64: 20, 50>}, {pipeline_mode = #tpu.pipeline_mode<synchronous>, transform_indices = @transform_18, window_bounds = array<i64: 88, 200>}, {pipeline_mode = #tpu.pipeline_mode<synchronous>, transform_indices = @transform_19, window_bounds = array<i64: 200, 80>}, {pipeline_mode = #tpu.pipeline_mode<synchronous>, transform_indices = @transform_20, window_bounds = array<i64: 32, 4>}, {pipeline_mode = #tpu.pipeline_mode<synchronous>, transform_indices = @transform_21, window_bounds = array<i64: 1, 4>}, {pipeline_mode = #tpu.pipeline_mode<synchronous>, transform_indices = @transform_22, window_bounds = array<i64: 4, 4>}, {pipeline_mode = #tpu.pipeline_mode<synchronous>, transform_indices = @transform_23, window_bounds = array<i64: 4, 80>}, {pipeline_mode = #tpu.pipeline_mode<synchronous>, transform_indices = @transform_24, window_bounds = array<i64: 4, 88>}, {pipeline_mode = #tpu.pipeline_mode<synchronous>, transform_indices = @transform_25, window_bounds = array<i64: 3, 80, 88>}, {pipeline_mode = #tpu.pipeline_mode<synchronous>, transform_indices = @transform_26, window_bounds = array<i64: 1, 88>}, {pipeline_mode = #tpu.pipeline_mode<synchronous>, transform_indices = @transform_27, window_bounds = array<i64: 50, 22>}, {pipeline_mode = #tpu.pipeline_mode<synchronous>, transform_indices = @transform_28, window_bounds = array<i64: 20, 50>}, {pipeline_mode = #tpu.pipeline_mode<synchronous>, transform_indices = @transform_29, window_bounds = array<i64: 88, 200>}, {pipeline_mode = #tpu.pipeline_mode<synchronous>, transform_indices = @transform_30, window_bounds = array<i64: 200, 80>}, {pipeline_mode = #tpu.pipeline_mode<synchronous>, transform_indices = @transform_31, window_bounds = array<i64: 32, 4>}, {pipeline_mode = #tpu.pipeline_mode<synchronous>, transform_indices = @transform_32, window_bounds = array<i64: 1, 4>}, {pipeline_mode = #tpu.pipeline_mode<synchronous>, transform_indices = @transform_33, window_bounds = array<i64: 4, 4>}, {pipeline_mode = #tpu.pipeline_mode<synchronous>, transform_indices = @transform_34, window_bounds = array<i64: 4, 80>}, {pipeline_mode = #tpu.pipeline_mode<synchronous>, transform_indices = @transform_35, window_bounds = array<i64: 4, 88>}, {pipeline_mode = #tpu.pipeline_mode<synchronous>, transform_indices = @transform_36, window_bounds = array<i64: 3, 80, 88>}, {pipeline_mode = #tpu.pipeline_mode<synchronous>, transform_indices = @transform_37, window_bounds = array<i64: 1, 88>}, {pipeline_mode = #tpu.pipeline_mode<synchronous>, transform_indices = @transform_38, window_bounds = array<i64: 42, 22>}, {pipeline_mode = #tpu.pipeline_mode<synchronous>, transform_indices = @transform_39, window_bounds = array<i64: 16, 42>}, {pipeline_mode = #tpu.pipeline_mode<synchronous>, transform_indices = @transform_40, window_bounds = array<i64: 88, 168>}, {pipeline_mode = #tpu.pipeline_mode<synchronous>, transform_indices = @transform_41, window_bounds = array<i64: 168, 64>}, {pipeline_mode = #tpu.pipeline_mode<synchronous>, transform_indices = @transform_42, window_bounds = array<i64: 32, 4>}, {pipeline_mode = #tpu.pipeline_mode<synchronous>, transform_indices = @transform_43, window_bounds = array<i64: 1, 4>}, {pipeline_mode = #tpu.pipeline_mode<synchronous>, transform_indices = @transform_44, window_bounds = array<i64: 4, 64>}, {pipeline_mode = #tpu.pipeline_mode<synchronous>, transform_indices = @transform_45, window_bounds = array<i64: 64, 48>}, {pipeline_mode = #tpu.pipeline_mode<synchronous>, transform_indices = @transform_46, window_bounds = array<i64: 1, 48>}, {transform_indices = @transform_47, window_bounds = array<i64: 1, 3, 16, 16>}]} {
    %c0 = arith.constant 0 : index
    %c0_0 = arith.constant 0 : index
    %c0_1 = arith.constant 0 : index
    %0 = vector.load %arg1[%c0, %c0_0, %c0_1] : memref<1x1x32xf32, #tpu.memory_space<vmem>>, vector<1x1x32xf32>
    %1 = vector.shape_cast %0 : vector<1x1x32xf32> to vector<1x32xf32>
    %2 = arith.mulf %1, %1 : vector<1x32xf32>
    %cst = arith.constant dense<0.000000e+00> : vector<1xf32>
    %3 = vector.multi_reduction <add>, %2, %cst [1] : vector<1x32xf32> to vector<1xf32>
    %4 = vector.shape_cast %3 : vector<1xf32> to vector<1x1xf32>
    %cst_2 = arith.constant 3.200000e+01 : f32
    %5 = vector.broadcast %cst_2 : f32 to vector<1x1xf32>
    %6 = arith.divf %4, %5 : vector<1x1xf32>
    %cst_3 = arith.constant 9.99999993E-9 : f32
    %7 = vector.broadcast %cst_3 : f32 to vector<1x1xf32>
    %8 = arith.addf %6, %7 : vector<1x1xf32>
    %9 = math.rsqrt %8 : vector<1x1xf32>
    %10 = vector.broadcast %9 : vector<1x1xf32> to vector<1x32xf32>
    %11 = arith.mulf %1, %10 : vector<1x32xf32>
    %c0_4 = arith.constant 0 : index
    %c0_5 = arith.constant 0 : index
    %c0_6 = arith.constant 0 : index
    %12 = vector.load %arg2[%c0_4, %c0_5, %c0_6] : memref<2x32x32xf32, #tpu.memory_space<vmem>>, vector<1x32x32xf32>
    %13 = vector.shape_cast %12 : vector<1x32x32xf32> to vector<32x32xf32>
    %cst_7 = arith.constant dense<0.000000e+00> : vector<1x32xf32>
    %14 = tpu.matmul %11, %13, %cst_7 {dimension_numbers = #tpu.dot_dimension_numbers<[1], [0], [0], [1], [0, 0, 1, 1], [], []>} : vector<1x32xf32>, vector<32x32xf32>, vector<1x32xf32> -> vector<1x32xf32>
    %c0_8 = arith.constant 0 : index
    %c0_9 = arith.constant 0 : index
    %c0_10 = arith.constant 0 : index
    %15 = vector.load %arg3[%c0_8, %c0_9, %c0_10] : memref<2x1x32xf32, #tpu.memory_space<vmem>>, vector<1x1x32xf32>
    %16 = vector.shape_cast %15 : vector<1x1x32xf32> to vector<1x32xf32>
    %17 = arith.addf %14, %16 : vector<1x32xf32>
    %cst_11 = arith.constant 0.000000e+00 : f32
    %18 = vector.broadcast %cst_11 : f32 to vector<1x32xf32>
    %19 = arith.cmpf oge, %17, %18 : vector<1x32xf32>
    %cst_12 = arith.constant 2.000000e-01 : f32
    %20 = vector.broadcast %cst_12 : f32 to vector<1x32xf32>
    %21 = arith.mulf %20, %17 : vector<1x32xf32>
    %22 = arith.select %19, %17, %21 : vector<1x32xi1>, vector<1x32xf32>
    %cst_13 = arith.constant 1.41421354 : f32
    %23 = vector.broadcast %cst_13 : f32 to vector<1x32xf32>
    %24 = arith.mulf %22, %23 : vector<1x32xf32>
    %c1 = arith.constant 1 : index
    %c0_14 = arith.constant 0 : index
    %c0_15 = arith.constant 0 : index
    %25 = vector.load %arg2[%c1, %c0_14, %c0_15] : memref<2x32x32xf32, #tpu.memory_space<vmem>>, vector<1x32x32xf32>
    %26 = vector.shape_cast %25 : vector<1x32x32xf32> to vector<32x32xf32>
    %cst_16 = arith.constant dense<0.000000e+00> : vector<1x32xf32>
    %27 = tpu.matmul %24, %26, %cst_16 {dimension_numbers = #tpu.dot_dimension_numbers<[1], [0], [0], [1], [0, 0, 1, 1], [], []>} : vector<1x32xf32>, vector<32x32xf32>, vector<1x32xf32> -> vector<1x32xf32>
    %c1_17 = arith.constant 1 : index
    %c0_18 = arith.constant 0 : index
    %c0_19 = arith.constant 0 : index
    %28 = vector.load %arg3[%c1_17, %c0_18, %c0_19] : memref<2x1x32xf32, #tpu.memory_space<vmem>>, vector<1x1x32xf32>
    %29 = vector.shape_cast %28 : vector<1x1x32xf32> to vector<1x32xf32>
    %30 = arith.addf %27, %29 : vector<1x32xf32>
    %cst_20 = arith.constant 0.000000e+00 : f32
    %31 = vector.broadcast %cst_20 : f32 to vector<1x32xf32>
    %32 = arith.cmpf oge, %30, %31 : vector<1x32xf32>
    %cst_21 = arith.constant 2.000000e-01 : f32
    %33 = vector.broadcast %cst_21 : f32 to vector<1x32xf32>
    %34 = arith.mulf %33, %30 : vector<1x32xf32>
    %35 = arith.select %32, %30, %34 : vector<1x32xi1>, vector<1x32xf32>
    %cst_22 = arith.constant 1.41421354 : f32
    %36 = vector.broadcast %cst_22 : f32 to vector<1x32xf32>
    %37 = arith.mulf %35, %36 : vector<1x32xf32>
    %c0_23 = arith.constant 0 : index
    %c0_24 = arith.constant 0 : index
    %38 = vector.load %arg4[%c0_23, %c0_24] : memref<32x4xf32, #tpu.memory_space<vmem>>, vector<32x4xf32>
    %cst_25 = arith.constant dense<0.000000e+00> : vector<1x4xf32>
    %39 = tpu.matmul %37, %38, %cst_25 {dimension_numbers = #tpu.dot_dimension_numbers<[1], [0], [0], [1], [0, 0, 1, 1], [], []>} : vector<1x32xf32>, vector<32x4xf32>, vector<1x4xf32> -> vector<1x4xf32>
    %c0_26 = arith.constant 0 : index
    %c0_27 = arith.constant 0 : index
    %40 = vector.load %arg5[%c0_26, %c0_27] : memref<1x4xf32, #tpu.memory_space<vmem>>, vector<1x4xf32>
    %41 = arith.addf %39, %40 : vector<1x4xf32>
    %42 = vector.extract_strided_slice %41 {offsets = [0, 0], sizes = [1, 1], strides = [1, 1]} : vector<1x4xf32> to vector<1x1xf32>
    %43 = vector.extract_strided_slice %41 {offsets = [0, 1], sizes = [1, 1], strides = [1, 1]} : vector<1x4xf32> to vector<1x1xf32>
    %44 = vector.extract_strided_slice %41 {offsets = [0, 2], sizes = [1, 1], strides = [1, 1]} : vector<1x4xf32> to vector<1x1xf32>
    %45 = vector.extract_strided_slice %41 {offsets = [0, 3], sizes = [1, 1], strides = [1, 1]} : vector<1x4xf32> to vector<1x1xf32>
    %46 = arith.mulf %42, %42 : vector<1x1xf32>
    %47 = arith.mulf %43, %43 : vector<1x1xf32>
    %48 = arith.addf %46, %47 : vector<1x1xf32>
    %49 = math.rsqrt %48 : vector<1x1xf32>
    %50 = arith.mulf %42, %49 : vector<1x1xf32>
    %51 = arith.mulf %43, %49 : vector<1x1xf32>
    %52 = arith.mulf %44, %49 : vector<1x1xf32>
    %53 = arith.mulf %45, %49 : vector<1x1xf32>
    %cst_28 = arith.constant 0.000000e+00 : f32
    %54 = vector.broadcast %cst_28 : f32 to vector<1x1xf32>
    %55 = arith.subf %54, %50 : vector<1x1xf32>
    %56 = arith.mulf %55, %52 : vector<1x1xf32>
    %57 = arith.mulf %51, %53 : vector<1x1xf32>
    %58 = arith.addf %56, %57 : vector<1x1xf32>
    %cst_29 = arith.constant 0.000000e+00 : f32
    %59 = vector.broadcast %cst_29 : f32 to vector<1x1xf32>
    %60 = arith.subf %59, %51 : vector<1x1xf32>
    %61 = arith.mulf %60, %52 : vector<1x1xf32>
    %62 = arith.mulf %50, %53 : vector<1x1xf32>
    %63 = arith.subf %61, %62 : vector<1x1xf32>
    %c0_30 = arith.constant 0 : index
    %c0_31 = arith.constant 0 : index
    %64 = vector.load %arg6[%c0_30, %c0_31] : memref<3x4xf32, #tpu.memory_space<vmem>>, vector<1x4xf32>
    %c1_32 = arith.constant 1 : index
    %c0_33 = arith.constant 0 : index
    %65 = vector.load %arg6[%c1_32, %c0_33] : memref<3x4xf32, #tpu.memory_space<vmem>>, vector<1x4xf32>
    %c2 = arith.constant 2 : index
    %c0_34 = arith.constant 0 : index
    %66 = vector.load %arg6[%c2, %c0_34] : memref<3x4xf32, #tpu.memory_space<vmem>>, vector<1x4xf32>
    %67 = vector.broadcast %58 : vector<1x1xf32> to vector<1x4xf32>
    %68 = arith.mulf %64, %67 : vector<1x4xf32>
    %69 = arith.addf %66, %68 : vector<1x4xf32>
    %70 = vector.broadcast %63 : vector<1x1xf32> to vector<1x4xf32>
    %71 = arith.mulf %65, %70 : vector<1x4xf32>
    %72 = arith.addf %69, %71 : vector<1x4xf32>
    %73 = vector.broadcast %50 : vector<1x1xf32> to vector<1x4xf32>
    %74 = arith.mulf %64, %73 : vector<1x4xf32>
    %75 = vector.broadcast %51 : vector<1x1xf32> to vector<1x4xf32>
    %76 = arith.mulf %65, %75 : vector<1x4xf32>
    %77 = arith.addf %74, %76 : vector<1x4xf32>
    %cst_35 = arith.constant 0.000000e+00 : f32
    %78 = vector.broadcast %cst_35 : f32 to vector<1x4xf32>
    %79 = arith.subf %78, %64 : vector<1x4xf32>
    %80 = vector.broadcast %51 : vector<1x1xf32> to vector<1x4xf32>
    %81 = arith.mulf %79, %80 : vector<1x4xf32>
    %82 = vector.broadcast %50 : vector<1x1xf32> to vector<1x4xf32>
    %83 = arith.mulf %65, %82 : vector<1x4xf32>
    %84 = arith.addf %81, %83 : vector<1x4xf32>
    %85 = arith.mulf %77, %77 : vector<1x4xf32>
    %86 = arith.mulf %84, %84 : vector<1x4xf32>
    %87 = arith.addf %85, %86 : vector<1x4xf32>
    %88 = math.sqrt %87 : vector<1x4xf32>
    %cst_36 = arith.constant 2.000000e+00 : f32
    %89 = vector.broadcast %cst_36 : f32 to vector<1x4xf32>
    %90 = arith.subf %88, %89 : vector<1x4xf32>
    %cst_37 = arith.constant 6.000000e+00 : f32
    %91 = vector.broadcast %cst_37 : f32 to vector<1x4xf32>
    %92 = arith.divf %90, %91 : vector<1x4xf32>
    %cst_38 = arith.constant 1.000000e+00 : f32
    %93 = vector.broadcast %cst_38 : f32 to vector<1x4xf32>
    %94 = arith.subf %93, %92 : vector<1x4xf32>
    %cst_39 = arith.constant 0.000000e+00 : f32
    %cst_40 = arith.constant 1.000000e+00 : f32
    %95 = vector.broadcast %cst_39 : f32 to vector<1x4xf32>
    %96 = arith.maximumf %95, %94 : vector<1x4xf32>
    %97 = vector.broadcast %cst_40 : f32 to vector<1x4xf32>
    %98 = arith.minimumf %97, %96 : vector<1x4xf32>
    %c0_41 = arith.constant 0 : index
    %c0_42 = arith.constant 0 : index
    %99 = vector.load %arg7[%c0_41, %c0_42] : memref<4x80xf32, #tpu.memory_space<vmem>>, vector<4x80xf32>
    %cst_43 = arith.constant dense<0.000000e+00> : vector<1x80xf32>
    %100 = tpu.matmul %77, %99, %cst_43 {dimension_numbers = #tpu.dot_dimension_numbers<[1], [0], [0], [1], [0, 0, 1, 1], [], []>} : vector<1x4xf32>, vector<4x80xf32>, vector<1x80xf32> -> vector<1x80xf32>
    %cst_44 = arith.constant dense<0.000000e+00> : vector<1x80xf32>
    %101 = tpu.matmul %84, %99, %cst_44 {dimension_numbers = #tpu.dot_dimension_numbers<[1], [0], [0], [1], [0, 0, 1, 1], [], []>} : vector<1x4xf32>, vector<4x80xf32>, vector<1x80xf32> -> vector<1x80xf32>
    %cst_45 = arith.constant dense<0.000000e+00> : vector<1x80xf32>
    %102 = tpu.matmul %72, %99, %cst_45 {dimension_numbers = #tpu.dot_dimension_numbers<[1], [0], [0], [1], [0, 0, 1, 1], [], []>} : vector<1x4xf32>, vector<4x80xf32>, vector<1x80xf32> -> vector<1x80xf32>
    %cst_46 = arith.constant dense<0.000000e+00> : vector<1x80xf32>
    %103 = tpu.matmul %98, %99, %cst_46 {dimension_numbers = #tpu.dot_dimension_numbers<[1], [0], [0], [1], [0, 0, 1, 1], [], []>} : vector<1x4xf32>, vector<4x80xf32>, vector<1x80xf32> -> vector<1x80xf32>
    %c0_47 = arith.constant 0 : index
    %c0_48 = arith.constant 0 : index
    %c0_49 = arith.constant 0 : index
    %104 = vector.load %arg8[%c0_47, %c0_48, %c0_49] : memref<2x20x80xf32, #tpu.memory_space<vmem>>, vector<1x20x80xf32>
    %105 = vector.shape_cast %104 : vector<1x20x80xf32> to vector<20x80xf32>
    %c1_50 = arith.constant 1 : index
    %c0_51 = arith.constant 0 : index
    %c0_52 = arith.constant 0 : index
    %106 = vector.load %arg8[%c1_50, %c0_51, %c0_52] : memref<2x20x80xf32, #tpu.memory_space<vmem>>, vector<1x20x80xf32>
    %107 = vector.shape_cast %106 : vector<1x20x80xf32> to vector<20x80xf32>
    %108 = vector.broadcast %100 : vector<1x80xf32> to vector<20x80xf32>
    %109 = arith.mulf %108, %105 : vector<20x80xf32>
    %110 = vector.broadcast %101 : vector<1x80xf32> to vector<20x80xf32>
    %111 = arith.mulf %110, %107 : vector<20x80xf32>
    %112 = arith.addf %109, %111 : vector<20x80xf32>
    %113 = vector.broadcast %102 : vector<1x80xf32> to vector<20x80xf32>
    %114 = arith.addf %112, %113 : vector<20x80xf32>
    %cst_53 = arith.constant 6.28318548 : f32
    %115 = vector.broadcast %cst_53 : f32 to vector<20x80xf32>
    %116 = arith.mulf %114, %115 : vector<20x80xf32>
    %117 = math.sin %116 : vector<20x80xf32>
    %118 = vector.broadcast %103 : vector<1x80xf32> to vector<20x80xf32>
    %119 = arith.mulf %117, %118 : vector<20x80xf32>
    %c0_54 = arith.constant 0 : index
    %c0_55 = arith.constant 0 : index
    %120 = vector.load %arg9[%c0_54, %c0_55] : memref<80x80xf32, #tpu.memory_space<vmem>>, vector<80x80xf32>
    %cst_56 = arith.constant dense<0.000000e+00> : vector<20x80xf32>
    %121 = tpu.matmul %119, %120, %cst_56 {dimension_numbers = #tpu.dot_dimension_numbers<[1], [0], [0], [1], [0, 0, 1, 1], [], []>} : vector<20x80xf32>, vector<80x80xf32>, vector<20x80xf32> -> vector<20x80xf32>
    %c0_57 = arith.constant 0 : index
    %c0_58 = arith.constant 0 : index
    %122 = vector.load %arg10[%c0_57, %c0_58] : memref<32x4xf32, #tpu.memory_space<vmem>>, vector<32x4xf32>
    %cst_59 = arith.constant dense<0.000000e+00> : vector<1x4xf32>
    %123 = tpu.matmul %37, %122, %cst_59 {dimension_numbers = #tpu.dot_dimension_numbers<[1], [0], [0], [1], [0, 0, 1, 1], [], []>} : vector<1x32xf32>, vector<32x4xf32>, vector<1x4xf32> -> vector<1x4xf32>
    %c0_60 = arith.constant 0 : index
    %c0_61 = arith.constant 0 : index
    %124 = vector.load %arg11[%c0_60, %c0_61] : memref<1x4xf32, #tpu.memory_space<vmem>>, vector<1x4xf32>
    %125 = arith.addf %123, %124 : vector<1x4xf32>
    %126 = arith.mulf %125, %125 : vector<1x4xf32>
    %c0_62 = arith.constant 0 : index
    %c0_63 = arith.constant 0 : index
    %127 = vector.load %arg12[%c0_62, %c0_63] : memref<4x4xf32, #tpu.memory_space<vmem>>, vector<4x4xf32>
    %cst_64 = arith.constant dense<0.000000e+00> : vector<1x4xf32>
    %128 = tpu.matmul %126, %127, %cst_64 {dimension_numbers = #tpu.dot_dimension_numbers<[1], [0], [0], [1], [0, 0, 1, 1], [], []>} : vector<1x4xf32>, vector<4x4xf32>, vector<1x4xf32> -> vector<1x4xf32>
    %cst_65 = arith.constant 9.99999993E-9 : f32
    %129 = vector.broadcast %cst_65 : f32 to vector<1x4xf32>
    %130 = arith.addf %128, %129 : vector<1x4xf32>
    %131 = math.rsqrt %130 : vector<1x4xf32>
    %c0_66 = arith.constant 0 : index
    %c0_67 = arith.constant 0 : index
    %132 = vector.load %arg13[%c0_66, %c0_67] : memref<4x80xf32, #tpu.memory_space<vmem>>, vector<4x80xf32>
    %cst_68 = arith.constant dense<0.000000e+00> : vector<1x80xf32>
    %133 = tpu.matmul %125, %132, %cst_68 {dimension_numbers = #tpu.dot_dimension_numbers<[1], [0], [0], [1], [0, 0, 1, 1], [], []>} : vector<1x4xf32>, vector<4x80xf32>, vector<1x80xf32> -> vector<1x80xf32>
    %c0_69 = arith.constant 0 : index
    %c0_70 = arith.constant 0 : index
    %134 = vector.load %arg14[%c0_69, %c0_70] : memref<4x88xf32, #tpu.memory_space<vmem>>, vector<4x88xf32>
    %cst_71 = arith.constant dense<0.000000e+00> : vector<1x88xf32>
    %135 = tpu.matmul %131, %134, %cst_71 {dimension_numbers = #tpu.dot_dimension_numbers<[1], [0], [0], [1], [0, 0, 1, 1], [], []>} : vector<1x4xf32>, vector<4x88xf32>, vector<1x88xf32> -> vector<1x88xf32>
    %136 = vector.broadcast %133 : vector<1x80xf32> to vector<20x80xf32>
    %137 = arith.mulf %121, %136 : vector<20x80xf32>
    %cst_72 = arith.constant 0.000000e+00 : f32
    %138 = vector.broadcast %cst_72 : f32 to vector<2x80xf32>
    %139 = tpu.concatenate %138, %137, %138 in 0 : vector<2x80xf32>, vector<20x80xf32>, vector<2x80xf32> -> vector<24x80xf32>
    %140 = vector.extract_strided_slice %139 {offsets = [0, 0], sizes = [22, 80], strides = [1, 1]} : vector<24x80xf32> to vector<22x80xf32>
    %c0_73 = arith.constant 0 : index
    %c0_74 = arith.constant 0 : index
    %c0_75 = arith.constant 0 : index
    %141 = vector.load %arg15[%c0_73, %c0_74, %c0_75] : memref<3x80x88xf32, #tpu.memory_space<vmem>>, vector<1x80x88xf32>
    %142 = vector.shape_cast %141 : vector<1x80x88xf32> to vector<80x88xf32>
    %cst_76 = arith.constant dense<0.000000e+00> : vector<22x88xf32>
    %143 = tpu.matmul %140, %142, %cst_76 {dimension_numbers = #tpu.dot_dimension_numbers<[1], [0], [0], [1], [0, 0, 1, 1], [], []>} : vector<22x80xf32>, vector<80x88xf32>, vector<22x88xf32> -> vector<22x88xf32>
    %144 = vector.extract_strided_slice %139 {offsets = [1, 0], sizes = [22, 80], strides = [1, 1]} : vector<24x80xf32> to vector<22x80xf32>
    %c1_77 = arith.constant 1 : index
    %c0_78 = arith.constant 0 : index
    %c0_79 = arith.constant 0 : index
    %145 = vector.load %arg15[%c1_77, %c0_78, %c0_79] : memref<3x80x88xf32, #tpu.memory_space<vmem>>, vector<1x80x88xf32>
    %146 = vector.shape_cast %145 : vector<1x80x88xf32> to vector<80x88xf32>
    %cst_80 = arith.constant dense<0.000000e+00> : vector<22x88xf32>
    %147 = tpu.matmul %144, %146, %cst_80 {dimension_numbers = #tpu.dot_dimension_numbers<[1], [0], [0], [1], [0, 0, 1, 1], [], []>} : vector<22x80xf32>, vector<80x88xf32>, vector<22x88xf32> -> vector<22x88xf32>
    %148 = arith.addf %143, %147 : vector<22x88xf32>
    %149 = vector.extract_strided_slice %139 {offsets = [2, 0], sizes = [22, 80], strides = [1, 1]} : vector<24x80xf32> to vector<22x80xf32>
    %c2_81 = arith.constant 2 : index
    %c0_82 = arith.constant 0 : index
    %c0_83 = arith.constant 0 : index
    %150 = vector.load %arg15[%c2_81, %c0_82, %c0_83] : memref<3x80x88xf32, #tpu.memory_space<vmem>>, vector<1x80x88xf32>
    %151 = vector.shape_cast %150 : vector<1x80x88xf32> to vector<80x88xf32>
    %cst_84 = arith.constant dense<0.000000e+00> : vector<22x88xf32>
    %152 = tpu.matmul %149, %151, %cst_84 {dimension_numbers = #tpu.dot_dimension_numbers<[1], [0], [0], [1], [0, 0, 1, 1], [], []>} : vector<22x80xf32>, vector<80x88xf32>, vector<22x88xf32> -> vector<22x88xf32>
    %153 = arith.addf %148, %152 : vector<22x88xf32>
    %154 = vector.broadcast %135 : vector<1x88xf32> to vector<22x88xf32>
    %155 = arith.mulf %153, %154 : vector<22x88xf32>
    %c0_85 = arith.constant 0 : index
    %c0_86 = arith.constant 0 : index
    %156 = vector.load %arg16[%c0_85, %c0_86] : memref<1x88xf32, #tpu.memory_space<vmem>>, vector<1x88xf32>
    %157 = vector.broadcast %156 : vector<1x88xf32> to vector<22x88xf32>
    %158 = arith.addf %155, %157 : vector<22x88xf32>
    %c0_87 = arith.constant 0 : index
    %c0_88 = arith.constant 0 : index
    %159 = vector.load %arg17[%c0_87, %c0_88] : memref<50x22xf32, #tpu.memory_space<vmem>>, vector<50x22xf32>
    %cst_89 = arith.constant dense<0.000000e+00> : vector<50x88xf32>
    %160 = tpu.matmul %159, %158, %cst_89 {dimension_numbers = #tpu.dot_dimension_numbers<[1], [0], [0], [1], [0, 0, 1, 1], [], []>} : vector<50x22xf32>, vector<22x88xf32>, vector<50x88xf32> -> vector<50x88xf32>
    %c0_90 = arith.constant 0 : index
    %c0_91 = arith.constant 0 : index
    %161 = vector.load %arg19[%c0_90, %c0_91] : memref<88x200xf32, #tpu.memory_space<vmem>>, vector<88x200xf32>
    %cst_92 = arith.constant dense<0.000000e+00> : vector<50x200xf32>
    %162 = tpu.matmul %160, %161, %cst_92 {dimension_numbers = #tpu.dot_dimension_numbers<[1], [0], [0], [1], [0, 0, 1, 1], [], []>} : vector<50x88xf32>, vector<88x200xf32>, vector<50x200xf32> -> vector<50x200xf32>
    %cst_93 = arith.constant 0.000000e+00 : f32
    %163 = vector.broadcast %cst_93 : f32 to vector<50x200xf32>
    %164 = arith.cmpf oge, %162, %163 : vector<50x200xf32>
    %cst_94 = arith.constant 2.000000e-01 : f32
    %165 = vector.broadcast %cst_94 : f32 to vector<50x200xf32>
    %166 = arith.mulf %165, %162 : vector<50x200xf32>
    %167 = arith.select %164, %162, %166 : vector<50x200xi1>, vector<50x200xf32>
    %cst_95 = arith.constant 1.41421354 : f32
    %168 = vector.broadcast %cst_95 : f32 to vector<50x200xf32>
    %169 = arith.mulf %167, %168 : vector<50x200xf32>
    %c0_96 = arith.constant 0 : index
    %c0_97 = arith.constant 0 : index
    %170 = vector.load %arg18[%c0_96, %c0_97] : memref<20x50xf32, #tpu.memory_space<vmem>>, vector<20x50xf32>
    %cst_98 = arith.constant dense<0.000000e+00> : vector<20x200xf32>
    %171 = tpu.matmul %170, %169, %cst_98 {dimension_numbers = #tpu.dot_dimension_numbers<[1], [0], [0], [1], [0, 0, 1, 1], [], []>} : vector<20x50xf32>, vector<50x200xf32>, vector<20x200xf32> -> vector<20x200xf32>
    %c0_99 = arith.constant 0 : index
    %c0_100 = arith.constant 0 : index
    %172 = vector.load %arg20[%c0_99, %c0_100] : memref<200x80xf32, #tpu.memory_space<vmem>>, vector<200x80xf32>
    %cst_101 = arith.constant dense<0.000000e+00> : vector<20x80xf32>
    %173 = tpu.matmul %171, %172, %cst_101 {dimension_numbers = #tpu.dot_dimension_numbers<[1], [0], [0], [1], [0, 0, 1, 1], [], []>} : vector<20x200xf32>, vector<200x80xf32>, vector<20x80xf32> -> vector<20x80xf32>
    %c0_102 = arith.constant 0 : index
    %c0_103 = arith.constant 0 : index
    %174 = vector.load %arg21[%c0_102, %c0_103] : memref<32x4xf32, #tpu.memory_space<vmem>>, vector<32x4xf32>
    %cst_104 = arith.constant dense<0.000000e+00> : vector<1x4xf32>
    %175 = tpu.matmul %37, %174, %cst_104 {dimension_numbers = #tpu.dot_dimension_numbers<[1], [0], [0], [1], [0, 0, 1, 1], [], []>} : vector<1x32xf32>, vector<32x4xf32>, vector<1x4xf32> -> vector<1x4xf32>
    %c0_105 = arith.constant 0 : index
    %c0_106 = arith.constant 0 : index
    %176 = vector.load %arg22[%c0_105, %c0_106] : memref<1x4xf32, #tpu.memory_space<vmem>>, vector<1x4xf32>
    %177 = arith.addf %175, %176 : vector<1x4xf32>
    %178 = arith.mulf %177, %177 : vector<1x4xf32>
    %c0_107 = arith.constant 0 : index
    %c0_108 = arith.constant 0 : index
    %179 = vector.load %arg23[%c0_107, %c0_108] : memref<4x4xf32, #tpu.memory_space<vmem>>, vector<4x4xf32>
    %cst_109 = arith.constant dense<0.000000e+00> : vector<1x4xf32>
    %180 = tpu.matmul %178, %179, %cst_109 {dimension_numbers = #tpu.dot_dimension_numbers<[1], [0], [0], [1], [0, 0, 1, 1], [], []>} : vector<1x4xf32>, vector<4x4xf32>, vector<1x4xf32> -> vector<1x4xf32>
    %cst_110 = arith.constant 9.99999993E-9 : f32
    %181 = vector.broadcast %cst_110 : f32 to vector<1x4xf32>
    %182 = arith.addf %180, %181 : vector<1x4xf32>
    %183 = math.rsqrt %182 : vector<1x4xf32>
    %c0_111 = arith.constant 0 : index
    %c0_112 = arith.constant 0 : index
    %184 = vector.load %arg24[%c0_111, %c0_112] : memref<4x80xf32, #tpu.memory_space<vmem>>, vector<4x80xf32>
    %cst_113 = arith.constant dense<0.000000e+00> : vector<1x80xf32>
    %185 = tpu.matmul %177, %184, %cst_113 {dimension_numbers = #tpu.dot_dimension_numbers<[1], [0], [0], [1], [0, 0, 1, 1], [], []>} : vector<1x4xf32>, vector<4x80xf32>, vector<1x80xf32> -> vector<1x80xf32>
    %c0_114 = arith.constant 0 : index
    %c0_115 = arith.constant 0 : index
    %186 = vector.load %arg25[%c0_114, %c0_115] : memref<4x88xf32, #tpu.memory_space<vmem>>, vector<4x88xf32>
    %cst_116 = arith.constant dense<0.000000e+00> : vector<1x88xf32>
    %187 = tpu.matmul %183, %186, %cst_116 {dimension_numbers = #tpu.dot_dimension_numbers<[1], [0], [0], [1], [0, 0, 1, 1], [], []>} : vector<1x4xf32>, vector<4x88xf32>, vector<1x88xf32> -> vector<1x88xf32>
    %188 = vector.broadcast %185 : vector<1x80xf32> to vector<20x80xf32>
    %189 = arith.mulf %173, %188 : vector<20x80xf32>
    %cst_117 = arith.constant 0.000000e+00 : f32
    %190 = vector.broadcast %cst_117 : f32 to vector<2x80xf32>
    %191 = tpu.concatenate %190, %189, %190 in 0 : vector<2x80xf32>, vector<20x80xf32>, vector<2x80xf32> -> vector<24x80xf32>
    %192 = vector.extract_strided_slice %191 {offsets = [0, 0], sizes = [22, 80], strides = [1, 1]} : vector<24x80xf32> to vector<22x80xf32>
    %c0_118 = arith.constant 0 : index
    %c0_119 = arith.constant 0 : index
    %c0_120 = arith.constant 0 : index
    %193 = vector.load %arg26[%c0_118, %c0_119, %c0_120] : memref<3x80x88xf32, #tpu.memory_space<vmem>>, vector<1x80x88xf32>
    %194 = vector.shape_cast %193 : vector<1x80x88xf32> to vector<80x88xf32>
    %cst_121 = arith.constant dense<0.000000e+00> : vector<22x88xf32>
    %195 = tpu.matmul %192, %194, %cst_121 {dimension_numbers = #tpu.dot_dimension_numbers<[1], [0], [0], [1], [0, 0, 1, 1], [], []>} : vector<22x80xf32>, vector<80x88xf32>, vector<22x88xf32> -> vector<22x88xf32>
    %196 = vector.extract_strided_slice %191 {offsets = [1, 0], sizes = [22, 80], strides = [1, 1]} : vector<24x80xf32> to vector<22x80xf32>
    %c1_122 = arith.constant 1 : index
    %c0_123 = arith.constant 0 : index
    %c0_124 = arith.constant 0 : index
    %197 = vector.load %arg26[%c1_122, %c0_123, %c0_124] : memref<3x80x88xf32, #tpu.memory_space<vmem>>, vector<1x80x88xf32>
    %198 = vector.shape_cast %197 : vector<1x80x88xf32> to vector<80x88xf32>
    %cst_125 = arith.constant dense<0.000000e+00> : vector<22x88xf32>
    %199 = tpu.matmul %196, %198, %cst_125 {dimension_numbers = #tpu.dot_dimension_numbers<[1], [0], [0], [1], [0, 0, 1, 1], [], []>} : vector<22x80xf32>, vector<80x88xf32>, vector<22x88xf32> -> vector<22x88xf32>
    %200 = arith.addf %195, %199 : vector<22x88xf32>
    %201 = vector.extract_strided_slice %191 {offsets = [2, 0], sizes = [22, 80], strides = [1, 1]} : vector<24x80xf32> to vector<22x80xf32>
    %c2_126 = arith.constant 2 : index
    %c0_127 = arith.constant 0 : index
    %c0_128 = arith.constant 0 : index
    %202 = vector.load %arg26[%c2_126, %c0_127, %c0_128] : memref<3x80x88xf32, #tpu.memory_space<vmem>>, vector<1x80x88xf32>
    %203 = vector.shape_cast %202 : vector<1x80x88xf32> to vector<80x88xf32>
    %cst_129 = arith.constant dense<0.000000e+00> : vector<22x88xf32>
    %204 = tpu.matmul %201, %203, %cst_129 {dimension_numbers = #tpu.dot_dimension_numbers<[1], [0], [0], [1], [0, 0, 1, 1], [], []>} : vector<22x80xf32>, vector<80x88xf32>, vector<22x88xf32> -> vector<22x88xf32>
    %205 = arith.addf %200, %204 : vector<22x88xf32>
    %206 = vector.broadcast %187 : vector<1x88xf32> to vector<22x88xf32>
    %207 = arith.mulf %205, %206 : vector<22x88xf32>
    %c0_130 = arith.constant 0 : index
    %c0_131 = arith.constant 0 : index
    %208 = vector.load %arg27[%c0_130, %c0_131] : memref<1x88xf32, #tpu.memory_space<vmem>>, vector<1x88xf32>
    %209 = vector.broadcast %208 : vector<1x88xf32> to vector<22x88xf32>
    %210 = arith.addf %207, %209 : vector<22x88xf32>
    %c0_132 = arith.constant 0 : index
    %c0_133 = arith.constant 0 : index
    %211 = vector.load %arg28[%c0_132, %c0_133] : memref<50x22xf32, #tpu.memory_space<vmem>>, vector<50x22xf32>
    %cst_134 = arith.constant dense<0.000000e+00> : vector<50x88xf32>
    %212 = tpu.matmul %211, %210, %cst_134 {dimension_numbers = #tpu.dot_dimension_numbers<[1], [0], [0], [1], [0, 0, 1, 1], [], []>} : vector<50x22xf32>, vector<22x88xf32>, vector<50x88xf32> -> vector<50x88xf32>
    %c0_135 = arith.constant 0 : index
    %c0_136 = arith.constant 0 : index
    %213 = vector.load %arg30[%c0_135, %c0_136] : memref<88x200xf32, #tpu.memory_space<vmem>>, vector<88x200xf32>
    %cst_137 = arith.constant dense<0.000000e+00> : vector<50x200xf32>
    %214 = tpu.matmul %212, %213, %cst_137 {dimension_numbers = #tpu.dot_dimension_numbers<[1], [0], [0], [1], [0, 0, 1, 1], [], []>} : vector<50x88xf32>, vector<88x200xf32>, vector<50x200xf32> -> vector<50x200xf32>
    %cst_138 = arith.constant 0.000000e+00 : f32
    %215 = vector.broadcast %cst_138 : f32 to vector<50x200xf32>
    %216 = arith.cmpf oge, %214, %215 : vector<50x200xf32>
    %cst_139 = arith.constant 2.000000e-01 : f32
    %217 = vector.broadcast %cst_139 : f32 to vector<50x200xf32>
    %218 = arith.mulf %217, %214 : vector<50x200xf32>
    %219 = arith.select %216, %214, %218 : vector<50x200xi1>, vector<50x200xf32>
    %cst_140 = arith.constant 1.41421354 : f32
    %220 = vector.broadcast %cst_140 : f32 to vector<50x200xf32>
    %221 = arith.mulf %219, %220 : vector<50x200xf32>
    %c0_141 = arith.constant 0 : index
    %c0_142 = arith.constant 0 : index
    %222 = vector.load %arg29[%c0_141, %c0_142] : memref<20x50xf32, #tpu.memory_space<vmem>>, vector<20x50xf32>
    %cst_143 = arith.constant dense<0.000000e+00> : vector<20x200xf32>
    %223 = tpu.matmul %222, %221, %cst_143 {dimension_numbers = #tpu.dot_dimension_numbers<[1], [0], [0], [1], [0, 0, 1, 1], [], []>} : vector<20x50xf32>, vector<50x200xf32>, vector<20x200xf32> -> vector<20x200xf32>
    %c0_144 = arith.constant 0 : index
    %c0_145 = arith.constant 0 : index
    %224 = vector.load %arg31[%c0_144, %c0_145] : memref<200x80xf32, #tpu.memory_space<vmem>>, vector<200x80xf32>
    %cst_146 = arith.constant dense<0.000000e+00> : vector<20x80xf32>
    %225 = tpu.matmul %223, %224, %cst_146 {dimension_numbers = #tpu.dot_dimension_numbers<[1], [0], [0], [1], [0, 0, 1, 1], [], []>} : vector<20x200xf32>, vector<200x80xf32>, vector<20x80xf32> -> vector<20x80xf32>
    %c0_147 = arith.constant 0 : index
    %c0_148 = arith.constant 0 : index
    %226 = vector.load %arg32[%c0_147, %c0_148] : memref<32x4xf32, #tpu.memory_space<vmem>>, vector<32x4xf32>
    %cst_149 = arith.constant dense<0.000000e+00> : vector<1x4xf32>
    %227 = tpu.matmul %37, %226, %cst_149 {dimension_numbers = #tpu.dot_dimension_numbers<[1], [0], [0], [1], [0, 0, 1, 1], [], []>} : vector<1x32xf32>, vector<32x4xf32>, vector<1x4xf32> -> vector<1x4xf32>
    %c0_150 = arith.constant 0 : index
    %c0_151 = arith.constant 0 : index
    %228 = vector.load %arg33[%c0_150, %c0_151] : memref<1x4xf32, #tpu.memory_space<vmem>>, vector<1x4xf32>
    %229 = arith.addf %227, %228 : vector<1x4xf32>
    %230 = arith.mulf %229, %229 : vector<1x4xf32>
    %c0_152 = arith.constant 0 : index
    %c0_153 = arith.constant 0 : index
    %231 = vector.load %arg34[%c0_152, %c0_153] : memref<4x4xf32, #tpu.memory_space<vmem>>, vector<4x4xf32>
    %cst_154 = arith.constant dense<0.000000e+00> : vector<1x4xf32>
    %232 = tpu.matmul %230, %231, %cst_154 {dimension_numbers = #tpu.dot_dimension_numbers<[1], [0], [0], [1], [0, 0, 1, 1], [], []>} : vector<1x4xf32>, vector<4x4xf32>, vector<1x4xf32> -> vector<1x4xf32>
    %cst_155 = arith.constant 9.99999993E-9 : f32
    %233 = vector.broadcast %cst_155 : f32 to vector<1x4xf32>
    %234 = arith.addf %232, %233 : vector<1x4xf32>
    %235 = math.rsqrt %234 : vector<1x4xf32>
    %c0_156 = arith.constant 0 : index
    %c0_157 = arith.constant 0 : index
    %236 = vector.load %arg35[%c0_156, %c0_157] : memref<4x80xf32, #tpu.memory_space<vmem>>, vector<4x80xf32>
    %cst_158 = arith.constant dense<0.000000e+00> : vector<1x80xf32>
    %237 = tpu.matmul %229, %236, %cst_158 {dimension_numbers = #tpu.dot_dimension_numbers<[1], [0], [0], [1], [0, 0, 1, 1], [], []>} : vector<1x4xf32>, vector<4x80xf32>, vector<1x80xf32> -> vector<1x80xf32>
    %c0_159 = arith.constant 0 : index
    %c0_160 = arith.constant 0 : index
    %238 = vector.load %arg36[%c0_159, %c0_160] : memref<4x88xf32, #tpu.memory_space<vmem>>, vector<4x88xf32>
    %cst_161 = arith.constant dense<0.000000e+00> : vector<1x88xf32>
    %239 = tpu.matmul %235, %238, %cst_161 {dimension_numbers = #tpu.dot_dimension_numbers<[1], [0], [0], [1], [0, 0, 1, 1], [], []>} : vector<1x4xf32>, vector<4x88xf32>, vector<1x88xf32> -> vector<1x88xf32>
    %240 = vector.broadcast %237 : vector<1x80xf32> to vector<20x80xf32>
    %241 = arith.mulf %225, %240 : vector<20x80xf32>
    %cst_162 = arith.constant 0.000000e+00 : f32
    %242 = vector.broadcast %cst_162 : f32 to vector<2x80xf32>
    %243 = tpu.concatenate %242, %241, %242 in 0 : vector<2x80xf32>, vector<20x80xf32>, vector<2x80xf32> -> vector<24x80xf32>
    %244 = vector.extract_strided_slice %243 {offsets = [0, 0], sizes = [22, 80], strides = [1, 1]} : vector<24x80xf32> to vector<22x80xf32>
    %c0_163 = arith.constant 0 : index
    %c0_164 = arith.constant 0 : index
    %c0_165 = arith.constant 0 : index
    %245 = vector.load %arg37[%c0_163, %c0_164, %c0_165] : memref<3x80x88xf32, #tpu.memory_space<vmem>>, vector<1x80x88xf32>
    %246 = vector.shape_cast %245 : vector<1x80x88xf32> to vector<80x88xf32>
    %cst_166 = arith.constant dense<0.000000e+00> : vector<22x88xf32>
    %247 = tpu.matmul %244, %246, %cst_166 {dimension_numbers = #tpu.dot_dimension_numbers<[1], [0], [0], [1], [0, 0, 1, 1], [], []>} : vector<22x80xf32>, vector<80x88xf32>, vector<22x88xf32> -> vector<22x88xf32>
    %248 = vector.extract_strided_slice %243 {offsets = [1, 0], sizes = [22, 80], strides = [1, 1]} : vector<24x80xf32> to vector<22x80xf32>
    %c1_167 = arith.constant 1 : index
    %c0_168 = arith.constant 0 : index
    %c0_169 = arith.constant 0 : index
    %249 = vector.load %arg37[%c1_167, %c0_168, %c0_169] : memref<3x80x88xf32, #tpu.memory_space<vmem>>, vector<1x80x88xf32>
    %250 = vector.shape_cast %249 : vector<1x80x88xf32> to vector<80x88xf32>
    %cst_170 = arith.constant dense<0.000000e+00> : vector<22x88xf32>
    %251 = tpu.matmul %248, %250, %cst_170 {dimension_numbers = #tpu.dot_dimension_numbers<[1], [0], [0], [1], [0, 0, 1, 1], [], []>} : vector<22x80xf32>, vector<80x88xf32>, vector<22x88xf32> -> vector<22x88xf32>
    %252 = arith.addf %247, %251 : vector<22x88xf32>
    %253 = vector.extract_strided_slice %243 {offsets = [2, 0], sizes = [22, 80], strides = [1, 1]} : vector<24x80xf32> to vector<22x80xf32>
    %c2_171 = arith.constant 2 : index
    %c0_172 = arith.constant 0 : index
    %c0_173 = arith.constant 0 : index
    %254 = vector.load %arg37[%c2_171, %c0_172, %c0_173] : memref<3x80x88xf32, #tpu.memory_space<vmem>>, vector<1x80x88xf32>
    %255 = vector.shape_cast %254 : vector<1x80x88xf32> to vector<80x88xf32>
    %cst_174 = arith.constant dense<0.000000e+00> : vector<22x88xf32>
    %256 = tpu.matmul %253, %255, %cst_174 {dimension_numbers = #tpu.dot_dimension_numbers<[1], [0], [0], [1], [0, 0, 1, 1], [], []>} : vector<22x80xf32>, vector<80x88xf32>, vector<22x88xf32> -> vector<22x88xf32>
    %257 = arith.addf %252, %256 : vector<22x88xf32>
    %258 = vector.broadcast %239 : vector<1x88xf32> to vector<22x88xf32>
    %259 = arith.mulf %257, %258 : vector<22x88xf32>
    %c0_175 = arith.constant 0 : index
    %c0_176 = arith.constant 0 : index
    %260 = vector.load %arg38[%c0_175, %c0_176] : memref<1x88xf32, #tpu.memory_space<vmem>>, vector<1x88xf32>
    %261 = vector.broadcast %260 : vector<1x88xf32> to vector<22x88xf32>
    %262 = arith.addf %259, %261 : vector<22x88xf32>
    %c0_177 = arith.constant 0 : index
    %c0_178 = arith.constant 0 : index
    %263 = vector.load %arg39[%c0_177, %c0_178] : memref<42x22xf32, #tpu.memory_space<vmem>>, vector<42x22xf32>
    %cst_179 = arith.constant dense<0.000000e+00> : vector<42x88xf32>
    %264 = tpu.matmul %263, %262, %cst_179 {dimension_numbers = #tpu.dot_dimension_numbers<[1], [0], [0], [1], [0, 0, 1, 1], [], []>} : vector<42x22xf32>, vector<22x88xf32>, vector<42x88xf32> -> vector<42x88xf32>
    %c0_180 = arith.constant 0 : index
    %c0_181 = arith.constant 0 : index
    %265 = vector.load %arg41[%c0_180, %c0_181] : memref<88x168xf32, #tpu.memory_space<vmem>>, vector<88x168xf32>
    %cst_182 = arith.constant dense<0.000000e+00> : vector<42x168xf32>
    %266 = tpu.matmul %264, %265, %cst_182 {dimension_numbers = #tpu.dot_dimension_numbers<[1], [0], [0], [1], [0, 0, 1, 1], [], []>} : vector<42x88xf32>, vector<88x168xf32>, vector<42x168xf32> -> vector<42x168xf32>
    %cst_183 = arith.constant 0.000000e+00 : f32
    %267 = vector.broadcast %cst_183 : f32 to vector<42x168xf32>
    %268 = arith.cmpf oge, %266, %267 : vector<42x168xf32>
    %cst_184 = arith.constant 2.000000e-01 : f32
    %269 = vector.broadcast %cst_184 : f32 to vector<42x168xf32>
    %270 = arith.mulf %269, %266 : vector<42x168xf32>
    %271 = arith.select %268, %266, %270 : vector<42x168xi1>, vector<42x168xf32>
    %cst_185 = arith.constant 1.41421354 : f32
    %272 = vector.broadcast %cst_185 : f32 to vector<42x168xf32>
    %273 = arith.mulf %271, %272 : vector<42x168xf32>
    %c0_186 = arith.constant 0 : index
    %c0_187 = arith.constant 0 : index
    %274 = vector.load %arg40[%c0_186, %c0_187] : memref<16x42xf32, #tpu.memory_space<vmem>>, vector<16x42xf32>
    %cst_188 = arith.constant dense<0.000000e+00> : vector<16x168xf32>
    %275 = tpu.matmul %274, %273, %cst_188 {dimension_numbers = #tpu.dot_dimension_numbers<[1], [0], [0], [1], [0, 0, 1, 1], [], []>} : vector<16x42xf32>, vector<42x168xf32>, vector<16x168xf32> -> vector<16x168xf32>
    %c0_189 = arith.constant 0 : index
    %c0_190 = arith.constant 0 : index
    %276 = vector.load %arg42[%c0_189, %c0_190] : memref<168x64xf32, #tpu.memory_space<vmem>>, vector<168x64xf32>
    %cst_191 = arith.constant dense<0.000000e+00> : vector<16x64xf32>
    %277 = tpu.matmul %275, %276, %cst_191 {dimension_numbers = #tpu.dot_dimension_numbers<[1], [0], [0], [1], [0, 0, 1, 1], [], []>} : vector<16x168xf32>, vector<168x64xf32>, vector<16x64xf32> -> vector<16x64xf32>
    %c0_192 = arith.constant 0 : index
    %c0_193 = arith.constant 0 : index
    %278 = vector.load %arg43[%c0_192, %c0_193] : memref<32x4xf32, #tpu.memory_space<vmem>>, vector<32x4xf32>
    %cst_194 = arith.constant dense<0.000000e+00> : vector<1x4xf32>
    %279 = tpu.matmul %37, %278, %cst_194 {dimension_numbers = #tpu.dot_dimension_numbers<[1], [0], [0], [1], [0, 0, 1, 1], [], []>} : vector<1x32xf32>, vector<32x4xf32>, vector<1x4xf32> -> vector<1x4xf32>
    %c0_195 = arith.constant 0 : index
    %c0_196 = arith.constant 0 : index
    %280 = vector.load %arg44[%c0_195, %c0_196] : memref<1x4xf32, #tpu.memory_space<vmem>>, vector<1x4xf32>
    %281 = arith.addf %279, %280 : vector<1x4xf32>
    %cst_197 = arith.constant 5.000000e-01 : f32
    %282 = vector.broadcast %cst_197 : f32 to vector<1x4xf32>
    %283 = arith.mulf %281, %282 : vector<1x4xf32>
    %c0_198 = arith.constant 0 : index
    %c0_199 = arith.constant 0 : index
    %284 = vector.load %arg45[%c0_198, %c0_199] : memref<4x64xf32, #tpu.memory_space<vmem>>, vector<4x64xf32>
    %cst_200 = arith.constant dense<0.000000e+00> : vector<1x64xf32>
    %285 = tpu.matmul %283, %284, %cst_200 {dimension_numbers = #tpu.dot_dimension_numbers<[1], [0], [0], [1], [0, 0, 1, 1], [], []>} : vector<1x4xf32>, vector<4x64xf32>, vector<1x64xf32> -> vector<1x64xf32>
    %286 = vector.broadcast %285 : vector<1x64xf32> to vector<16x64xf32>
    %287 = arith.mulf %277, %286 : vector<16x64xf32>
    %c0_201 = arith.constant 0 : index
    %c0_202 = arith.constant 0 : index
    %288 = vector.load %arg46[%c0_201, %c0_202] : memref<64x48xf32, #tpu.memory_space<vmem>>, vector<64x48xf32>
    %cst_203 = arith.constant dense<0.000000e+00> : vector<16x48xf32>
    %289 = tpu.matmul %287, %288, %cst_203 {dimension_numbers = #tpu.dot_dimension_numbers<[1], [0], [0], [1], [0, 0, 1, 1], [], []>} : vector<16x64xf32>, vector<64x48xf32>, vector<16x48xf32> -> vector<16x48xf32>
    %c0_204 = arith.constant 0 : index
    %c0_205 = arith.constant 0 : index
    %290 = vector.load %arg47[%c0_204, %c0_205] : memref<1x48xf32, #tpu.memory_space<vmem>>, vector<1x48xf32>
    %291 = vector.broadcast %290 : vector<1x48xf32> to vector<16x48xf32>
    %292 = arith.addf %289, %291 : vector<16x48xf32>
    %cst_206 = arith.constant 2.500000e-01 : f32
    %293 = vector.broadcast %cst_206 : f32 to vector<16x48xf32>
    %294 = arith.mulf %292, %293 : vector<16x48xf32>
    %295 = vector.extract_strided_slice %294 {offsets = [0, 0], sizes = [16, 16], strides = [1, 1]} : vector<16x48xf32> to vector<16x16xf32>
    %c0_207 = arith.constant 0 : index
    %c0_208 = arith.constant 0 : index
    %c0_209 = arith.constant 0 : index
    %c0_210 = arith.constant 0 : index
    %296 = vector.load %arg48[%c0_207, %c0_208, %c0_209, %c0_210] : memref<1x3x16x16xf32, #tpu.memory_space<vmem>>, vector<1x1x16x16xf32>
    %297 = vector.shape_cast %296 : vector<1x1x16x16xf32> to vector<16x16xf32>
    %298 = vector.shape_cast %295 : vector<16x16xf32> to vector<1x1x16x16xf32>
    tpu.vector_store %arg48[%c0_207, %c0_208, %c0_209, %c0_210], %298 {strides = array<i32>} : memref<1x3x16x16xf32, #tpu.memory_space<vmem>>, vector<1x1x16x16xf32>,
    %299 = vector.extract_strided_slice %294 {offsets = [0, 16], sizes = [16, 16], strides = [1, 1]} : vector<16x48xf32> to vector<16x16xf32>
    %c0_211 = arith.constant 0 : index
    %c1_212 = arith.constant 1 : index
    %c0_213 = arith.constant 0 : index
    %c0_214 = arith.constant 0 : index
    %300 = vector.load %arg48[%c0_211, %c1_212, %c0_213, %c0_214] : memref<1x3x16x16xf32, #tpu.memory_space<vmem>>, vector<1x1x16x16xf32>
    %301 = vector.shape_cast %300 : vector<1x1x16x16xf32> to vector<16x16xf32>
    %302 = vector.shape_cast %299 : vector<16x16xf32> to vector<1x1x16x16xf32>
    tpu.vector_store %arg48[%c0_211, %c1_212, %c0_213, %c0_214], %302 {strides = array<i32>} : memref<1x3x16x16xf32, #tpu.memory_space<vmem>>, vector<1x1x16x16xf32>,
    %303 = vector.extract_strided_slice %294 {offsets = [0, 32], sizes = [16, 16], strides = [1, 1]} : vector<16x48xf32> to vector<16x16xf32>
    %c0_215 = arith.constant 0 : index
    %c2_216 = arith.constant 2 : index
    %c0_217 = arith.constant 0 : index
    %c0_218 = arith.constant 0 : index
    %304 = vector.load %arg48[%c0_215, %c2_216, %c0_217, %c0_218] : memref<1x3x16x16xf32, #tpu.memory_space<vmem>>, vector<1x1x16x16xf32>
    %305 = vector.shape_cast %304 : vector<1x1x16x16xf32> to vector<16x16xf32>
    %306 = vector.shape_cast %303 : vector<16x16xf32> to vector<1x1x16x16xf32>
    tpu.vector_store %arg48[%c0_215, %c2_216, %c0_217, %c0_218], %306 {strides = array<i32>} : memref<1x3x16x16xf32, #tpu.memory_space<vmem>>, vector<1x1x16x16xf32>,
    return
  }
  func.func @transform_0(%arg0: i32) -> (i32, i32, i32) {
    %c0_i32 = arith.constant 0 : i32
    %c0_i32_0 = arith.constant 0 : i32
    %c0_i32_1 = arith.constant 0 : i32
    return %arg0, %c0_i32, %c0_i32_0 : i32, i32, i32
  }
  func.func @transform_1(%arg0: i32) -> (i32, i32, i32) {
    %c0_i32 = arith.constant 0 : i32
    %c0_i32_0 = arith.constant 0 : i32
    %c0_i32_1 = arith.constant 0 : i32
    %c0_i32_2 = arith.constant 0 : i32
    return %c0_i32, %c0_i32_0, %c0_i32_1 : i32, i32, i32
  }
  func.func @transform_2(%arg0: i32) -> (i32, i32, i32) {
    %c0_i32 = arith.constant 0 : i32
    %c0_i32_0 = arith.constant 0 : i32
    %c0_i32_1 = arith.constant 0 : i32
    %c0_i32_2 = arith.constant 0 : i32
    return %c0_i32, %c0_i32_0, %c0_i32_1 : i32, i32, i32
  }
  func.func @transform_3(%arg0: i32) -> (i32, i32) {
    %c0_i32 = arith.constant 0 : i32
    %c0_i32_0 = arith.constant 0 : i32
    %c0_i32_1 = arith.constant 0 : i32
    return %c0_i32, %c0_i32_0 : i32, i32
  }
  func.func @transform_4(%arg0: i32) -> (i32, i32) {
    %c0_i32 = arith.constant 0 : i32
    %c0_i32_0 = arith.constant 0 : i32
    %c0_i32_1 = arith.constant 0 : i32
    return %c0_i32, %c0_i32_0 : i32, i32
  }
  func.func @transform_5(%arg0: i32) -> (i32, i32) {
    %c0_i32 = arith.constant 0 : i32
    %c0_i32_0 = arith.constant 0 : i32
    %c0_i32_1 = arith.constant 0 : i32
    return %c0_i32, %c0_i32_0 : i32, i32
  }
  func.func @transform_6(%arg0: i32) -> (i32, i32) {
    %c0_i32 = arith.constant 0 : i32
    %c0_i32_0 = arith.constant 0 : i32
    %c0_i32_1 = arith.constant 0 : i32
    return %c0_i32, %c0_i32_0 : i32, i32
  }
  func.func @transform_7(%arg0: i32) -> (i32, i32, i32) {
    %c0_i32 = arith.constant 0 : i32
    %c0_i32_0 = arith.constant 0 : i32
    %c0_i32_1 = arith.constant 0 : i32
    %c0_i32_2 = arith.constant 0 : i32
    return %c0_i32, %c0_i32_0, %c0_i32_1 : i32, i32, i32
  }
  func.func @transform_8(%arg0: i32) -> (i32, i32) {
    %c0_i32 = arith.constant 0 : i32
    %c0_i32_0 = arith.constant 0 : i32
    %c0_i32_1 = arith.constant 0 : i32
    return %c0_i32, %c0_i32_0 : i32, i32
  }
  func.func @transform_9(%arg0: i32) -> (i32, i32) {
    %c0_i32 = arith.constant 0 : i32
    %c0_i32_0 = arith.constant 0 : i32
    %c0_i32_1 = arith.constant 0 : i32
    return %c0_i32, %c0_i32_0 : i32, i32
  }
  func.func @transform_10(%arg0: i32) -> (i32, i32) {
    %c0_i32 = arith.constant 0 : i32
    %c0_i32_0 = arith.constant 0 : i32
    %c0_i32_1 = arith.constant 0 : i32
    return %c0_i32, %c0_i32_0 : i32, i32
  }
  func.func @transform_11(%arg0: i32) -> (i32, i32) {
    %c0_i32 = arith.constant 0 : i32
    %c0_i32_0 = arith.constant 0 : i32
    %c0_i32_1 = arith.constant 0 : i32
    return %c0_i32, %c0_i32_0 : i32, i32
  }
  func.func @transform_12(%arg0: i32) -> (i32, i32) {
    %c0_i32 = arith.constant 0 : i32
    %c0_i32_0 = arith.constant 0 : i32
    %c0_i32_1 = arith.constant 0 : i32
    return %c0_i32, %c0_i32_0 : i32, i32
  }
  func.func @transform_13(%arg0: i32) -> (i32, i32) {
    %c0_i32 = arith.constant 0 : i32
    %c0_i32_0 = arith.constant 0 : i32
    %c0_i32_1 = arith.constant 0 : i32
    return %c0_i32, %c0_i32_0 : i32, i32
  }
  func.func @transform_14(%arg0: i32) -> (i32, i32, i32) {
    %c0_i32 = arith.constant 0 : i32
    %c0_i32_0 = arith.constant 0 : i32
    %c0_i32_1 = arith.constant 0 : i32
    %c0_i32_2 = arith.constant 0 : i32
    return %c0_i32, %c0_i32_0, %c0_i32_1 : i32, i32, i32
  }
  func.func @transform_15(%arg0: i32) -> (i32, i32) {
    %c0_i32 = arith.constant 0 : i32
    %c0_i32_0 = arith.constant 0 : i32
    %c0_i32_1 = arith.constant 0 : i32
    return %c0_i32, %c0_i32_0 : i32, i32
  }
  func.func @transform_16(%arg0: i32) -> (i32, i32) {
    %c0_i32 = arith.constant 0 : i32
    %c0_i32_0 = arith.constant 0 : i32
    %c0_i32_1 = arith.constant 0 : i32
    return %c0_i32, %c0_i32_0 : i32, i32
  }
  func.func @transform_17(%arg0: i32) -> (i32, i32) {
    %c0_i32 = arith.constant 0 : i32
    %c0_i32_0 = arith.constant 0 : i32
    %c0_i32_1 = arith.constant 0 : i32
    return %c0_i32, %c0_i32_0 : i32, i32
  }
  func.func @transform_18(%arg0: i32) -> (i32, i32) {
    %c0_i32 = arith.constant 0 : i32
    %c0_i32_0 = arith.constant 0 : i32
    %c0_i32_1 = arith.constant 0 : i32
    return %c0_i32, %c0_i32_0 : i32, i32
  }
  func.func @transform_19(%arg0: i32) -> (i32, i32) {
    %c0_i32 = arith.constant 0 : i32
    %c0_i32_0 = arith.constant 0 : i32
    %c0_i32_1 = arith.constant 0 : i32
    return %c0_i32, %c0_i32_0 : i32, i32
  }
  func.func @transform_20(%arg0: i32) -> (i32, i32) {
    %c0_i32 = arith.constant 0 : i32
    %c0_i32_0 = arith.constant 0 : i32
    %c0_i32_1 = arith.constant 0 : i32
    return %c0_i32, %c0_i32_0 : i32, i32
  }
  func.func @transform_21(%arg0: i32) -> (i32, i32) {
    %c0_i32 = arith.constant 0 : i32
    %c0_i32_0 = arith.constant 0 : i32
    %c0_i32_1 = arith.constant 0 : i32
    return %c0_i32, %c0_i32_0 : i32, i32
  }
  func.func @transform_22(%arg0: i32) -> (i32, i32) {
    %c0_i32 = arith.constant 0 : i32
    %c0_i32_0 = arith.constant 0 : i32
    %c0_i32_1 = arith.constant 0 : i32
    return %c0_i32, %c0_i32_0 : i32, i32
  }
  func.func @transform_23(%arg0: i32) -> (i32, i32) {
    %c0_i32 = arith.constant 0 : i32
    %c0_i32_0 = arith.constant 0 : i32
    %c0_i32_1 = arith.constant 0 : i32
    return %c0_i32, %c0_i32_0 : i32, i32
  }
  func.func @transform_24(%arg0: i32) -> (i32, i32) {
    %c0_i32 = arith.constant 0 : i32
    %c0_i32_0 = arith.constant 0 : i32
    %c0_i32_1 = arith.constant 0 : i32
    return %c0_i32, %c0_i32_0 : i32, i32
  }
  func.func @transform_25(%arg0: i32) -> (i32, i32, i32) {
    %c0_i32 = arith.constant 0 : i32
    %c0_i32_0 = arith.constant 0 : i32
    %c0_i32_1 = arith.constant 0 : i32
    %c0_i32_2 = arith.constant 0 : i32
    return %c0_i32, %c0_i32_0, %c0_i32_1 : i32, i32, i32
  }
  func.func @transform_26(%arg0: i32) -> (i32, i32) {
    %c0_i32 = arith.constant 0 : i32
    %c0_i32_0 = arith.constant 0 : i32
    %c0_i32_1 = arith.constant 0 : i32
    return %c0_i32, %c0_i32_0 : i32, i32
  }
  func.func @transform_27(%arg0: i32) -> (i32, i32) {
    %c0_i32 = arith.constant 0 : i32
    %c0_i32_0 = arith.constant 0 : i32
    %c0_i32_1 = arith.constant 0 : i32
    return %c0_i32, %c0_i32_0 : i32, i32
  }
  func.func @transform_28(%arg0: i32) -> (i32, i32) {
    %c0_i32 = arith.constant 0 : i32
    %c0_i32_0 = arith.constant 0 : i32
    %c0_i32_1 = arith.constant 0 : i32
    return %c0_i32, %c0_i32_0 : i32, i32
  }
  func.func @transform_29(%arg0: i32) -> (i32, i32) {
    %c0_i32 = arith.constant 0 : i32
    %c0_i32_0 = arith.constant 0 : i32
    %c0_i32_1 = arith.constant 0 : i32
    return %c0_i32, %c0_i32_0 : i32, i32
  }
  func.func @transform_30(%arg0: i32) -> (i32, i32) {
    %c0_i32 = arith.constant 0 : i32
    %c0_i32_0 = arith.constant 0 : i32
    %c0_i32_1 = arith.constant 0 : i32
    return %c0_i32, %c0_i32_0 : i32, i32
  }
  func.func @transform_31(%arg0: i32) -> (i32, i32) {
    %c0_i32 = arith.constant 0 : i32
    %c0_i32_0 = arith.constant 0 : i32
    %c0_i32_1 = arith.constant 0 : i32
    return %c0_i32, %c0_i32_0 : i32, i32
  }
  func.func @transform_32(%arg0: i32) -> (i32, i32) {
    %c0_i32 = arith.constant 0 : i32
    %c0_i32_0 = arith.constant 0 : i32
    %c0_i32_1 = arith.constant 0 : i32
    return %c0_i32, %c0_i32_0 : i32, i32
  }
  func.func @transform_33(%arg0: i32) -> (i32, i32) {
    %c0_i32 = arith.constant 0 : i32
    %c0_i32_0 = arith.constant 0 : i32
    %c0_i32_1 = arith.constant 0 : i32
    return %c0_i32, %c0_i32_0 : i32, i32
  }
  func.func @transform_34(%arg0: i32) -> (i32, i32) {
    %c0_i32 = arith.constant 0 : i32
    %c0_i32_0 = arith.constant 0 : i32
    %c0_i32_1 = arith.constant 0 : i32
    return %c0_i32, %c0_i32_0 : i32, i32
  }
  func.func @transform_35(%arg0: i32) -> (i32, i32) {
    %c0_i32 = arith.constant 0 : i32
    %c0_i32_0 = arith.constant 0 : i32
    %c0_i32_1 = arith.constant 0 : i32
    return %c0_i32, %c0_i32_0 : i32, i32
  }
  func.func @transform_36(%arg0: i32) -> (i32, i32, i32) {
    %c0_i32 = arith.constant 0 : i32
    %c0_i32_0 = arith.constant 0 : i32
    %c0_i32_1 = arith.constant 0 : i32
    %c0_i32_2 = arith.constant 0 : i32
    return %c0_i32, %c0_i32_0, %c0_i32_1 : i32, i32, i32
  }
  func.func @transform_37(%arg0: i32) -> (i32, i32) {
    %c0_i32 = arith.constant 0 : i32
    %c0_i32_0 = arith.constant 0 : i32
    %c0_i32_1 = arith.constant 0 : i32
    return %c0_i32, %c0_i32_0 : i32, i32
  }
  func.func @transform_38(%arg0: i32) -> (i32, i32) {
    %c0_i32 = arith.constant 0 : i32
    %c0_i32_0 = arith.constant 0 : i32
    %c0_i32_1 = arith.constant 0 : i32
    return %c0_i32, %c0_i32_0 : i32, i32
  }
  func.func @transform_39(%arg0: i32) -> (i32, i32) {
    %c0_i32 = arith.constant 0 : i32
    %c0_i32_0 = arith.constant 0 : i32
    %c0_i32_1 = arith.constant 0 : i32
    return %c0_i32, %c0_i32_0 : i32, i32
  }
  func.func @transform_40(%arg0: i32) -> (i32, i32) {
    %c0_i32 = arith.constant 0 : i32
    %c0_i32_0 = arith.constant 0 : i32
    %c0_i32_1 = arith.constant 0 : i32
    return %c0_i32, %c0_i32_0 : i32, i32
  }
  func.func @transform_41(%arg0: i32) -> (i32, i32) {
    %c0_i32 = arith.constant 0 : i32
    %c0_i32_0 = arith.constant 0 : i32
    %c0_i32_1 = arith.constant 0 : i32
    return %c0_i32, %c0_i32_0 : i32, i32
  }
  func.func @transform_42(%arg0: i32) -> (i32, i32) {
    %c0_i32 = arith.constant 0 : i32
    %c0_i32_0 = arith.constant 0 : i32
    %c0_i32_1 = arith.constant 0 : i32
    return %c0_i32, %c0_i32_0 : i32, i32
  }
  func.func @transform_43(%arg0: i32) -> (i32, i32) {
    %c0_i32 = arith.constant 0 : i32
    %c0_i32_0 = arith.constant 0 : i32
    %c0_i32_1 = arith.constant 0 : i32
    return %c0_i32, %c0_i32_0 : i32, i32
  }
  func.func @transform_44(%arg0: i32) -> (i32, i32) {
    %c0_i32 = arith.constant 0 : i32
    %c0_i32_0 = arith.constant 0 : i32
    %c0_i32_1 = arith.constant 0 : i32
    return %c0_i32, %c0_i32_0 : i32, i32
  }
  func.func @transform_45(%arg0: i32) -> (i32, i32) {
    %c0_i32 = arith.constant 0 : i32
    %c0_i32_0 = arith.constant 0 : i32
    %c0_i32_1 = arith.constant 0 : i32
    return %c0_i32, %c0_i32_0 : i32, i32
  }
  func.func @transform_46(%arg0: i32) -> (i32, i32) {
    %c0_i32 = arith.constant 0 : i32
    %c0_i32_0 = arith.constant 0 : i32
    %c0_i32_1 = arith.constant 0 : i32
    return %c0_i32, %c0_i32_0 : i32, i32
  }
  func.func @transform_47(%arg0: i32) -> (i32, i32, i32, i32) {
    %c0_i32 = arith.constant 0 : i32
    %c0_i32_0 = arith.constant 0 : i32
    %c0_i32_1 = arith.constant 0 : i32
    %c0_i32_2 = arith.constant 0 : i32
    return %arg0, %c0_i32, %c0_i32_0, %c0_i32_1 : i32, i32, i32, i32
  }
}

</mosaic_0001>

<bundles_post_ra>
// kernel: tpu_custom_call.1
= control target key start
LH: loop header
LB: loop body
LE: loop exit
PB: predicated region body
PF: predicated region fallthrough
CT: control target
= control target key end

     0   :  { %s9037_s6 = smov 1   ;;  %s9038_s10 = smov 2   ;;  %s10736_s0 = inlined_call_operand.smem [shape: u32[48], index: -1, kind: input, shape index: {}] }
   0x1   :  { %s9131_s5 = sld [smem:[%s10736_s0]]   ;;  %s9039_s14 = smov 3  }
   0x2   :  { %s9136_s9 = sld [smem:[%s10736_s0 + %s9037_s6]]   ;;  %s9040_s18 = smov 4  }
   0x3   :  { %s9141_s13 = sld [smem:[%s10736_s0 + %s9038_s10]]   ;;  %s9041_s22 = smov 5  }
   0x4   :  { %s9146_s17 = sld [smem:[%s10736_s0 + %s9039_s14]]   ;;  %s9042_s26 = smov 6  }
   0x5   :  { %s9151_s21 = sld [smem:[%s10736_s0 + %s9040_s18]]   ;;  %s9043_s30 = smov 7  }
   0x6   :  { %s9156_s25 = sld [smem:[%s10736_s0 + %s9041_s22]]   ;;  %s9044_s4 = smov 8  }
   0x7   :  { %10793 = sst [smem:[#allocation35_spill]] %s9131_s5  ;;  %s9045_s10 = smov 9  }
   0x8   :  { %10794 = sst [smem:[#allocation36_spill]] %s9136_s9  ;;  %s9046_s15 = smov 10  }
   0x9   :  { %10795 = sst [smem:[#allocation37_spill]] %s9141_s13  ;;  %s9047_s20 = smov 11  }
   0xa   :  { %10796 = sst [smem:[#allocation38_spill]] %s9146_s17  ;;  %s9049_s1 = smov 13  }
   0xb   :  { %s9161_s29 = sld [smem:[%s10736_s0 + %s9042_s26]]   ;;  %s9048_s26 = smov 12  }
   0xc   :  { %s9166_s3 = sld [smem:[%s10736_s0 + %s9043_s30]]   ;;  %s9050_s7 = smov 14  }
   0xd   :  { %s9171_s8 = sld [smem:[%s10736_s0 + %s9044_s4]]   ;;  %s9052_s22 = smov 16  }
   0xe   :  { %s9176_s14 = sld [smem:[%s10736_s0 + %s9045_s10]]   ;;  %s9053_s28 = smov 17  }
   0xf   :  { %s9181_s19 = sld [smem:[%s10736_s0 + %s9046_s15]]   ;;  %s9051_s15 = smov 15  }
  0x10   :  { %s9186_s24 = sld [smem:[%s10736_s0 + %s9047_s20]]  }
  0x11   :  { %s9191_s30 = sld [smem:[%s10736_s0 + %s9048_s26]]  }
  0x12   :  { %10797 = sst [smem:[#allocation39_spill]] %s9166_s3 }
  0x13   :  { %10798 = sst [smem:[#allocation40_spill]] %s9171_s8 }
  0x14   :  { %10799 = sst [smem:[#allocation41_spill]] %s9176_s14 }
  0x15   :  { %s9196_s6 = sld [smem:[%s10736_s0 + %s9049_s1]]  }
  0x16   :  { %s9201_s12 = sld [smem:[%s10736_s0 + %s9050_s7]]   ;;  %s9054_s7 = smov 18  }
  0x17   :  { %s9206_s20 = sld [smem:[%s10736_s0 + %s9051_s15]]   ;;  %s9055_s15 = smov 19  }
  0x18   :  { %s9211_s27 = sld [smem:[%s10736_s0 + %s9052_s22]]   ;;  %s9056_s22 = smov 20  }
  0x19   :  { %s9216_s4 = sld [smem:[%s10736_s0 + %s9053_s28]]   ;;  %s9057_s28 = smov 21  }
  0x1a   :  { %s9226_s8 = sld [smem:[%s10736_s0 + %s9055_s15]]   ;;  %s9059_s15 = smov 23  }
  0x1b   :  { %10800 = sst [smem:[#allocation42_spill]] %s9196_s6 }
  0x1c   :  { %10801 = sst [smem:[#allocation43_spill]] %s9201_s12 }
  0x1d   :  { %s9221_s12 = sld [smem:[%s10736_s0 + %s9054_s7]]   ;;  %s9058_s7 = smov 22  }
  0x1e   :  { %10802 = sst [smem:[#allocation44_spill]] %s9211_s27 }
  0x1f   :  { %10803 = sst [smem:[#allocation45_spill]] %s9216_s4 }
  0x20   :  { %10805 = sst [smem:[#allocation47_spill]] %s9226_s8 }
  0x21   :  { %s9231_s27 = sld [smem:[%s10736_s0 + %s9056_s22]]   ;;  %s9060_s22 = smov 24  }
  0x22   :  { %s9236_s4 = sld [smem:[%s10736_s0 + %s9057_s28]]   ;;  %s9061_s28 = smov 25  }
  0x23   :  { %10804 = sst [smem:[#allocation46_spill]] %s9221_s12 }
  0x24   :  { %s9241_s12 = sld [smem:[%s10736_s0 + %s9058_s7]]   ;;  %s9062_s7 = smov 26  }
  0x25   :  { %s9246_s8 = sld [smem:[%s10736_s0 + %s9059_s15]]   ;;  %s9063_s15 = smov 27  }
  0x26   :  { %s9256_s3 = sld [smem:[%s10736_s0 + %s9061_s28]]   ;;  %s9065_s28 = smov 29  }
  0x27   :  { %10806 = sst [smem:[#allocation48_spill]] %s9231_s27 }
  0x28   :  { %10807 = sst [smem:[#allocation49_spill]] %s9236_s4 }
  0x29   :  { %s9251_s27 = sld [smem:[%s10736_s0 + %s9060_s22]]   ;;  %s9064_s22 = smov 28  }
  0x2a   :  { %10808 = sst [smem:[#allocation50_spill]] %s9241_s12 }
  0x2b   :  { %10809 = sst [smem:[#allocation51_spill]] %s9246_s8 }
  0x2c   :  { %10811 = sst [smem:[#allocation53_spill]] %s9256_s3 }
  0x2d   :  { %s9261_s14 = sld [smem:[%s10736_s0 + %s9062_s7]]   ;;  %s9066_s7 = smov 30  }
  0x2e   :  { %s9266_s17 = sld [smem:[%s10736_s0 + %s9063_s15]]   ;;  %s9067_s15 = smov 31  }
  0x2f   :  { %10810 = sst [smem:[#allocation52_spill]] %s9251_s27 }
  0x30   :  { %s9271_s27 = sld [smem:[%s10736_s0 + %s9064_s22]]   ;;  %s9068_s22 = smov 32  }
  0x31   :  { %s9276_s3 = sld [smem:[%s10736_s0 + %s9065_s28]]   ;;  %s9069_s28 = smov 33  }
  0x33   :  { %10812 = sst [smem:[#allocation54_spill]] %s9261_s14 }
  0x34   :  { %10813 = sst [smem:[#allocation55_spill]] %s9266_s17 }
  0x35   :  { %s9281_s14 = sld [smem:[%s10736_s0 + %s9066_s7]]   ;;  %s9070_s7 = smov 34  }
  0x36   :  { %10814 = sst [smem:[#allocation56_spill]] %s9271_s27 }
  0x37   :  { %10815 = sst [smem:[#allocation57_spill]] %s9276_s3 }
  0x38   :  { %s9286_s17 = sld [smem:[%s10736_s0 + %s9067_s15]]   ;;  %s9071_s15 = smov 35  }
  0x39   :  { %s9291_s27 = sld [smem:[%s10736_s0 + %s9068_s22]]   ;;  %s9072_s22 = smov 36  }
  0x3a   :  { %s9296_s3 = sld [smem:[%s10736_s0 + %s9069_s28]]   ;;  %s9073_s28 = smov 37  }
  0x3b   :  { %10816 = sst [smem:[#allocation58_spill]] %s9281_s14 }
  0x3c   :  { %s9301_s14 = sld [smem:[%s10736_s0 + %s9070_s7]]   ;;  %s9074_s7 = smov 38  }
  0x3d   :  { %s9311_s9 = sld [smem:[%s10736_s0 + %s9072_s22]]   ;;  %s9076_s22 = smov 40  }
  0x3e   :  { %10817 = sst [smem:[#allocation59_spill]] %s9286_s17 }
  0x3f   :  { %s9306_s17 = sld [smem:[%s10736_s0 + %s9071_s15]]   ;;  %s9075_s15 = smov 39  }
  0x40   :  { %10818 = sst [smem:[#allocation60_spill]] %s9296_s3 }
  0x41   :  { %s9316_s3 = sld [smem:[%s10736_s0 + %s9073_s28]]   ;;  %s9077_s28 = smov 41  }
  0x42   :  { %10819 = sst [smem:[#allocation61_spill]] %s9301_s14 }
  0x43   :  { %10821 = sst [smem:[#allocation63_spill]] %s9311_s9 }
  0x44   :  { %s9321_s14 = sld [smem:[%s10736_s0 + %s9074_s7]]   ;;  %s9078_s7 = smov 42  }
  0x45   :  { %10820 = sst [smem:[#allocation62_spill]] %s9306_s17 }
  0x46   :  { %s9326_s17 = sld [smem:[%s10736_s0 + %s9075_s15]]   ;;  %s9079_s15 = smov 43  }
  0x47   :  { %10822 = sst [smem:[#allocation64_spill]] %s9316_s3 }
  0x48   :  { %s9331_s9 = sld [smem:[%s10736_s0 + %s9076_s22]]   ;;  %s9080_s22 = smov 44  }
  0x49   :  { %s9336_s3 = sld [smem:[%s10736_s0 + %s9077_s28]]   ;;  %s9081_s28 = smov 45  }
  0x4a   :  { %10823 = sst [smem:[#allocation65_spill]] %s9321_s14 }
  0x4b   :  { %s9341_s14 = sld [smem:[%s10736_s0 + %s9078_s7]]   ;;  %s9082_s7 = smov 46  }
  0x4c   :  { %10824 = sst [smem:[#allocation66_spill]] %s9326_s17 }
  0x4d   :  { %s9346_s17 = sld [smem:[%s10736_s0 + %s9079_s15]]   ;;  %s9083_s15 = smov 47  }
  0x4e   :  { %10825 = sst [smem:[#allocation67_spill]] %s9331_s9 }
  0x4f   :  { %10826 = sst [smem:[#allocation68_spill]] %s9336_s3 }
  0x50   :  { %s9351_s9 = sld [smem:[%s10736_s0 + %s9080_s22]]  }
  0x51   :  { %10827 = sst [smem:[#allocation69_spill]] %s9341_s14 }
  0x52   :  { %s9356_s3 = sld [smem:[%s10736_s0 + %s9081_s28]]  }
  0x53   :  { %10828 = sst [smem:[#allocation70_spill]] %s9346_s17 }
  0x54   :  { %s9361_s14 = sld [smem:[%s10736_s0 + %s9082_s7]]  }
  0x55   :  { %s9366_s17 = sld [smem:[%s10736_s0 + %s9083_s15]]  }
  0x56   :  { %10829 = sst [smem:[#allocation71_spill]] %s9351_s9 }
  0x58   :  { %10830 = sst [smem:[#allocation72_spill]] %s9356_s3 }
  0x5a   :  { %10831 = sst [smem:[#allocation73_spill]] %s9361_s14 }
  0x5b   :  { %10832 = sst [smem:[#allocation74_spill]] %s9366_s17 }
  0x5c   :  { %100 = vsyncpa [#allocation3], 0 }
  0x5d   :  { %102 = vsyncpa [#allocation3 + $0x1], 0 }
  0x5e   :  { %103 = vsyncpa [#allocation6], 0 }
  0x5f   :  { %104 = vsyncpa [#allocation9], 0 }
  0x60   :  { %105 = vsyncpa [#allocation12], 0 }
  0x61   :  { %106 = vsyncpa [#allocation15], 0 }
  0x62   :  { %107 = vsyncpa [#allocation18], 0 }
  0x63   :  { %108 = vsyncpa [#allocation21], 0 }
  0x64   :  { %109 = vsyncpa [#allocation24], 0 }
  0x65   :  { %110 = vsyncpa [#allocation4], 0 }
  0x66   :  { %112 = vsyncpa [#allocation4 + $0x1], 0  ;;  %s9368_s22 = smov 0   ;;  %s9370_s23 = smov 0  }
  0x67   :  { %s9372_s26 = smov 0   ;;  %s9374_s28 = smov 0  }
  0x68 LB: > { %s10833_s3 = sld [smem:[#allocation72_spill]]  ;;  %s10834_s5 = sld [smem:[#allocation35_spill]]  ;;  %s9031_s26 = sphi %s9372_s26, %s10918_s26   ;;  %s9027_s23 = sphi %s9370_s23, %s10917_s23   ;;  %s9023_s22 = sphi %s9368_s22, %s10916_s22   ;;  %s9035_s28 = sphi %s9374_s28, %s10919_s28  }
  0x69   : > { %s10835_s12 = sld [smem:[#allocation50_spill]]  ;;  %s10836_s8 = sld [smem:[#allocation51_spill]] }
  0x6a   : > { %s10837_s6 = sld [smem:[#allocation42_spill]]  ;;  %s10838_s4 = sld [smem:[#allocation49_spill]] }
  0x6b   : > { %s10839_s13 = sld [smem:[#allocation37_spill]]  ;;  %s9084_s0 = smov [#allocation5]  }
  0x6c   : > { %s1156_s1 = sshll.u32 %s9084_s0, 4  ;;  %s9389_s2 = sadd.s32 4294967295, %s9035_s28   ;;  %s9394_s1 = int_to_ptr.vmem [resolvable:$true] %s1156_s1 }
  0x6d   : > { %p6793_p0 = scmp.ge.s32.totalorder %s9035_s28, 1  ;;  %p10761_p1 = scmp.eq.s32.totalorder %s9389_s2, 0 }
  0x6e   : > { %p1141_p2 = scmp.lt.s32.totalorder %s9035_s28, 3  ;;  %s9085_s10 = smov [#allocation8]  }
  0x6f   : > { %s1184_s11 = sshll.u32 %s9085_s10, 4  ;;  %s9086_s16 = smov [#allocation11]   ;;  %s9409_s11 = int_to_ptr.vmem [resolvable:$true] %s1184_s11 }
  0x70   : > { %p9396_p3 = pnand %p6793_p0, %p1141_p2  ;;  %s1215_s18 = sshll.u32 %s9086_s16, 4  ;;  %s9411_s18 = int_to_ptr.vmem [resolvable:$true] %s1215_s18 }
  0x71   : > { %s8547_s0 = scalar_lea.hbm %s10839_s13, 32 }
  0x72   : > { %s10840_s7 = scalar_select %p9396_p3, 1, 0 }
  0x73   : > { %p8327_p5 = pneg %p9396_p3  ;;  %p8548_p7 = scmp.ne.s32.totalorder %s10839_s13, %s8547_s0 }
  0x74   : > { %p8554_p11 = scmp.lt.u32.totalorder %s8547_s0, %s10839_s13 }
  0x75   : > { %p9405_p6 = pnand %p8327_p5, %p10761_p1 }
  0x77   : > { %p9417_p8 = pneg %p9405_p6 }
  0x79   : > { %p8550_p9 = pnand %p9417_p8, %p8548_p7 }
  0x7b   : > { %p8551_p10 = pneg %p8550_p9 }
  0x7d   : > { %p8556_p12 = pnand %p8554_p11, %p8551_p10 }
  0x7f   : > { %8559 = shalt.err (!%p8556_p12)
}
  0x80   : > { %s8560_s10 = scalar_lea.vmem %s9394_s1, 32  ;;  %p8568_p5 = scmp.lt.s32.totalorder %s9394_s1, %s9394_s1 }
  0x81   : > { %p8561_p13 = scmp.ne.s32.totalorder %s9394_s1, %s8560_s10  ;;  %p8569_p4 = scmp.lt.s32.totalorder %s8560_s10, %s8560_s10 }
  0x83   : > { %p8563_p0 = pnand %p8561_p13, %p9417_p8  ;;  %p8570_p1 = por %p8569_p4, %p8568_p5 }
  0x85   : > { %p8564_p2 = pneg %p8563_p0 }
  0x87   : > { %p8571_p3 = pnand %p8570_p1, %p8564_p2 }
  0x89   : > { %8574 = shalt.err (!%p8571_p3)
}
  0x8a   : > { %s9087_s16 = smov 16   ;;  %s9088_s0 = smov 1  }
  0x8b   : > { %8330 = dma.hbm_to_vmem [thread:$0]  (!%p9405_p6), %s10839_s13, 32, %s9394_s1, [#allocation6], %s9087_s16, %s9087_s16, %s9088_s0  }
  0x8c   : > { %s8575_s14 = scalar_lea.hbm %s9156_s25, 64 }
  0x8d   : > { %p8576_p7 = scmp.ne.s32.totalorder %s9156_s25, %s8575_s14  ;;  %p8582_p11 = scmp.lt.u32.totalorder %s8575_s14, %s9156_s25 }
  0x8f   : > { %p8578_p9 = pnand %p8576_p7, %p9417_p8 }
  0x91   : > { %p8579_p10 = pneg %p8578_p9 }
  0x93   : > { %p8584_p4 = pnand %p8582_p11, %p8579_p10 }
  0x95   : > { %8587 = shalt.err (!%p8584_p4)
}
  0x96   : > { %s8588_s10 = scalar_lea.vmem %s9409_s11, 64  ;;  %p8596_p13 = scmp.lt.s32.totalorder %s9409_s11, %s9409_s11 }
  0x97   : > { %p8589_p1 = scmp.ne.s32.totalorder %s9409_s11, %s8588_s10  ;;  %p8597_p0 = scmp.lt.s32.totalorder %s8588_s10, %s8588_s10 }
  0x99   : > { %p8591_p3 = pnand %p8589_p1, %p9417_p8  ;;  %p8598_p2 = por %p8597_p0, %p8596_p13 }
  0x9b   : > { %p8592_p12 = pneg %p8591_p3 }
  0x9d   : > { %p8599_p5 = pnand %p8598_p2, %p8592_p12 }
  0x9f   : > { %8602 = shalt.err (!%p8599_p5)
}
  0xa0   : > { %8336 = dma.hbm_to_vmem [thread:$0]  (!%p9405_p6), %s9156_s25, 64, %s9409_s11, [#allocation9]  }
  0xa1   : > { %s8603_s14 = scalar_lea.hbm %s9181_s19, 16 }
  0xa2   : > { %p8604_p7 = scmp.ne.s32.totalorder %s9181_s19, %s8603_s14  ;;  %p8610_p11 = scmp.lt.u32.totalorder %s8603_s14, %s9181_s19 }
  0xa4   : > { %p8606_p9 = pnand %p8604_p7, %p9417_p8 }
  0xa6   : > { %p8607_p10 = pneg %p8606_p9 }
  0xa8   : > { %p8612_p4 = pnand %p8610_p11, %p8607_p10 }
  0xaa   : > { %8615 = shalt.err (!%p8612_p4)
}
  0xab   : > { %s8616_s1 = scalar_lea.vmem %s9411_s18, 16  ;;  %s8623_s16 = scalar_lea.vmem %s9411_s18, 32 }
  0xac   : > { %p8617_p1 = scmp.ne.s32.totalorder %s9411_s18, %s8616_s1  ;;  %p8624_p13 = scmp.lt.s32.totalorder %s9411_s18, %s9411_s18 }
  0xad   : > { %p8625_p0 = scmp.lt.s32.totalorder %s8623_s16, %s8616_s1 }
  0xae   : > { %p8619_p3 = pnand %p8617_p1, %p9417_p8 }
  0xaf   : > { %p8626_p2 = por %p8625_p0, %p8624_p13 }
  0xb0   : > { %p8620_p12 = pneg %p8619_p3 }
  0xb2   : > { %p8627_p5 = pnand %p8626_p2, %p8620_p12 }
  0xb4   : > { %8630 = shalt.err (!%p8627_p5)
}
  0xb5   : > { %8342 = dma.hbm_to_vmem [thread:$0]  (!%p9405_p6), %s9181_s19, 16, %s9411_s18, [#allocation12]  }
  0xb6   : > { %s9089_s11 = smov [#allocation14]   ;;  %s9090_s10 = smov [#allocation17]  }
  0xb7   : > { %s1237_s0 = sshll.u32 %s9089_s11, 4  ;;  %s1262_s14 = sshll.u32 %s9090_s10, 4  ;;  %s1238_s0 = int_to_ptr.vmem [resolvable:$true] %s1237_s0  ;;  %s1263_s14 = int_to_ptr.vmem [resolvable:$true] %s1262_s14 }
  0xb8   : > { %s8631_s13 = scalar_lea.hbm %s9191_s30, 64 }
  0xb9   : > { %p8632_p7 = scmp.ne.s32.totalorder %s9191_s30, %s8631_s13  ;;  %p8638_p11 = scmp.lt.u32.totalorder %s8631_s13, %s9191_s30 }
  0xbb   : > { %p8634_p9 = pnand %p8632_p7, %p9417_p8 }
  0xbd   : > { %p8635_p10 = pneg %p8634_p9 }
  0xbf   : > { %p8640_p4 = pnand %p8638_p11, %p8635_p10 }
  0xc1   : > { %8643 = shalt.err (!%p8640_p4)
}
  0xc2   : > { %s8644_s1 = scalar_lea.vmem %s1238_s0, 64  ;;  %p8652_p13 = scmp.lt.s32.totalorder %s1238_s0, %s1238_s0 }
  0xc3   : > { %p8645_p1 = scmp.ne.s32.totalorder %s1238_s0, %s8644_s1  ;;  %p8653_p0 = scmp.lt.s32.totalorder %s8644_s1, %s8644_s1 }
  0xc5   : > { %p8647_p3 = pnand %p8645_p1, %p9417_p8  ;;  %p8654_p2 = por %p8653_p0, %p8652_p13 }
  0xc7   : > { %p8648_p12 = pneg %p8647_p3 }
  0xc9   : > { %p8655_p5 = pnand %p8654_p2, %p8648_p12 }
  0xcb   : > { %8658 = shalt.err (!%p8655_p5)
}
  0xcc   : > { %8348 = dma.hbm_to_vmem [thread:$0]  (!%p9405_p6), %s9191_s30, 64, %s1238_s0, [#allocation15]  }
  0xcd   : > { %s8659_s13 = scalar_lea.hbm %s9206_s20, 16 }
  0xce   : > { %p8660_p7 = scmp.ne.s32.totalorder %s9206_s20, %s8659_s13  ;;  %p8666_p11 = scmp.lt.u32.totalorder %s8659_s13, %s9206_s20 }
  0xd0   : > { %p8662_p9 = pnand %p8660_p7, %p9417_p8 }
  0xd2   : > { %p8663_p10 = pneg %p8662_p9 }
  0xd4   : > { %p8668_p4 = pnand %p8666_p11, %p8663_p10 }
  0xd6   : > { %8671 = shalt.err (!%p8668_p4)
}
  0xd7   : > { %s8672_s18 = scalar_lea.vmem %s1263_s14, 16  ;;  %s8679_s16 = scalar_lea.vmem %s1263_s14, 32 }
  0xd8   : > { %p8673_p1 = scmp.ne.s32.totalorder %s1263_s14, %s8672_s18  ;;  %p8680_p13 = scmp.lt.s32.totalorder %s1263_s14, %s1263_s14 }
  0xd9   : > { %p8681_p0 = scmp.lt.s32.totalorder %s8679_s16, %s8672_s18 }
  0xda   : > { %p8675_p3 = pnand %p8673_p1, %p9417_p8 }
  0xdb   : > { %p8682_p2 = por %p8681_p0, %p8680_p13 }
  0xdc   : > { %p8676_p12 = pneg %p8675_p3 }
  0xde   : > { %p8683_p5 = pnand %p8682_p2, %p8676_p12 }
  0xe0   : > { %8686 = shalt.err (!%p8683_p5)
}
  0xe1   : > { %8354 = dma.hbm_to_vmem [thread:$0]  (!%p9405_p6), %s9206_s20, 16, %s1263_s14, [#allocation18]  }
  0xe2   : > { %s9091_s11 = smov [#allocation20]   ;;  %s9092_s10 = smov [#allocation7]  }
  0xe3   : > { %s1299_s0 = sshll.u32 %s9091_s11, 4  ;;  %s1173_s1 = sshll.u32 %s9092_s10, 4  ;;  %s1300_s0 = int_to_ptr.vmem [resolvable:$true] %s1299_s0  ;;  %s1174_s1 = int_to_ptr.vmem [resolvable:$true] %s1173_s1 }
  0xe4   : > { %s8687_s13 = scalar_lea.hbm %s10835_s12, 64 }
  0xe5   : > { %p8688_p7 = scmp.ne.s32.totalorder %s10835_s12, %s8687_s13  ;;  %p8694_p11 = scmp.lt.u32.totalorder %s8687_s13, %s10835_s12 }
  0xe7   : > { %p8690_p9 = pnand %p8688_p7, %p9417_p8 }
  0xe9   : > { %p8691_p10 = pneg %p8690_p9 }
  0xeb   : > { %p8696_p4 = pnand %p8694_p11, %p8691_p10 }
  0xed   : > { %8699 = shalt.err (!%p8696_p4)
}
  0xee   : > { %s8700_s18 = scalar_lea.vmem %s1300_s0, 64  ;;  %p8708_p13 = scmp.lt.s32.totalorder %s1300_s0, %s1300_s0 }
  0xef   : > { %p8701_p1 = scmp.ne.s32.totalorder %s1300_s0, %s8700_s18  ;;  %p8709_p0 = scmp.lt.s32.totalorder %s8700_s18, %s8700_s18 }
  0xf1   : > { %p8703_p3 = pnand %p8701_p1, %p9417_p8  ;;  %p8710_p2 = por %p8709_p0, %p8708_p13 }
  0xf3   : > { %p8704_p12 = pneg %p8703_p3 }
  0xf5   : > { %p8711_p5 = pnand %p8710_p2, %p8704_p12 }
  0xf7   : > { %8714 = shalt.err (!%p8711_p5)
}
  0xf8   : > { %8360 = dma.hbm_to_vmem [thread:$0]  (!%p9405_p6), %s10835_s12, 64, %s1300_s0, [#allocation21]  }
  0xf9   : > { %s8715_s14 = scalar_lea.hbm %s9151_s21, 16 }
  0xfa   : > { %p8716_p7 = scmp.ne.s32.totalorder %s9151_s21, %s8715_s14  ;;  %p8722_p11 = scmp.lt.u32.totalorder %s8715_s14, %s9151_s21 }
  0xfc   : > { %p8718_p9 = pnand %p8716_p7, %p9417_p8 }
  0xfe   : > { %p8719_p10 = pneg %p8718_p9 }
 0x100   : > { %p8724_p4 = pnand %p8722_p11, %p8719_p10 }
 0x102   : > { %8727 = shalt.err (!%p8724_p4)
}
 0x103   : > { %s8728_s16 = scalar_lea.vmem %s1174_s1, 16  ;;  %s8735_s11 = scalar_lea.vmem %s1174_s1, 32 }
 0x104   : > { %p8729_p1 = scmp.ne.s32.totalorder %s1174_s1, %s8728_s16  ;;  %p8736_p13 = scmp.lt.s32.totalorder %s1174_s1, %s1174_s1 }
 0x105   : > { %p8737_p0 = scmp.lt.s32.totalorder %s8735_s11, %s8728_s16 }
 0x106   : > { %p8731_p3 = pnand %p8729_p1, %p9417_p8 }
 0x107   : > { %p8738_p2 = por %p8737_p0, %p8736_p13 }
 0x108   : > { %p8732_p12 = pneg %p8731_p3 }
 0x10a   : > { %p8739_p5 = pnand %p8738_p2, %p8732_p12 }
 0x10c   : > { %8742 = shalt.err (!%p8739_p5)
}
 0x10d   : > { %8333 = dma.hbm_to_vmem [thread:$0]  (!%p9405_p6), %s9151_s21, 16, %s1174_s1, [#allocation6]  }
 0x10e   : > { %s9093_s0 = smov [#allocation10]   ;;  %s9094_s13 = smov [#allocation13]  }
 0x10f   : > { %s1195_s10 = sshll.u32 %s9093_s0, 4  ;;  %s1226_s18 = sshll.u32 %s9094_s13, 4  ;;  %s1196_s10 = int_to_ptr.vmem [resolvable:$true] %s1195_s10  ;;  %s1227_s18 = int_to_ptr.vmem [resolvable:$true] %s1226_s18 }
 0x110   : > { %s8743_s14 = scalar_lea.hbm %s9161_s29, 64 }
 0x111   : > { %p8744_p7 = scmp.ne.s32.totalorder %s9161_s29, %s8743_s14  ;;  %p8750_p11 = scmp.lt.u32.totalorder %s8743_s14, %s9161_s29 }
 0x113   : > { %p8746_p9 = pnand %p8744_p7, %p9417_p8 }
 0x115   : > { %p8747_p10 = pneg %p8746_p9 }
 0x117   : > { %p8752_p4 = pnand %p8750_p11, %p8747_p10 }
 0x119   : > { %8755 = shalt.err (!%p8752_p4)
}
 0x11a   : > { %s8756_s16 = scalar_lea.vmem %s1196_s10, 64  ;;  %p8764_p13 = scmp.lt.s32.totalorder %s1196_s10, %s1196_s10 }
 0x11b   : > { %p8757_p1 = scmp.ne.s32.totalorder %s1196_s10, %s8756_s16  ;;  %p8765_p0 = scmp.lt.s32.totalorder %s8756_s16, %s8756_s16 }
 0x11d   : > { %p8759_p3 = pnand %p8757_p1, %p9417_p8  ;;  %p8766_p2 = por %p8765_p0, %p8764_p13 }
 0x11f   : > { %p8760_p12 = pneg %p8759_p3 }
 0x121   : > { %p8767_p5 = pnand %p8766_p2, %p8760_p12 }
 0x123   : > { %8770 = shalt.err (!%p8767_p5)
}
 0x124   : > { %8339 = dma.hbm_to_vmem [thread:$0]  (!%p9405_p6), %s9161_s29, 64, %s1196_s10, [#allocation9]  }
 0x125   : > { %s8771_s1 = scalar_lea.hbm %s9186_s24, 64 }
 0x126   : > { %p8772_p7 = scmp.ne.s32.totalorder %s9186_s24, %s8771_s1  ;;  %p8778_p11 = scmp.lt.u32.totalorder %s8771_s1, %s9186_s24 }
 0x128   : > { %p8774_p9 = pnand %p8772_p7, %p9417_p8 }
 0x12a   : > { %p8775_p10 = pneg %p8774_p9 }
 0x12c   : > { %p8780_p4 = pnand %p8778_p11, %p8775_p10 }
 0x12e   : > { %8783 = shalt.err (!%p8780_p4)
}
 0x12f   : > { %s8784_s11 = scalar_lea.vmem %s1227_s18, 64  ;;  %p8792_p13 = scmp.lt.s32.totalorder %s1227_s18, %s1227_s18 }
 0x130   : > { %p8785_p1 = scmp.ne.s32.totalorder %s1227_s18, %s8784_s11  ;;  %p8793_p0 = scmp.lt.s32.totalorder %s8784_s11, %s8784_s11 }
 0x132   : > { %p8787_p3 = pnand %p8785_p1, %p9417_p8  ;;  %p8794_p2 = por %p8793_p0, %p8792_p13 }
 0x134   : > { %p8788_p12 = pneg %p8787_p3 }
 0x136   : > { %p8795_p5 = pnand %p8794_p2, %p8788_p12 }
 0x138   : > { %8798 = shalt.err (!%p8795_p5)
}
 0x139   : > { %8345 = dma.hbm_to_vmem [thread:$0]  (!%p9405_p6), %s9186_s24, 64, %s1227_s18, [#allocation12]  }
 0x13a   : > { %s9095_s0 = smov [#allocation16]   ;;  %s9096_s13 = smov [#allocation19]  }
 0x13b   : > { %s1248_s10 = sshll.u32 %s9095_s0, 4  ;;  %s1288_s14 = sshll.u32 %s9096_s13, 4  ;;  %s1249_s10 = int_to_ptr.vmem [resolvable:$true] %s1248_s10  ;;  %s1289_s14 = int_to_ptr.vmem [resolvable:$true] %s1288_s14 }
 0x13c   : > { %s8799_s16 = scalar_lea.hbm %s10837_s6, 64 }
 0x13d   : > { %p8800_p7 = scmp.ne.s32.totalorder %s10837_s6, %s8799_s16  ;;  %p8806_p11 = scmp.lt.u32.totalorder %s8799_s16, %s10837_s6 }
 0x13f   : > { %p8802_p9 = pnand %p8800_p7, %p9417_p8 }
 0x141   : > { %p8803_p10 = pneg %p8802_p9 }
 0x143   : > { %p8808_p4 = pnand %p8806_p11, %p8803_p10 }
 0x145   : > { %8811 = shalt.err (!%p8808_p4)
}
 0x146   : > { %s8812_s1 = scalar_lea.vmem %s1249_s10, 64  ;;  %p8820_p13 = scmp.lt.s32.totalorder %s1249_s10, %s1249_s10 }
 0x147   : > { %p8813_p1 = scmp.ne.s32.totalorder %s1249_s10, %s8812_s1  ;;  %p8821_p0 = scmp.lt.s32.totalorder %s8812_s1, %s8812_s1 }
 0x149   : > { %p8815_p3 = pnand %p8813_p1, %p9417_p8  ;;  %p8822_p2 = por %p8821_p0, %p8820_p13 }
 0x14b   : > { %p8816_p12 = pneg %p8815_p3 }
 0x14d   : > { %p8823_p5 = pnand %p8822_p2, %p8816_p12 }
 0x14f   : > { %8826 = shalt.err (!%p8823_p5)
}
 0x150   : > { %8351 = dma.hbm_to_vmem [thread:$0]  (!%p9405_p6), %s10837_s6, 64, %s1249_s10, [#allocation15]  }
 0x151   : > { %s8827_s18 = scalar_lea.hbm %s10838_s4, 16 }
 0x152   : > { %p8828_p7 = scmp.ne.s32.totalorder %s10838_s4, %s8827_s18  ;;  %p8834_p11 = scmp.lt.u32.totalorder %s8827_s18, %s10838_s4 }
 0x154   : > { %p8830_p9 = pnand %p8828_p7, %p9417_p8 }
 0x156   : > { %p8831_p10 = pneg %p8830_p9 }
 0x158   : > { %p8836_p4 = pnand %p8834_p11, %p8831_p10 }
 0x15a   : > { %8839 = shalt.err (!%p8836_p4)
}
 0x15b   : > { %s8840_s11 = scalar_lea.vmem %s1289_s14, 16  ;;  %s8847_s0 = scalar_lea.vmem %s1289_s14, 32 }
 0x15c   : > { %p8841_p1 = scmp.ne.s32.totalorder %s1289_s14, %s8840_s11  ;;  %p8848_p13 = scmp.lt.s32.totalorder %s1289_s14, %s1289_s14 }
 0x15d   : > { %p8849_p0 = scmp.lt.s32.totalorder %s8847_s0, %s8840_s11 }
 0x15e   : > { %p8843_p3 = pnand %p8841_p1, %p9417_p8 }
 0x15f   : > { %p8850_p2 = por %p8849_p0, %p8848_p13 }
 0x160   : > { %p8844_p12 = pneg %p8843_p3 }
 0x162   : > { %p8851_p5 = pnand %p8850_p2, %p8844_p12 }
 0x164   : > { %8854 = shalt.err (!%p8851_p5)
}
 0x165   : > { %8357 = dma.hbm_to_vmem [thread:$0]  (!%p9405_p6), %s10838_s4, 16, %s1289_s14, [#allocation18]  }
 0x166   : > { %s9097_s10 = smov [#allocation22]   ;;  %s9098_s16 = smov [#allocation23]  }
 0x167   : > { %s1310_s13 = sshll.u32 %s9097_s10, 4  ;;  %s1345_s1 = sshll.u32 %s9098_s16, 4  ;;  %s1311_s13 = int_to_ptr.vmem [resolvable:$true] %s1310_s13  ;;  %s1346_s1 = int_to_ptr.vmem [resolvable:$true] %s1345_s1 }
 0x168   : > { %s8855_s18 = scalar_lea.hbm %s10836_s8, 64 }
 0x169   : > { %p8856_p7 = scmp.ne.s32.totalorder %s10836_s8, %s8855_s18  ;;  %p8862_p11 = scmp.lt.u32.totalorder %s8855_s18, %s10836_s8 }
 0x16b   : > { %p8858_p9 = pnand %p8856_p7, %p9417_p8 }
 0x16d   : > { %p8859_p10 = pneg %p8858_p9 }
 0x16f   : > { %p8864_p4 = pnand %p8862_p11, %p8859_p10 }
 0x171   : > { %8867 = shalt.err (!%p8864_p4)
}
 0x172   : > { %s8868_s11 = scalar_lea.vmem %s1311_s13, 64  ;;  %p8876_p13 = scmp.lt.s32.totalorder %s1311_s13, %s1311_s13 }
 0x173   : > { %p8869_p1 = scmp.ne.s32.totalorder %s1311_s13, %s8868_s11  ;;  %p8877_p0 = scmp.lt.s32.totalorder %s8868_s11, %s8868_s11 }
 0x175   : > { %p8871_p3 = pnand %p8869_p1, %p9417_p8  ;;  %p8878_p2 = por %p8877_p0, %p8876_p13 }
 0x177   : > { %p8872_p12 = pneg %p8871_p3 }
 0x179   : > { %p8879_p5 = pnand %p8878_p2, %p8872_p12 }
 0x17b   : > { %8882 = shalt.err (!%p8879_p5)
}
 0x17c   : > { %8363 = dma.hbm_to_vmem [thread:$0]  (!%p9405_p6), %s10836_s8, 64, %s1311_s13, [#allocation21]  }
 0x17d   : > { %s8883_s14 = scalar_lea.hbm %s9291_s27, 16 }
 0x17e   : > { %p8884_p7 = scmp.ne.s32.totalorder %s9291_s27, %s8883_s14  ;;  %p8890_p11 = scmp.lt.u32.totalorder %s8883_s14, %s9291_s27 }
 0x180   : > { %p8886_p9 = pnand %p8884_p7, %p9417_p8 }
 0x182   : > { %p8887_p10 = pneg %p8886_p9 }
 0x184   : > { %p8892_p4 = pnand %p8890_p11, %p8887_p10 }
 0x186   : > { %8895 = shalt.err (!%p8892_p4)
}
 0x187   : > { %s8896_s0 = scalar_lea.vmem %s1346_s1, 16  ;;  %s8903_s10 = scalar_lea.vmem %s1346_s1, 32 }
 0x188   : > { %p8897_p1 = scmp.ne.s32.totalorder %s1346_s1, %s8896_s0  ;;  %p8904_p13 = scmp.lt.s32.totalorder %s1346_s1, %s1346_s1 }
 0x189   : > { %p8905_p0 = scmp.lt.s32.totalorder %s8903_s10, %s8896_s0 }
 0x18a   : > { %p8899_p3 = pnand %p8897_p1, %p9417_p8 }
 0x18b   : > { %p8906_p2 = por %p8905_p0, %p8904_p13 }
 0x18c   : > { %p8900_p12 = pneg %p8899_p3 }
 0x18e   : > { %p8907_p5 = pnand %p8906_p2, %p8900_p12 }
 0x190   : > { %8910 = shalt.err (!%p8907_p5)
}
 0x191   : > { %8366 = dma.hbm_to_vmem [thread:$0]  (!%p9405_p6), %s9291_s27, 16, %s1346_s1, [#allocation24]  }
 0x192   : > { %s6792_s17 = sadd.s32 4294967294, %s9035_s28   ;;  %s9567_s13 = sadd.s32 1, %s9035_s28  }
 0x193   : > { %s125_s15 = sadd.s32 1, %s9031_s26  ;;  %s122_s16 = ssub.s32 %s9035_s28, %s9567_s13 }
 0x194   : > { %p132_p8 = scmp.ne.s32.totalorder %s9031_s26, %s9027_s23  ;;  %p123_p7 = scmp.eq.s32.totalorder %s122_s16, 0 }
 0x195   : > { %p133_p9 = scmp.eq.s32.totalorder %s9035_s28, 0  ;;  %p138_p10 = scmp.ne.s32.totalorder %s9027_s23, %s9023_s22 }
 0x196   : > { %p1128_p11 = scmp.eq.s32.totalorder %s9389_s2, 1  ;;  %p10843_p1 = scmp.eq.s32.totalorder %s9389_s2, 0 }
 0x197   : > { %s9579_s18 = scalar_select %p123_p7, %s9031_s26, %s125_s15  }
 0x198   : > { %p134_p4 = por %p133_p9, %p132_p8  ;;  %p9583_p3 = por %p10843_p1, %p138_p10 }
 0x199   : > { %p9587_p6 = por %p1128_p11, %p132_p8  ;;  %p1134_p12 = scmp.eq.s32.totalorder %s6792_s17, 1 }
 0x19a   : > { %s10844_s1 = scalar_select %p9583_p3, 1, 0 }
 0x19b   : > { %s10845_s11 = scalar_select %p9587_p6, 1, 0 }
 0x19c   : > { %p8388_p13 = scmp.lt.s32.totalorder %s9035_s28, 2  ;;  %s1398_s14 = sand.u32 1, %s9031_s26  }
 0x19d   : > { %p9593_p0 = por %p1134_p12, %p138_p10  ;;  %s6808_s10 = sshll.u32 %s9035_s28, 4 }
 0x19e   : > { %s9599_s15 = scalar_lea.hbm %s10834_s5, %s6808_s10  ;;  %s1401_s16 = scalar_lea.vmem [#allocation2], %s1398_s14 }
 0x19f   : > { %s10846_s0 = scalar_select %p9593_p0, 1, 0 }
 0x1a0   : > { %s1408_s4 = sshll.u32 %s1401_s16, 4  ;;  %p9603_p2 = pnand %p8388_p13, %p134_p4  ;;  %s9601_s4 = int_to_ptr.vmem [resolvable:$true] %s1408_s4 }
 0x1a1   : > { %s1399_s6 = scalar_lea.sflag [#allocation3], %s1398_s14  ;;  %s8911_s8 = scalar_lea.hbm %s9599_s15, 16 }
 0x1a2   : > { %p8912_p5 = scmp.ne.s32.totalorder %s9599_s15, %s8911_s8  ;;  %p8913_p8 = pneg %p9603_p2 }
 0x1a3   : > { %s8916_s10 = scalar_lea.hbm %s10834_s5, 32  ;;  %p8917_p10 = scmp.lt.u32.totalorder %s9599_s15, %s10834_s5 }
 0x1a4   : > { %p8914_p7 = pnand %p8913_p8, %p8912_p5  ;;  %p8918_p11 = scmp.lt.u32.totalorder %s8916_s10, %s8911_s8 }
 0x1a5   : > { %p8920_p12 = scmp.lt.u32.totalorder %s8911_s8, %s9599_s15 }
 0x1a6   : > { %p8915_p9 = pneg %p8914_p7  ;;  %p8919_p1 = por %p8918_p11, %p8917_p10 }
 0x1a8   : > { %p8921_p4 = por %p8920_p12, %p8919_p1 }
 0x1aa   : > { %p8922_p13 = pnand %p8921_p4, %p8915_p9 }
 0x1ac   : > { %8925 = shalt.err (!%p8922_p13)
}
 0x1ad   : > { %s8926_s14 = scalar_lea.vmem %s9601_s4, 16  ;;  %s9099_s16 = smov [#allocation2]  }
 0x1ae   : > { %p8927_p0 = scmp.ne.s32.totalorder %s9601_s4, %s8926_s14  ;;  %s8931_s12 = sshll.u32 %s9099_s16, 4  ;;  %s8932_s12 = int_to_ptr.vmem [resolvable:$false] %s8931_s12 }
 0x1af   : > { %s8933_s5 = scalar_lea.vmem %s8932_s12, 32  ;;  %p8934_p5 = scmp.lt.s32.totalorder %s9601_s4, %s8932_s12 }
 0x1b0   : > { %p8929_p6 = pnand %p8927_p0, %p8913_p8  ;;  %p8935_p7 = scmp.lt.s32.totalorder %s8933_s5, %s8926_s14 }
 0x1b2   : > { %p8930_p3 = pneg %p8929_p6  ;;  %p8936_p10 = por %p8935_p7, %p8934_p5 }
 0x1b4   : > { %p8937_p11 = pnand %p8936_p10, %p8930_p3 }
 0x1b6   : > { %8940 = shalt.err (!%p8937_p11)
}
 0x1b7   : > { %8370 = dma.hbm_to_vmem [thread:$0]  (!%p9603_p2), %s9599_s15, 16, %s9601_s4, %s1399_s6  }
 0x1b8   : > { %p10848_p9 = scmp.ne.s32.totalorder %s10840_s7, 0 }
 0x1b9   : > { %s9631_s8 = sand.u32 (!%p10848_p9), 1, %s9027_s23   ;;  %p10849_p6 = scmp.ne.s32.totalorder (!%p10848_p9), %s10844_s1, 0 }
 0x1ba   : > { %1417 = sbr.rel (%p10848_p9) target bundleno = 6352 (0x18d0), region = 208  ;;  %s1420_s10 = scalar_lea.sflag (!%p10848_p9), [#allocation3], %s9631_s8 }
 0x1bb   : > { %s1422_s12 = scalar_lea.vmem (!%p10848_p9), [#allocation2], %s9631_s8 }
 0x1c1   : > { %8986 = dma.done.wait (%p10849_p6), %s1420_s10, 16  }
 0x1c2   : > { %8988 = vsyncadd (%p10849_p6), %s1420_s10, 4294967280  ;;  %p10850_p3 = scmp.eq.s32.totalorder %s9389_s2, 0 }
 0x1c4   : > { %8990 = dma.done.wait (%p10850_p3), [#allocation6], 48   ;;  %p10851_p0 = pmov %p10850_p3 }
 0x1c6   : > { %8992 = vsyncadd (%p10851_p0), [#allocation6], 4294967248  ;;  %p10852_p2 = pmov %p10851_p0 }
 0x1c7   : > { %p10853_p8 = pmov %p10851_p0 }
 0x1c8   : > { %8994 = dma.done.wait (%p10852_p2), [#allocation9], 128  }
 0x1c9   : > { %8996 = vsyncadd (%p10853_p8), [#allocation9], 4294967168  ;;  %p10854_p1 = pmov %p10851_p0 }
 0x1ca   : > { %p10855_p12 = pmov %p10851_p0 }
 0x1cb   : > { %8998 = dma.done.wait (%p10854_p1), [#allocation12], 80  }
 0x1cc   : > { %9000 = vsyncadd (%p10855_p12), [#allocation12], 4294967216  ;;  %p10856_p4 = pmov %p10851_p0 }
 0x1cd   : > { %p10857_p13 = pmov %p10851_p0 }
 0x1ce   : > { %9002 = dma.done.wait (%p10856_p4), [#allocation15], 128  }
 0x1cf   : > { %9004 = vsyncadd (%p10857_p13), [#allocation15], 4294967168  ;;  %p10858_p5 = pmov %p10851_p0 }
 0x1d0   : > { %p10859_p7 = pmov %p10851_p0 }
 0x1d1   : > { %9006 = dma.done.wait (%p10858_p5), [#allocation18], 32  }
 0x1d2   : > { %9008 = vsyncadd (%p10859_p7), [#allocation18], 4294967264  ;;  %p10860_p10 = pmov %p10851_p0 }
 0x1d3   : > { %p10861_p11 = pmov %p10851_p0 }
 0x1d4   : > { %9010 = dma.done.wait (%p10860_p10), [#allocation21], 128  }
 0x1d5   : > { %9012 = vsyncadd (%p10861_p11), [#allocation21], 4294967168  ;;  %p10862_p9 = pmov %p10851_p0 }
 0x1d6   : > { %p10863_p6 = pmov %p10851_p0 }
 0x1d7   : > { %9014 = dma.done.wait (%p10862_p9), [#allocation24], 16  }
 0x1d8   : > { %9016 = vsyncadd (%p10863_p6), [#allocation24], 4294967280  ;;  %s10864_s5 = sld [smem:[#allocation36_spill]]  ;;  %v1584_v0 = vld [vmem:[%s1422_s12] sm:$0x1]  ;;  %vm1586_vm0 = vcmask 253952  }
 0x1d9   : > { %v1585_v1 = vmul.f32 %v1584_v0, %v1584_v0  ;;  %v9100_v6 = vmov 0.0|0.0   ;;  %vm9101_vm1 = vmmov 0   ;;  %v9102_v9 = vmov 0.0   ;;  %s10865_s6 = sld [smem:[#allocation38_spill]]  ;;  %v1599_v22 = vld [vmem:[#allocation5] sm:$0x1] }
 0x1da   : > { %7803 = vmatprep.subr.bf16.mxu0 %v9100_v6  ;;  %7286 = vmatprep.mubr.msk.f32.mxu0 %vm9101_vm1, %v9102_v9  ;;  %vm1600_vm2 = vcmask 261120   ;;  %v1684_v35 = vld [vmem:[#allocation5 + $0x1] sm:$0x1]  ;;  %v1766_v42 = vld [vmem:[#allocation7] sm:$0x1]  ;;  %s9103_s4 = smov 127  }
 0x1db   : > { %v1587_v2 = vsel %vm1586_vm0, %v1585_v1, 0.0  ;;  %7809 = vmatprep.subr.bf16.mxu1 %v9100_v6  ;;  %7297 = vmatprep.mubr.msk.f32.mxu1 %vm9101_vm1, %v9102_v9  ;;  %v9104_v49 = vmov 0   ;;  %s9105_s7 = smov 3   ;;  %s9106_s1 = smov 1   ;;  %v9108_v51 = vmov 1   ;;  %vm1946_vm5 = vcmask 1043456  }
 0x1dc   : > { %1588 = vadd.xlane.f32.xlu0 %v1587_v2  ;;  %s9107_s15 = smov 2   ;;  %8520 = vset.pattern.permute.xlu1 %v9108_v51  ;;  %s9109_s17 = smov 126   ;;  %v1941_v63 = vld [vmem:[#allocation10] sm:$0xf]  ;;  %vm1942_vm6 = vcmask 31744  }
 0x1dd   : > { %8519 = vset.pattern.permute.xlu0 %v9104_v49  ;;  %s9110_s14 = smov 125   ;;  %s10866_s16 = sld [smem:[#allocation41_spill]] }
 0x1de   : > { %v1595_v3 = vld [vmem:[%s10864_s5] sm:$0xff]  ;;  %v1596_v4 = vld [vmem:[%s10864_s5 + $0x8] sm:$0xff]  ;;  %v1597_v5 = vld [vmem:[%s10864_s5 + $0x10] sm:$0xff]  ;;  %s10867_s10 = sld [smem:[#allocation39_spill]]  ;;  %s10868_s12 = sld [smem:[#allocation40_spill]] }
 0x1df   : > { %v7804_v7 = vpack.c.bf16 %v1596_v4, %v1595_v3  ;;  %v1598_v8 = vld [vmem:[%s10864_s5 + $0x18] sm:$0xff]  ;;  %v6824_v16 = vld [vmem:[%s10864_s5 + $0x20] sm:$0xff]  ;;  %v6825_v17 = vld [vmem:[%s10864_s5 + $0x28] sm:$0xff]  ;;  %s10909_s9 = sld [smem:[#allocation71_spill]]  ;;  %p10913_p0 = scmp.ne.s32.totalorder %s10845_s11, 0 }
 0x1e0   : > { %v7807_v10 = vpack.c.bf16 %v1598_v8, %v1597_v5  ;;  %v7810_v18 = vpack.c.bf16 %v6825_v17, %v6824_v16  ;;  %v6826_v19 = vld [vmem:[%s10864_s5 + $0x30] sm:$0xff]  ;;  %v6827_v20 = vld [vmem:[%s10864_s5 + $0x38] sm:$0xff]  ;;  %v1762_v29 = vld [vmem:[%s10865_s6] sm:$0xff]  ;;  %s10883_s5 = sld [smem:[#allocation55_spill]] }
 0x1e1   : > { %7805 = vmatpush3.bf16.msra.mxu0 %v7804_v7  ;;  %v7813_v21 = vpack.c.bf16 %v6827_v20, %v6826_v19  ;;  %v1763_v30 = vld [vmem:[%s10865_s6 + $0x8] sm:$0xff]  ;;  %v1764_v32 = vld [vmem:[%s10865_s6 + $0x10] sm:$0xff]  ;;  %v1765_v33 = vld [vmem:[%s10865_s6 + $0x18] sm:$0xff]  ;;  %s10887_s6 = sld [smem:[#allocation60_spill]] }
 0x1e2   : > { %7806 = vmatprep.subr.bf16.mxu0 %v9100_v6  ;;  %7811 = vmatpush3.bf16.msra.mxu1 %v7810_v18  ;;  %v7816_v31 = vpack.c.bf16 %v1763_v30, %v1762_v29  ;;  %v7819_v34 = vpack.c.bf16 %v1765_v33, %v1764_v32 }
 0x1e3   : > { %7812 = vmatprep.subr.bf16.mxu1 %v9100_v6 }
 0x1e5   : > { %7808 = vmatpush3.bf16.msra.mxu0 %v7807_v10 }
 0x1e6   : > { %7815 = vmatprep.subr.bf16.mxu0 %v9100_v6  ;;  %7814 = vmatpush3.bf16.msra.mxu1 %v7813_v21 }
 0x1e7   : > { %7311 = vmatprep.subr.mxu1 %v9102_v9 }
 0x269   : > { %v1589_v11 = vpop.xlane.xlu0 %1588 }
 0x26a   : > { %v1591_v12 = vmul.f32 0.03125, %v1589_v11 }
 0x26c   : > { %v1592_v13 = vadd.f32 1e-08, %v1591_v12  ;;  %v1891_v12 = vld [vmem:[#allocation8] sm:$0x1] }
 0x26e   : > { %8523 = vrsqrt.f32 %v1592_v13  ;;  %v1921_v13 = vsub.f32 0.0, %v1891_v12 }
 0x278   : > { %v8524_v14 = vpop.eup %8523 }
 0x279   : > { %v1594_v15 = vmul.f32 %v8524_v14, %v1584_v0  ;;  %v1892_v14 = vld [vmem:[#allocation8 + $0x1] sm:$0x1] }
 0x27b   : > { %7287 = vmatmul.mubr.msk.f32.vlgmr.msra.gmra.mrb[0].mxu0 %vm1600_vm2, %v1594_v15 }
 0x27c   : > { %7308 = vmatprep.mubr.msk.f32.mxu0 %vm9101_vm1, %v9102_v9  ;;  %7817 = vmatpush3.bf16.msra.mxu0 %v7816_v31 }
 0x27d   : > { %7818 = vmatprep.subr.bf16.mxu0 %v9100_v6 }
 0x280   : > { %7820 = vmatpush3.bf16.msra.mxu0 %v7819_v34  ;;  %v2692_v34 = vld [vmem:[%s10866_s16] sm:$0xff] }
 0x281   : > { %7321 = vmatprep.subr.mxu0 %v9102_v9 }
 0x34e   : > { %v1670_v23 = vpop.f32.mrb[0].mxu0 }
 0x34f   : > { %v1671_v24 = vadd.f32 %v1670_v23, %v1599_v22  ;;  %v7288_v25 = vpop.f32.mrb[1].mxu0 }
 0x351   : > { %vm1674_vm3 = vcmp.ge.f32.partialorder %v1671_v24, 0.0  ;;  %v1675_v26 = vmul.f32 0.2, %v1671_v24 }
 0x353   : > { %v1676_v27 = vsel %vm1674_vm3, %v1671_v24, %v1675_v26 }
 0x354   : > { %v1677_v28 = vmul.f32 1.4142135, %v1676_v27 }
 0x356   : > { %7298 = vmatmul.mubr.msk.f32.vlgmr.msra.gmra.mrb[0].mxu1 %vm1600_vm2, %v1677_v28 }
 0x357   : > { %7313 = vmatprep.mubr.msk.f32.mxu1 %vm9101_vm1, %v9102_v9  ;;  %7312 = vmatpush3.msk.msra.mxu1 %vm1946_vm5, %v1941_v63 }
 0x358   : > { %7316 = vmatprep.subr.mxu1 %v9102_v9 }
 0x429   : > { %v1754_v36 = vpop.f32.mrb[0].mxu1 }
 0x42a   : > { %v1755_v37 = vadd.f32 %v1754_v36, %v1684_v35  ;;  %v7299_v38 = vpop.f32.mrb[1].mxu1  ;;  %v2693_v35 = vld [vmem:[%s10866_s16 + $0x8] sm:$0xff] }
 0x42c   : > { %vm1758_vm4 = vcmp.ge.f32.partialorder %v1755_v37, 0.0  ;;  %v1759_v39 = vmul.f32 0.2, %v1755_v37 }
 0x42e   : > { %v1760_v40 = vsel %vm1758_vm4, %v1755_v37, %v1759_v39  ;;  %v7837_v37 = vpack.c.bf16 %v2693_v35, %v2692_v34  ;;  %v2694_v39 = vld [vmem:[%s10866_s16 + $0x10] sm:$0xff]  ;;  %v2601_v34 = vld [vmem:[%s10868_s12 + $0x48] sm:$0xff] }
 0x42f   : > { %v9697_v41 = vmul.f32 1.4142135, %v1760_v40  ;;  %v2695_v40 = vld [vmem:[%s10866_s16 + $0x18] sm:$0xff] }
 0x431   : > { %7309 = vmatmul.mubr.msk.f32.vlgmr.msra.gmra.mrb[2].mxu0 %vm1600_vm2, %v9697_v41 }
 0x432   : > { %7323 = vmatprep.mubr.msk.f32.mxu0 %vm9101_vm1, %v9102_v9  ;;  %7322 = vmatpush3.msk.msra.mxu0 %vm1946_vm5, %v1941_v63 }
 0x433   : > { %7821 = vmatprep.subr.bf16.mxu0 %v9100_v6 }
 0x504   : > { %v1836_v43 = vpop.f32.mrb[2].mxu0 }
 0x505   : > { %v1837_v44 = vadd.f32 %v1836_v43, %v1766_v42  ;;  %v7310_v45 = vpop.f32.mrb[3].mxu0  ;;  %v7840_v42 = vpack.c.bf16 %v2695_v40, %v2694_v39 }
 0x506   : > { %v1893_v45 = vld [vmem:[#allocation8 + $0x2] sm:$0x1] }
 0x507   : > { %v1840_v46 = vmul.f32 %v1837_v44, %v1837_v44 }
 0x509   : > { %1842 = vrot.lane.b32.xlu0 %v1840_v46, %s9103_s4 }
 0x57b   : > { %v1843_v47 = vpop.permute.xlu0 %1842 }
 0x57c   : > { %v1845_v48 = vadd.f32 %v1843_v47, %v1840_v46 }
 0x57e   : > { %8525 = vrsqrt.f32 %v1845_v48 }
 0x588   : > { %v8526_v50 = vpop.eup %8525 }
 0x589   : > { %1857 = vrot.lane.b32.xlu1 %v8526_v50, %s9105_s7  ;;  %v1847_v57 = vmul.f32 %v8526_v50, %v1837_v44  ;;  %s10874_s7 = sld [smem:[#allocation46_spill]] }
 0x58b   : > { %v1861_v1 = vsub.f32 0.0, %v1847_v57 }
 0x58d   : > { %1849 = vrot.lane.b32.xlu1 %v8526_v50, %s9106_s1 }
 0x591   : > { %1853 = vrot.lane.b32.xlu1 %v8526_v50, %s9107_s15  ;;  %v2768_v50 = vld [vmem:[#allocation13] sm:$0xf]  ;;  %s10876_s15 = sld [smem:[#allocation47_spill]] }
 0x5fb   : > { %v1858_v52 = vpop.permute.xlu1 %1857 }
 0x5fc   : > { %v1860_v53 = vmul.f32 %v1858_v52, %v1837_v44 }
 0x5fe   : > { %1868 = vrot.lane.b32.xlu1 %v1860_v53, %s9109_s17 }
 0x5ff   : > { %v1850_v54 = vpop.permute.xlu1 %1849 }
 0x600   : > { %v1852_v58 = vmul.f32 %v1850_v54, %v1837_v44 }
 0x602   : > { %1882 = vrot.lane.b32.xlu1 %v1860_v53, %s9110_s14  ;;  %v1877_v5 = vsub.f32 0.0, %v1852_v58  ;;  %s10878_s14 = sld [smem:[#allocation45_spill]] }
 0x603   : > { %v1854_v55 = vpop.permute.xlu1 %1853 }
 0x604   : > { %v1856_v56 = vmul.f32 %v1854_v55, %v1837_v44 }
 0x606   : > { %1878 = vrot.lane.b32.xlu0 %v1856_v56, %s9103_s4  ;;  %1863 = vrot.lane.b32.xlu1 %v1856_v56, %s9109_s17  ;;  %s10877_s17 = sld [smem:[#allocation48_spill]] }
 0x60a   : > { %1910 = vperm.xlu0 %8519, %v1847_v57  }
 0x60e   : > { %8522 = vset.pattern.permute.xlu0 %v9108_v51  ;;  %v2246_v51 = vlaneseq }
 0x610   : > { %v2247_v52 = vshrl.u32 %v2246_v51, 7 }
 0x612   : > { %v9738_v53 = vsub.s32 0, %v2247_v52 }
 0x670   : > { %v1869_v59 = vpop.permute.xlu1 %1868 }
 0x671   : > { %v1871_v60 = vmul.f32 %v1869_v59, %v1852_v58  ;;  %v2241_v59 = vld [vmem:[%s10867_s10 + $0x10] sm:$0xf] }
 0x673   : > { %1873 = vrot.lane.b32.xlu1 %v1871_v60, %s9103_s4  ;;  %s10871_s4 = sld [smem:[#allocation43_spill]] }
 0x674   : > { %v1883_v61 = vpop.permute.xlu1 %1882 }
 0x675   : > { %v1885_v62 = vmul.f32 %v1883_v61, %v1847_v57  ;;  %v2239_v57 = vld [vmem:[%s10867_s10] sm:$0xff]  ;;  %v6839_v61 = vld [vmem:[%s10867_s10 + $0x18] sm:$0xff] }
 0x677   : > { %1887 = vrot.lane.b32.xlu1 %v1885_v62, %s9106_s1  ;;  %v6840_v62 = vld [vmem:[%s10867_s10 + $0x20] sm:$0xff]  ;;  %s10875_s1 = sld [smem:[#allocation44_spill]] }
 0x678   : > { %v1864_v0 = vpop.permute.xlu1 %1863  ;;  %v1879_v3 = vpop.permute.xlu0 %1878 }
 0x679   : > { %v1866_v2 = vmul.f32 %v1864_v0, %v1861_v1  ;;  %v1881_v8 = vmul.f32 %v1879_v3, %v1877_v5 }
 0x67b   : > { %1916 = vperm.xlu1 %8520, %v1852_v58   ;;  %v2240_v58 = vld [vmem:[%s10867_s10 + $0x8] sm:$0xff] }
 0x67f   : > { %8521 = vset.pattern.permute.xlu1 %v9104_v49 }
 0x689   : > { %v1911_v15 = vpop.permute.xlu0 %1910 }
 0x68a   : > { %v1913_v17 = vmul.f32 %v1911_v15, %v1891_v12  ;;  %v1923_v18 = vmul.f32 %v1911_v15, %v1892_v14  ;;  %v2696_v15 = vld [vmem:[#allocation11] sm:$0x1] }
 0x6e5   : > { %v1874_v4 = vpop.permute.xlu1 %1873 }
 0x6e6   : > { %v1876_v7 = vadd.f32 %v1874_v4, %v1866_v2 }
 0x6e8   : > { %1896 = vperm.xlu1 %8521, %v1876_v7  }
 0x6e9   : > { %v1888_v10 = vpop.permute.xlu1 %1887 }
 0x6ea   : > { %v1890_v11 = vsub.f32 %v1881_v8, %v1888_v10 }
 0x6ec   : > { %1903 = vperm.xlu0 %8522, %v1890_v11  }
 0x6fa   : > { %v1917_v16 = vpop.permute.xlu1 %1916 }
 0x6fb   : > { %v1919_v19 = vmul.f32 %v1917_v16, %v1892_v14  ;;  %v1922_v20 = vmul.f32 %v1921_v13, %v1917_v16 }
 0x6fd   : > { %v1920_v21 = vadd.f32 %v1919_v19, %v1913_v17  ;;  %v1924_v22 = vadd.f32 %v1923_v18, %v1922_v20  ;;  %v2846_v20 = vld [vmem:[#allocation14] sm:$0xf] }
 0x6ff   : > { %v1925_v23 = vmul.f32 %v1920_v21, %v1920_v21  ;;  %v1926_v24 = vmul.f32 %v1924_v22, %v1924_v22  ;;  %7314 = vmatmul.mubr.msk.f32.vlgmr.msra.gmra.mrb[2].mxu1 %vm1942_vm6, %v1920_v21  ;;  %v2592_v21 = vld [vmem:[%s10868_s12] sm:$0xff] }
 0x700   : > { %7317 = vmatpush3.msk.msra.mxu1 %vm1946_vm5, %v1941_v63  ;;  %7318 = vmatprep.mubr.msk.f32.mxu1 %vm9101_vm1, %v9102_v9 }
 0x701   : > { %v1927_v25 = vadd.f32 %v1926_v24, %v1925_v23  ;;  %7326 = vmatprep.subr.mxu1 %v9102_v9  ;;  %v2594_v24 = vld [vmem:[%s10868_s12 + $0x10] sm:$0xff] }
 0x703   : > { %8527 = vrsqrt.f32 %v1927_v25  ;;  %7319 = vmatmul.mubr.msk.f32.vlgmr.msra.gmra.mrb[4].mxu1 %vm1942_vm6, %v1924_v22  ;;  %vm1930_vm7 = vcmp.eq.f32.partialorder %v1927_v25, inf  ;;  %v1933_v28 = vand.u32 2147483648, %v1927_v25  ;;  %vm1932_vm8 = vcmp.eq.f32.partialorder %v1927_v25, 0.0  ;;  %v2593_v22 = vld [vmem:[%s10868_s12 + $0x8] sm:$0xff] }
 0x704   : > { %7327 = vmatpush3.msk.msra.mxu1 %vm1946_vm5, %v1941_v63  ;;  %7328 = vmatprep.mubr.msk.f32.mxu1 %vm9101_vm1, %v9102_v9  ;;  %v6841_v63 = vld [vmem:[%s10867_s10 + $0x28] sm:$0xf]  ;;  %v7822_v23 = vpack.c.bf16 %v2593_v22, %v2592_v21  ;;  %v9113_v21 = vmov 2131351028  }
 0x705   : > { %7836 = vmatprep.subr.bf16.mxu1 %v9100_v6 }
 0x70d   : > { %v8528_v26 = vpop.eup %8527 }
 0x70e   : > { %v1929_v27 = vmul.f32 %v8528_v26, %v1927_v25 }
 0x710   : > { %v1931_v29 = vsel %vm1930_vm7, %v1927_v25, %v1929_v27  ;;  %v2595_v25 = vld [vmem:[%s10868_s12 + $0x18] sm:$0xff]  ;;  %v2596_v27 = vld [vmem:[%s10868_s12 + $0x20] sm:$0xff] }
 0x711   : > { %v1934_v30 = vsel %vm1932_vm8, %v1933_v28, %v1931_v29  ;;  %v7825_v26 = vpack.c.bf16 %v2595_v25, %v2594_v24  ;;  %v2597_v28 = vld [vmem:[%s10868_s12 + $0x28] sm:$0xff]  ;;  %v9115_v25 = vmov 920167782  }
 0x712   : > { %v6830_v31 = vadd.f32 -2.0, %v1934_v30  ;;  %v7828_v29 = vpack.c.bf16 %v2597_v28, %v2596_v27  ;;  %v2598_v30 = vld [vmem:[%s10868_s12 + $0x30] sm:$0xff] }
 0x714   : > { %v1937_v32 = vmul.f32 0.16666667, %v6830_v31  ;;  %v2599_v31 = vld [vmem:[%s10868_s12 + $0x38] sm:$0xff] }
 0x716   : > { %v1938_v33 = vsub.f32 1.0, %v1937_v32  ;;  %v7831_v32 = vpack.c.bf16 %v2599_v31, %v2598_v30 }
 0x718   : > { %v1939_v36 = vmax.f32 %v1938_v33, 0.0  ;;  %v2600_v33 = vld [vmem:[%s10868_s12 + $0x40] sm:$0xff] }
 0x719   : > { %v7834_v35 = vpack.c.bf16 %v2601_v34, %v2600_v33 }
 0x71a   : > { %v1940_v38 = vmin.f32 %v1939_v36, 1.0 }
 0x71c   : > { %7329 = vmatmul.mubr.msk.f32.vlgmr.msra.gmra.mrb[6].mxu1 %vm1942_vm6, %v1940_v38 }
 0x71d   : > { %7838 = vmatpush3.bf16.msra.mxu1 %v7837_v37  ;;  %7368 = vmatprep.mubr.msk.f32.mxu1 %vm9101_vm1, %v9102_v9 }
 0x71e   : > { %7839 = vmatprep.subr.bf16.mxu1 %v9100_v6 }
 0x721   : > { %7841 = vmatpush3.bf16.msra.mxu1 %v7840_v42 }
 0x722   : > { %7371 = vmatprep.subr.mxu1 %v9102_v9 }
 0x724   : > { %7369 = vmatmul.mubr.msk.f32.vlgmr.msra.gmra.mrb[8].mxu1 %vm1600_vm2, %v9697_v41 }
 0x725   : > { %7373 = vmatprep.mubr.msk.f32.mxu1 %vm9101_vm1, %v9102_v9  ;;  %7372 = vmatpush3.msk.msra.mxu1 %vm1946_vm5, %v2768_v50 }
 0x726   : > { %7376 = vmatprep.subr.mxu1 %v9102_v9 }
 0x767   : > { %v1897_v43 = vpop.permute.xlu1 %1896 }
 0x768   : > { %v1899_v44 = vmul.f32 %v1897_v43, %v1891_v12 }
 0x76a   : > { %v1900_v47 = vadd.f32 %v1899_v44, %v1893_v45 }
 0x76b   : > { %v1904_v46 = vpop.permute.xlu0 %1903 }
 0x76c   : > { %v1906_v48 = vmul.f32 %v1904_v46, %v1892_v14 }
 0x76e   : > { %v1907_v49 = vadd.f32 %v1906_v48, %v1900_v47 }
 0x770   : > { %7324 = vmatmul.mubr.msk.f32.vlgmr.msra.gmra.mrb[4].mxu0 %vm1942_vm6, %v1907_v49 }
 0x771   : > { %7351 = vmatprep.mubr.msk.f32.mxu0 %vm9101_vm1, %v9102_v9  ;;  %7823 = vmatpush3.bf16.msra.mxu0 %v7822_v23  ;;  %v9114_v23 = vmov 2102212464  }
 0x772   : > { %7824 = vmatprep.subr.bf16.mxu0 %v9100_v6 }
 0x775   : > { %7826 = vmatpush3.bf16.msra.mxu0 %v7825_v26 }
 0x776   : > { %7827 = vmatprep.subr.bf16.mxu0 %v9100_v6 }
 0x779   : > { %7829 = vmatpush3.bf16.msra.mxu0 %v7828_v29 }
 0x77a   : > { %7830 = vmatprep.subr.bf16.mxu0 %v9100_v6 }
 0x77d   : > { %7832 = vmatpush3.bf16.msra.mxu0 %v7831_v32  ;;  %v9116_v32 = vmov 1326507024  }
 0x77e   : > { %7833 = vmatprep.subr.bf16.mxu0 %v9100_v6 }
 0x781   : > { %7835 = vmatpush3.bf16.msra.mxu0 %v7834_v35 }
 0x782   : > { %7842 = vmatprep.subr.bf16.mxu0 %v9100_v6 }
 0x7d2   : > { %v2016_v54 = vpop.f32.mrb[2].mxu1 }
 0x7d3   : > { %v7315_v55 = vpop.f32.mrb[3].mxu1  ;;  %v2249_v56 = vrot.slane %v2016_v54, %v9738_v53 }
 0x7d5   : > { %v2250_v2 = vmul.f32 %v2249_v56, %v2239_v57  ;;  %v2251_v3 = vmul.f32 %v2249_v56, %v2240_v58  ;;  %v2252_v4 = vmul.f32 %v2249_v56, %v2241_v59 }
 0x7d6   : > { %v2089_v60 = vpop.f32.mrb[4].mxu1 }
 0x7d7   : > { %v2256_v0 = vrot.slane %v2089_v60, %v9738_v53  ;;  %v7320_v1 = vpop.f32.mrb[5].mxu1 }
 0x7d9   : > { %v2257_v5 = vmul.f32 %v6839_v61, %v2256_v0  ;;  %v2258_v7 = vmul.f32 %v6840_v62, %v2256_v0  ;;  %v2259_v8 = vmul.f32 %v6841_v63, %v2256_v0 }
 0x7db   : > { %v2260_v10 = vadd.f32 %v2257_v5, %v2250_v2  ;;  %v2261_v11 = vadd.f32 %v2258_v7, %v2251_v3  ;;  %v2262_v12 = vadd.f32 %v2259_v8, %v2252_v4  ;;  %v2923_v8 = vld [vmem:[#allocation16] sm:$0xf] }
 0x7ef   : > { %v9748_v13 = vpop.f32.mrb[6].mxu1 }
 0x7f0   : > { %v7330_v14 = vpop.f32.mrb[7].mxu1 }
 0x7f7   : > { %v2763_v16 = vpop.f32.mrb[8].mxu1 }
 0x7f8   : > { %v2764_v17 = vadd.f32 %v2763_v16, %v2696_v15  ;;  %v7370_v18 = vpop.f32.mrb[9].mxu1  ;;  %v9111_v16 = vmov 683565275  }
 0x7f9   : > { %v9112_v18 = vmov 2475754826  }
 0x7fa   : > { %v2767_v19 = vmul.f32 %v2764_v17, %v2764_v17 }
 0x7fc   : > { %7374 = vmatmul.mubr.msk.f32.vlgmr.msra.gmra.mrb[10].mxu1 %vm1942_vm6, %v2767_v19 }
 0x7fd   : > { %7377 = vmatpush3.msk.msra.mxu1 %vm1946_vm5, %v2846_v20  ;;  %7378 = vmatprep.mubr.msk.f32.mxu1 %vm9101_vm1, %v9102_v9 }
 0x7fe   : > { %7381 = vmatprep.subr.mxu1 %v9102_v9 }
 0x800   : > { %7379 = vmatmul.mubr.msk.f32.vlgmr.msra.gmra.mrb[12].mxu1 %vm1942_vm6, %v2764_v17 }
 0x801   : > { %7383 = vmatprep.mubr.msk.f32.mxu1 %vm9101_vm1, %v9102_v9  ;;  %7382 = vmatpush3.msk.msra.mxu1 %vm1946_vm5, %v2923_v8 }
 0x802   : > { %7887 = vmatprep.subr.bf16.mxu1 %v9100_v6 }
 0x843   : > { %v2162_v36 = vpop.f32.mrb[4].mxu0 }
 0x844   : > { %v2266_v37 = vrot.slane %v2162_v36, %v9738_v53  ;;  %v7325_v38 = vpop.f32.mrb[5].mxu0 }
 0x846   : > { %v2267_v39 = vadd.f32 %v2266_v37, %v2260_v10  ;;  %v2268_v40 = vadd.f32 %v2266_v37, %v2261_v11  ;;  %v2269_v42 = vadd.f32 %v2266_v37, %v2262_v12 }
 0x848   : > { %v9774_v43 = vmul.f32 6.2831855, %v2267_v39  ;;  %v9776_v44 = vmul.f32 6.2831855, %v2268_v40  ;;  %v9778_v45 = vmul.f32 6.2831855, %v2269_v42 }
 0x84a   : > { %v2273_v46 = vand.u32 2147483647, %v9774_v43  ;;  %v2276_v47 = vand.u32 2139095040, %v9774_v43  ;;  %v2377_v48 = vand.u32 2147483647, %v9776_v44  ;;  %v2380_v49 = vand.u32 2139095040, %v9776_v44 }
 0x84b   : > { %v2484_v51 = vand.u32 2139095040, %v9778_v45  ;;  %v2481_v59 = vand.u32 2147483647, %v9778_v45 }
 0x84c   : > { %v2277_v50 = vshrl.u32 %v2276_v47, 23  ;;  %v2280_v52 = vand.u32 8388607, %v2273_v46  ;;  %v2381_v54 = vshrl.u32 %v2380_v49, 23  ;;  %v2384_v55 = vand.u32 8388607, %v2377_v48 }
 0x84d   : > { %v2485_v57 = vshrl.u32 %v2484_v51, 23  ;;  %v9792_v3 = vand.u32 8388607, %v2481_v59 }
 0x84e   : > { %v6842_v56 = vadd.s32 4294967169, %v2277_v50  ;;  %v6846_v58 = vadd.s32 4294967169, %v2381_v54  ;;  %v2281_v62 = vor.u32 8388608, %v2280_v52  ;;  %v2385_v63 = vor.u32 8388608, %v2384_v55 }
 0x84f   : > { %v6850_v61 = vadd.s32 4294967169, %v2485_v57 }
 0x850   : > { %v2283_v60 = vadd.s32 1, %v6842_v56  ;;  %v2387_v0 = vadd.s32 1, %v6846_v58  ;;  %v9794_v10 = vshll.u32 %v2281_v62, 8  ;;  %v9800_v14 = vshll.u32 %v2385_v63, 8 }
 0x851   : > { %v2491_v1 = vadd.s32 1, %v6850_v61 }
 0x852   : > { %vm2284_vm9 = vcmp.gt.s32.totalorder %v2283_v60, 0  ;;  %vm2388_vm10 = vcmp.gt.s32.totalorder %v2387_v0, 0 }
 0x853   : > { %v2285_v2 = vsel %vm2284_vm9, %v2283_v60, 0  ;;  %v2389_v7 = vsel %vm2388_vm10, %v2387_v0, 0  ;;  %vm2492_vm11 = vcmp.gt.s32.totalorder %v2491_v1, 0 }
 0x854   : > { %v2286_v4 = vshrl.u32 %v2285_v2, 5  ;;  %v2287_v5 = vand.u32 31, %v2285_v2  ;;  %v9796_v11 = vshrl.u32 %v2389_v7, 5  ;;  %v9798_v12 = vand.u32 31, %v2389_v7 }
 0x855   : > { %v9805_v20 = vsel %vm2492_vm11, %v2491_v1, 0 }
 0x856   : > { %v2288_v15 = vsub.s32 32, %v2287_v5  ;;  %v2290_v17 = vshll.u32 %v9111_v16, %v2287_v5  ;;  %v2293_v19 = vshll.u32 %v9112_v18, %v2287_v5  ;;  %v2296_v22 = vshll.u32 %v9113_v21, %v2287_v5 }
 0x857   : > { %v2299_v24 = vshll.u32 %v9114_v23, %v2287_v5  ;;  %v2302_v26 = vshll.u32 %v9115_v25, %v2287_v5  ;;  %vm2305_vm12 = vcmp.lt.s32.totalorder %v2286_v4, 1  ;;  %vm2306_vm13 = vcmp.lt.s32.totalorder %v2286_v4, 2 }
 0x858   : > { %v2291_v27 = vshrl.u32 %v9112_v18, %v2288_v15  ;;  %v2294_v28 = vshrl.u32 %v9113_v21, %v2288_v15  ;;  %v2297_v29 = vshrl.u32 %v9114_v23, %v2288_v15  ;;  %v2289_v30 = vshrl.u32 %v9111_v16, %v2288_v15 }
 0x859   : > { %v2300_v31 = vshrl.u32 %v9115_v25, %v2288_v15  ;;  %v2303_v33 = vshrl.u32 %v9116_v32, %v2288_v15  ;;  %vm2307_vm14 = vcmp.lt.s32.totalorder %v2286_v4, 3  ;;  %v2392_v37 = vsub.s32 32, %v9798_v12 }
 0x85a   : > { %v2292_v34 = vor.u32 %v2291_v27, %v2290_v17  ;;  %v2295_v35 = vor.u32 %v2294_v28, %v2293_v19  ;;  %v2298_v36 = vor.u32 %v2297_v29, %v2296_v22  ;;  %vm2308_vm15 = vcmp.lt.s32.totalorder %v2286_v4, 4 }
 0x85b   : > { %v2301_v38 = vor.u32 %v2300_v31, %v2299_v24  ;;  %v2304_v39 = vor.u32 %v2303_v33, %v2302_v26  ;;  %v2394_v40 = vshll.u32 %v9111_v16, %v9798_v12  ;;  %v2397_v55 = vshll.u32 %v9112_v18, %v9798_v12 }
 0x85c   : > { %v2309_v42 = vsel %vm2305_vm12, %v2289_v30, %v2292_v34  ;;  %v2310_v47 = vsel %vm2308_vm15, %v2298_v36, 2102212464  ;;  %v2313_v49 = vsel %vm2305_vm12, %v2292_v34, %v2295_v35  ;;  %v2317_v50 = vsel %vm2305_vm12, %v2295_v35, %v2298_v36 }
 0x85d   : > { %v2311_v51 = vsel %vm2307_vm14, %v2295_v35, %v2310_v47  ;;  %v2314_v52 = vsel %vm2308_vm15, %v2301_v38, 920167782  ;;  %v2318_v54 = vsel %vm2308_vm15, %v2304_v39, 1326507024  ;;  %v2393_v58 = vshrl.u32 %v9111_v16, %v2392_v37 }
 0x85e   : > { %v2315_v56 = vsel %vm2307_vm14, %v2298_v36, %v2314_v52  ;;  %v2319_v57 = vsel %vm2307_vm14, %v2301_v38, %v2318_v54  ;;  %v2395_v60 = vshrl.u32 %v9112_v18, %v2392_v37  ;;  %v2312_v61 = vsel %vm2306_vm13, %v2309_v42, %v2311_v51 }
 0x85f   : > { %v2316_v62 = vsel %vm2306_vm13, %v2313_v49, %v2315_v56  ;;  %v2320_v63 = vsel %vm2306_vm13, %v2317_v50, %v2319_v57  ;;  %v2398_v0 = vshrl.u32 %v9113_v21, %v2392_v37  ;;  %v2400_v17 = vshll.u32 %v9113_v21, %v9798_v12 }
 0x860   : > { %v9835_v1 = vmul.u32.u64.low %v9794_v10, %v2320_v63  ;;  %v9836_v2 = vmul.u32.u64.high %v9794_v10, %v2320_v63, %v9835_v1  ;;  %v9839_v5 = vmul.u32.u64.low %v9794_v10, %v2316_v62  ;;  %v9840_v7 = vmul.u32.u64.high %v9794_v10, %v2316_v62, %v9839_v5 }
 0x861   : > { %v2396_v8 = vor.u32 %v2395_v60, %v2394_v40  ;;  %v2399_v15 = vor.u32 %v2398_v0, %v2397_v55  ;;  %v2401_v19 = vshrl.u32 %v9114_v23, %v2392_v37  ;;  %v2328_v4 = vmul.u32 %v9794_v10, %v2312_v61 }
 0x862   : > { %v2403_v22 = vshll.u32 %v9114_v23, %v9798_v12  ;;  %v2404_v24 = vshrl.u32 %v9115_v25, %v2392_v37  ;;  %v2407_v26 = vshrl.u32 %v9116_v32, %v2392_v37  ;;  %v2406_v28 = vshll.u32 %v9115_v25, %v9798_v12 }
 0x863   : > { %v2402_v27 = vor.u32 %v2401_v19, %v2400_v17  ;;  %vm2409_vm0 = vcmp.lt.s32.totalorder %v9796_v11, 1  ;;  %vm2410_vm3 = vcmp.lt.s32.totalorder %v9796_v11, 2  ;;  %vm2330_vm4 = vc.u32 %v9836_v2, %v9839_v5 }
 0x864   : > { %v2331_v10 = vadd.s32 1, %v9840_v7  ;;  %v2405_v29 = vor.u32 %v2404_v24, %v2403_v22  ;;  %vm2411_vm7 = vcmp.lt.s32.totalorder %v9796_v11, 3  ;;  %v2408_v30 = vor.u32 %v2407_v26, %v2406_v28 }
 0x865   : > { %vm2412_vm8 = vcmp.lt.s32.totalorder %v9796_v11, 4  ;;  %v2413_v31 = vsel %vm2409_vm0, %v2393_v58, %v2396_v8  ;;  %v2417_v33 = vsel %vm2409_vm0, %v2396_v8, %v2399_v15  ;;  %v2421_v36 = vsel %vm2409_vm0, %v2399_v15, %v2402_v27 }
 0x866   : > { %v2332_v34 = vsel %vm2330_vm4, %v2331_v10, %v9840_v7  ;;  %v2414_v12 = vsel %vm2412_vm8, %v2402_v27, 2102212464  ;;  %v2418_v35 = vsel %vm2412_vm8, %v2405_v29, 920167782  ;;  %v2422_v40 = vsel %vm2412_vm8, %v2408_v30, 1326507024 }
 0x867   : > { %v2333_v37 = vadd.s32 %v2332_v34, %v2328_v4  ;;  %v2415_v38 = vsel %vm2411_vm7, %v2399_v15, %v2414_v12  ;;  %v2419_v39 = vsel %vm2411_vm7, %v2402_v27, %v2418_v35  ;;  %v2423_v47 = vsel %vm2411_vm7, %v2405_v29, %v2422_v40 }
 0x868   : > { %v2420_v42 = vsel %vm2410_vm3, %v2417_v33, %v2419_v39  ;;  %v2489_v49 = vor.u32 8388608, %v9792_v3  ;;  %v2494_v50 = vshrl.u32 %v9805_v20, 5  ;;  %v2424_v52 = vsel %vm2410_vm3, %v2421_v36, %v2423_v47 }
 0x869   : > { %v2334_v51 = vadd.s32 536870912, %v2333_v37  ;;  %v9868_v54 = vmul.u32.u64.low %v9800_v14, %v2420_v42  ;;  %v9869_v55 = vmul.u32.u64.high %v9800_v14, %v2420_v42, %v9868_v54  ;;  %v2416_v56 = vsel %vm2410_vm3, %v2413_v31, %v2415_v38 }
 0x86a   : > { %v9875_v57 = vmul.u32.u64.low %v9800_v14, %v2424_v52  ;;  %v9876_v58 = vmul.u32.u64.high %v9800_v14, %v2424_v52, %v9875_v57  ;;  %v2495_v3 = vand.u32 31, %v9805_v20  ;;  %v9881_v62 = vshll.u32 %v2489_v49, 8 }
 0x86b   : > { %v9879_v60 = vshrl.u32 %v2334_v51, 30  ;;  %v2432_v0 = vmul.u32 %v9800_v14, %v2416_v56  ;;  %v2435_v1 = vadd.s32 1, %v9869_v55  ;;  %vm2513_vm9 = vcmp.lt.s32.totalorder %v2494_v50, 1 }
 0x86c   : > { %v2496_v61 = vsub.s32 32, %v2495_v3  ;;  %vm2434_vm10 = vc.u32 %v9876_v58, %v9868_v54  ;;  %v2498_v11 = vshll.u32 %v9111_v16, %v2495_v3  ;;  %vm2514_vm11 = vcmp.lt.s32.totalorder %v2494_v50, 2 }
 0x86d   : > { %v2336_v63 = vshll.u32 %v9879_v60, 30  ;;  %vm2515_vm12 = vcmp.lt.s32.totalorder %v2494_v50, 3  ;;  %v2436_v8 = vsel %vm2434_vm10, %v2435_v1, %v9869_v55  ;;  %v2501_v15 = vshll.u32 %v9112_v18, %v2495_v3 }
 0x86e   : > { %v2499_v7 = vshrl.u32 %v9112_v18, %v2496_v61  ;;  %v2502_v17 = vshrl.u32 %v9113_v21, %v2496_v61  ;;  %v2437_v14 = vadd.s32 %v2436_v8, %v2432_v0  ;;  %v2504_v4 = vshll.u32 %v9113_v21, %v2495_v3 }
 0x86f   : > { %v2337_v20 = vsub.s32 %v2333_v37, %v2336_v63  ;;  %v2505_v22 = vshrl.u32 %v9114_v23, %v2496_v61  ;;  %v2507_v27 = vshll.u32 %v9114_v23, %v2495_v3  ;;  %v2508_v28 = vshrl.u32 %v9115_v25, %v2496_v61 }
 0x870   : > { %v2500_v19 = vor.u32 %v2499_v7, %v2498_v11  ;;  %v2503_v26 = vor.u32 %v2502_v17, %v2501_v15  ;;  %v2438_v10 = vadd.s32 536870912, %v2437_v14  ;;  %v2510_v30 = vshll.u32 %v9115_v25, %v2495_v3 }
 0x871   : > { %v2339_v24 = vsub.s32 0, %v2337_v20  ;;  %v2506_v29 = vor.u32 %v2505_v22, %v2504_v4  ;;  %v2511_v18 = vshrl.u32 %v9116_v32, %v2496_v61  ;;  %v2497_v33 = vshrl.u32 %v9111_v16, %v2496_v61 }
 0x872   : > { %v2509_v34 = vor.u32 %v2508_v28, %v2507_v27  ;;  %vm2516_vm13 = vcmp.lt.s32.totalorder %v2494_v50, 4  ;;  %v9900_v21 = vshrl.u32 %v2438_v10, 30  ;;  %v2521_v36 = vsel %vm2513_vm9, %v2500_v19, %v2503_v26 }
 0x873   : > { %v6843_v31 = vmin.u32 %v2339_v24, %v2337_v20  ;;  %v2512_v12 = vor.u32 %v2511_v18, %v2510_v30  ;;  %v2518_v35 = vsel %vm2516_vm13, %v2506_v29, 2102212464  ;;  %v2517_v37 = vsel %vm2513_vm9, %v2497_v33, %v2500_v19 }
 0x874   : > { %v2522_v38 = vsel %vm2516_vm13, %v2509_v34, 920167782  ;;  %v2525_v39 = vsel %vm2513_vm9, %v2503_v26, %v2506_v29  ;;  %v2440_v25 = vshll.u32 %v9900_v21, 30  ;;  %v2519_v32 = vsel %vm2515_vm12, %v2503_v26, %v2518_v35 }
 0x875   : > { %v2341_v23 = vclz %v6843_v31  ;;  %v2523_v16 = vsel %vm2515_vm12, %v2506_v29, %v2522_v38  ;;  %v2526_v40 = vsel %vm2516_vm13, %v2512_v12, 1326507024  ;;  %v2520_v57 = vsel %vm2514_vm11, %v2517_v37, %v2519_v32 }
 0x876   : > { %v2524_v47 = vsel %vm2514_vm11, %v2521_v36, %v2523_v16  ;;  %v2527_v49 = vsel %vm2515_vm12, %v2509_v34, %v2526_v40  ;;  %v2441_v51 = vsub.s32 %v2437_v14, %v2440_v25  ;;  %v2329_v1 = vadd.s32 %v9839_v5, %v9836_v2 }
 0x877   : > { %v6844_v42 = vadd.s32 4294967294, %v2341_v23  ;;  %v2528_v52 = vsel %vm2514_vm11, %v2525_v39, %v2527_v49  ;;  %v9912_v55 = vmul.u32.u64.low %v9881_v62, %v2524_v47  ;;  %v9913_v56 = vmul.u32.u64.high %v9881_v62, %v2524_v47, %v9912_v55 }
 0x878   : > { %v9918_v3 = vmul.u32.u64.low %v9881_v62, %v2528_v52  ;;  %v9919_v61 = vmul.u32.u64.high %v9881_v62, %v2528_v52, %v9918_v3  ;;  %v2443_v0 = vsub.s32 0, %v2441_v51  ;;  %v2536_v15 = vmul.u32 %v9881_v62, %v2520_v57 }
 0x879   : > { %vm6845_vm14 = vcmp.lt.s32.totalorder %v6844_v42, 0  ;;  %v2539_v17 = vadd.s32 1, %v9913_v56  ;;  %v2433_v18 = vadd.s32 %v9868_v54, %v9876_v58  ;;  %vm2275_vm3 = vcmp.lt.s32.totalorder %v9774_v43, 0 }
 0x87a   : > { %v2344_v63 = vsel %vm6845_vm14, 0, %v6844_v42  ;;  %v6847_v8 = vmin.u32 %v2443_v0, %v2441_v51  ;;  %vm2538_vm15 = vc.u32 %v9919_v61, %v9912_v55  ;;  %vm2274_vm4 = vcmp.le.f32.partialorder %v2273_v46, 0.7853982 }
 0x87b   : > { %v2345_v11 = vsub.s32 32, %v2344_v63  ;;  %v2349_v7 = vsub.s32 4294967266, %v2344_v63  ;;  %v2346_v14 = vshll.u32 %v2337_v20, %v2344_v63  ;;  %v2540_v22 = vsel %vm2538_vm15, %v2539_v17, %v9913_v56 }
 0x87c   : > { %v2445_v4 = vclz %v6847_v8  ;;  %v2541_v27 = vadd.s32 %v2540_v22, %v2536_v15  ;;  %v2359_v20 = vsub.s32 4, %v9879_v60  ;;  %v2463_v56 = vsub.s32 4, %v9900_v21 }
 0x87d   : > { %v2347_v19 = vshrl.u32 %v2329_v1, %v2345_v11  ;;  %v2350_v50 = vadd.s32 127, %v2349_v7  ;;  %vm2379_vm7 = vcmp.lt.s32.totalorder %v9776_v44, 0  ;;  %vm9944_vm9 = vcmp.le.f32.partialorder %v2377_v48, 0.7853982 }
 0x87e   : > { %v6848_v2 = vadd.s32 4294967294, %v2445_v4  ;;  %v2542_v28 = vadd.s32 536870912, %v2541_v27  ;;  %v2360_v39 = vsel %vm2275_vm3, %v2359_v20, %v9879_v60  ;;  %v2464_v63 = vsel %vm2379_vm7, %v2463_v56, %v9900_v21 }
 0x87f   : > { %v2348_v24 = vor.u32 %v2347_v19, %v2346_v14  ;;  %v2351_v26 = vshll.u32 %v2350_v50, 23  ;;  %v2362_v42 = vsel %vm2274_vm4, 0, %v2360_v39  ;;  %v2537_v15 = vadd.s32 %v9912_v55, %v9919_v61 }
 0x880   : > { %vm6849_vm0 = vcmp.lt.s32.totalorder %v6848_v2, 0  ;;  %v9928_v30 = vshrl.u32 %v2542_v28, 30  ;;  %v2366_v57 = vadd.s32 3, %v2362_v42  ;;  %v2466_v48 = vsel %vm9944_vm9, 0, %v2464_v63  ;;  %v6865_v28 = vld [vmem:[%s10871_s4 + $0x58] sm:$0xff] }
 0x881   : > { %v2352_v5 = vor.u32 4788187, %v2351_v26  ;;  %v2355_v62 = vcvt.s32.f32 %v2348_v24  ;;  %v2448_v29 = vsel %vm6849_vm0, 0, %v6848_v2  ;;  %v2470_v61 = vadd.s32 3, %v2466_v48 }
 0x882   : > { %v2449_v31 = vsub.s32 32, %v2448_v29  ;;  %v2453_v33 = vsub.s32 4294967266, %v2448_v29  ;;  %v2544_v12 = vshll.u32 %v9928_v30, 30  ;;  %v2450_v35 = vshll.u32 %v2441_v51, %v2448_v29 }
 0x883   : > { %v2353_v10 = vand.u32 2147483647, %v2352_v5  ;;  %v2367_v7 = vand.u32 3, %v2366_v57  ;;  %v6864_v5 = vld [vmem:[%s10871_s4 + $0x50] sm:$0xff]  ;;  %v2588_v29 = vrot.slane %v9748_v13, %v9738_v53  ;;  %vm2365_vm13 = vweird.f32 %v9774_v43 }
 0x884   : > { %v2451_v36 = vshrl.u32 %v2433_v18, %v2449_v31  ;;  %v2454_v23 = vadd.s32 127, %v2453_v33  ;;  %v2545_v38 = vsub.s32 %v2541_v27, %v2544_v12  ;;  %vm2602_vm14 = vcmask 654336  }
 0x885   : > { %v2356_v34 = vmul.f32 %v2355_v62, %v2353_v10  ;;  %vm2372_vm10 = vcmp.eq.s32.totalorder %v2367_v7, 2  ;;  %vm2369_vm11 = vcmp.eq.s32.totalorder %v2367_v7, 0  ;;  %vm2368_vm12 = vcmp.lt.s32.totalorder %v2367_v7, 2 }
 0x886   : > { %v2452_v25 = vor.u32 %v2451_v36, %v2450_v35  ;;  %v2455_v32 = vshll.u32 %v2454_v23, 23  ;;  %v2547_v58 = vsub.s32 0, %v2545_v38  ;;  %v2471_v35 = vand.u32 3, %v2470_v61  ;;  %v6866_v36 = vld [vmem:[%s10871_s4 + $0x60] sm:$0xff]  ;;  %v6867_v23 = vld [vmem:[%s10871_s4 + $0x68] sm:$0xff] }
 0x887   : > { %v2357_v37 = vxor.u32 2147483648, %v2356_v34  ;;  %vm9968_vm15 = vcmp.le.f32.partialorder %v2481_v59, 0.7853982  ;;  %vm2483_vm0 = vcmp.lt.s32.totalorder %v9778_v45, 0 }
 0x888   : > { %v2456_v40 = vor.u32 4788187, %v2455_v32  ;;  %v6851_v47 = vmin.u32 %v2547_v58, %v2545_v38  ;;  %v2459_v51 = vcvt.s32.f32 %v2452_v25  ;;  %v7846_v32 = vpack.c.bf16 %v6867_v23, %v6866_v36 }
 0x889   : > { %v2358_v54 = vsel %vm2275_vm3, %v2357_v37, %v2356_v34  ;;  %v7843_v34 = vpack.c.bf16 %v6865_v28, %v6864_v5  ;;  %vm2476_vm3 = vcmp.eq.s32.totalorder %v2471_v35, 2 }
 0x88a   : > { %v2361_v16 = vsel %vm2274_vm4, %v9774_v43, %v2358_v54  ;;  %v2457_v49 = vand.u32 2147483647, %v2456_v40  ;;  %v2549_v52 = vclz %v6851_v47  ;;  %vm2473_vm4 = vcmp.eq.s32.totalorder %v2471_v35, 0  ;;  %v3025_v54 = vld [vmem:[%s10871_s4 + $0x20] sm:$0xff] }
 0x88b   : > { %8529 = vcosq.f32 %v2361_v16 }
 0x88c   : > { %8531 = vsinq.f32 %v2361_v16  ;;  %v2460_v60 = vmul.f32 %v2459_v51, %v2457_v49  ;;  %v6852_v3 = vadd.s32 4294967294, %v2549_v52 }
 0x88e   : > { %v2461_v46 = vxor.u32 2147483648, %v2460_v60  ;;  %vm6853_vm8 = vcmp.lt.s32.totalorder %v6852_v3, 0 }
 0x88f   : > { %v2552_v11 = vsel %vm6853_vm8, 0, %v6852_v3  ;;  %vm2469_vm8 = vweird.f32 %v9776_v44 }
 0x890   : > { %v2462_v1 = vsel %vm2379_vm7, %v2461_v46, %v2460_v60  ;;  %v2553_v17 = vsub.s32 32, %v2552_v11  ;;  %v2557_v14 = vsub.s32 4294967266, %v2552_v11  ;;  %v2554_v19 = vshll.u32 %v2545_v38, %v2552_v11 }
 0x891   : > { %v2465_v8 = vsel %vm9944_vm9, %v9776_v44, %v2462_v1  ;;  %v2567_v38 = vsub.s32 4, %v9928_v30  ;;  %vm2472_vm7 = vcmp.lt.s32.totalorder %v2471_v35, 2 }
 0x892   : > { %8533 = vcosq.f32 %v2465_v8  ;;  %v2555_v50 = vshrl.u32 %v2537_v15, %v2553_v17  ;;  %v2558_v4 = vadd.s32 127, %v2557_v14 }
 0x893   : > { %8535 = vsinq.f32 %v2465_v8  ;;  %v2568_v42 = vsel %vm2483_vm0, %v2567_v38, %v9928_v30 }
 0x894   : > { %v2556_v26 = vor.u32 %v2555_v50, %v2554_v19  ;;  %v2559_v27 = vshll.u32 %v2558_v4, 23  ;;  %v2570_v52 = vsel %vm9968_vm15, 0, %v2568_v42  ;;  %v6869_v19 = vld [vmem:[%s10871_s4 + $0x78] sm:$0xff]  ;;  %v6870_v4 = vld [vmem:[%s10871_s4 + $0x80] sm:$0xff]  ;;  %v3027_v42 = vld [vmem:[%s10871_s4 + $0x30] sm:$0xff] }
 0x895   : > { %v8530_v21 = vpop.eup %8529  ;;  %v2574_v30 = vadd.s32 3, %v2570_v52 }
 0x896   : > { %v8532_v22 = vpop.eup %8531  ;;  %v2373_v24 = vxor.u32 2147483648, %v8530_v21  ;;  %v2560_v10 = vor.u32 4788187, %v2559_v27  ;;  %v2563_v31 = vcvt.s32.f32 %v2556_v26  ;;  %v6872_v26 = vld [vmem:[%s10871_s4 + $0x90] sm:$0xff]  ;;  %v6873_v27 = vld [vmem:[%s10871_s4 + $0x98] sm:$0xff] }
 0x897   : > { %v2370_v2 = vxor.u32 2147483648, %v8532_v22  ;;  %v2575_v60 = vand.u32 3, %v2574_v30  ;;  %v3030_v30 = vld [vmem:[%s10871_s4 + $0x48] sm:$0xff] }
 0x898   : > { %v2374_v55 = vsel %vm2372_vm10, %v2373_v24, %v8532_v22  ;;  %v2561_v18 = vand.u32 2147483647, %v2560_v10  ;;  %v6871_v22 = vld [vmem:[%s10871_s4 + $0x88] sm:$0xff] }
 0x899   : > { %v2371_v62 = vsel %vm2369_vm11, %v8530_v21, %v2370_v2  ;;  %vm2580_vm9 = vcmp.eq.s32.totalorder %v2575_v60, 2  ;;  %vm2577_vm10 = vcmp.eq.s32.totalorder %v2575_v60, 0  ;;  %vm2576_vm11 = vcmp.lt.s32.totalorder %v2575_v60, 2  ;;  %v6868_v21 = vld [vmem:[%s10871_s4 + $0x70] sm:$0xff] }
 0x89a   : > { %v2375_v20 = vsel %vm2368_vm12, %v2371_v62, %v2374_v55  ;;  %v2564_v37 = vmul.f32 %v2563_v31, %v2561_v18  ;;  %vm2573_vm12 = vweird.f32 %v9778_v45  ;;  %v7849_v50 = vpack.c.bf16 %v6869_v19, %v6868_v21  ;;  %v3021_v18 = vld [vmem:[%s10871_s4] sm:$0xff]  ;;  %v3022_v31 = vld [vmem:[%s10871_s4 + $0x8] sm:$0xff]  ;;  %v6886_v21 = vld [vmem:[%s10871_s4 + $0xd0] sm:$0xff] }
 0x89b   : > { %v2376_v33 = vsel %vm2365_vm13, nan, %v2375_v20  ;;  %v7852_v24 = vpack.c.bf16 %v6871_v22, %v6870_v4  ;;  %v7855_v2 = vpack.c.bf16 %v6873_v27, %v6872_v26  ;;  %vm3010_vm13 = vcmask 1041408   ;;  %v6887_v19 = vld [vmem:[%s10871_s4 + $0xd8] sm:$0xff]  ;;  %v6888_v4 = vld [vmem:[%s10871_s4 + $0xe0] sm:$0xff]  ;;  %v6889_v22 = vld [vmem:[%s10871_s4 + $0xe8] sm:$0xff] }
 0x89c   : > { %v2589_v12 = vmul.f32 %v2588_v29, %v2376_v33  ;;  %v8534_v39 = vpop.eup %8533  ;;  %v2565_v13 = vxor.u32 2147483648, %v2564_v37  ;;  %v7858_v35 = vpack.c.bf16 %v3022_v31, %v3021_v18 }
 0x89d   : > { %v8536_v25 = vpop.eup %8535  ;;  %v2477_v43 = vxor.u32 2147483648, %v8534_v39 }
 0x89e   : > { %7352 = vmatmul.mubr.msk.f32.vlgmr.msra.gmra.mrb[6].mxu0 %vm2602_vm14, %v2589_v12  ;;  %v2474_v58 = vxor.u32 2147483648, %v8536_v25  ;;  %v2566_v16 = vsel %vm2483_vm0, %v2565_v13, %v2564_v37  ;;  %vm3044_vm0 = vcmask 1046528  }
 0x89f   : > { %7354 = vmatprep.mubr.msk.f32.mxu0 %vm9101_vm1, %v9102_v9  ;;  %7844 = vmatpush3.bf16.msra.mxu0 %v7843_v34  ;;  %v2478_v40 = vsel %vm2476_vm3, %v2477_v43, %v8536_v25  ;;  %v2569_v47 = vsel %vm9968_vm15, %v9778_v45, %v2566_v16  ;;  %vm3019_vm15 = vcmask 1045504   ;;  %v3024_v25 = vld [vmem:[%s10871_s4 + $0x18] sm:$0xff]  ;;  %vm10776_vm3 = vcmask 179200  }
 0x8a0   : > { %7845 = vmatprep.subr.bf16.mxu0 %v9100_v6  ;;  %v2475_v59 = vsel %vm2473_vm4, %v8534_v39, %v2474_v58  ;;  %8537 = vcosq.f32 %v2569_v47  ;;  %v3023_v39 = vld [vmem:[%s10871_s4 + $0x10] sm:$0xff]  ;;  %v3026_v58 = vld [vmem:[%s10871_s4 + $0x28] sm:$0xff]  ;;  %vm10775_vm4 = vcmask 719872  }
 0x8a1   : > { %v2479_v49 = vsel %vm2472_vm7, %v2475_v59, %v2478_v40  ;;  %8539 = vsinq.f32 %v2569_v47  ;;  %v7864_v16 = vpack.c.bf16 %v3026_v58, %v3025_v54  ;;  %v3028_v47 = vld [vmem:[%s10871_s4 + $0x38] sm:$0xff]  ;;  %v3480_v58 = vld [vmem:[%s10874_s7 + $0x20] sm:$0xff] }
 0x8a2   : > { %v2480_v51 = vsel %vm2469_vm8, nan, %v2479_v49  ;;  %v7867_v52 = vpack.c.bf16 %v3028_v47, %v3027_v42  ;;  %v3487_v42 = vld [vmem:[%s10874_s7 + $0x58] sm:$0xff]  ;;  %v3345_v47 = vld [vmem:[%s10875_s1 + $0x8] sm:$0xff] }
 0x8a3   : > { %7847 = vmatpush3.bf16.msra.mxu0 %v7846_v32  ;;  %v2590_v56 = vmul.f32 %v2588_v29, %v2480_v51  ;;  %v7861_v32 = vpack.c.bf16 %v3024_v25, %v3023_v39  ;;  %v3483_v39 = vld [vmem:[%s10874_s7 + $0x38] sm:$0xff] }
 0x8a4   : > { %7848 = vmatprep.subr.bf16.mxu0 %v9100_v6 }
 0x8a5   : > { %7355 = vmatmul.mubr.msk.f32.gmra.mrb[8].mxu0 %vm2602_vm14, %v2590_v56  ;;  %v3029_v56 = vld [vmem:[%s10871_s4 + $0x40] sm:$0xff] }
 0x8a6   : > { %7357 = vmatprep.mubr.msk.f32.mxu0 %vm9101_vm1, %v9102_v9 }
 0x8a7   : > { %7850 = vmatpush3.bf16.msra.mxu0 %v7849_v50  ;;  %v7882_v50 = vpack.c.bf16 %v6887_v19, %v6886_v21  ;;  %v3350_v21 = vld [vmem:[%s10875_s1 + $0x30] sm:$0x3]  ;;  %v3496_v19 = vld [vmem:[%s10874_s7 + $0xa0] sm:$0xff] }
 0x8a8   : > { %7851 = vmatprep.subr.bf16.mxu0 %v9100_v6 }
 0x8aa   : > { %v8538_v57 = vpop.eup %8537 }
 0x8ab   : > { %v8540_v3 = vpop.eup %8539  ;;  %v2581_v44 = vxor.u32 2147483648, %v8538_v57  ;;  %7853 = vmatpush3.bf16.msra.mxu0 %v7852_v24  ;;  %v7885_v24 = vpack.c.bf16 %v6889_v22, %v6888_v4 }
 0x8ac   : > { %v2578_v46 = vxor.u32 2147483648, %v8540_v3  ;;  %7854 = vmatprep.subr.bf16.mxu0 %v9100_v6 }
 0x8ad   : > { %v2582_v63 = vsel %vm2580_vm9, %v2581_v44, %v8540_v3  ;;  %v7870_v44 = vpack.c.bf16 %v3030_v30, %v3029_v56  ;;  %v3489_v56 = vld [vmem:[%s10874_s7 + $0x68] sm:$0xff]  ;;  %v3491_v30 = vld [vmem:[%s10874_s7 + $0x78] sm:$0xff] }
 0x8ae   : > { %v2579_v0 = vsel %vm2577_vm10, %v8538_v57, %v2578_v46 }
 0x8af   : > { %v2583_v1 = vsel %vm2576_vm11, %v2579_v0, %v2582_v63  ;;  %7856 = vmatpush3.bf16.msra.mxu0 %v7855_v2 }
 0x8b0   : > { %v2584_v11 = vsel %vm2573_vm12, nan, %v2583_v1  ;;  %7857 = vmatprep.subr.bf16.mxu0 %v9100_v6  ;;  %v6880_v1 = vld [vmem:[%s10871_s4 + $0xa0] sm:$0xff] }
 0x8b1   : > { %v2591_v7 = vmul.f32 %v2588_v29, %v2584_v11  ;;  %v6881_v11 = vld [vmem:[%s10871_s4 + $0xa8] sm:$0xff] }
 0x8b3   : > { %7358 = vmatmul.mubr.msk.f32.gmra.mrb[10].mxu0 %vm2602_vm14, %v2591_v7  ;;  %v7873_v7 = vpack.c.bf16 %v6881_v11, %v6880_v1  ;;  %v3347_v1 = vld [vmem:[%s10875_s1 + $0x18] sm:$0xff] }
 0x8b4   : > { %7406 = vmatprep.mubr.msk.f32.mxu0 %vm9101_vm1, %v9102_v9 }
 0x8cf   : > { %v2841_v8 = vpop.f32.mrb[10].mxu1 }
 0x8d0   : > { %v2842_v15 = vadd.f32 1e-08, %v2841_v8  ;;  %v7375_v17 = vpop.f32.mrb[11].mxu1  ;;  %v6882_v8 = vld [vmem:[%s10871_s4 + $0xb0] sm:$0xff] }
 0x8d2   : > { %8541 = vrsqrt.f32 %v2842_v15  ;;  %v6883_v15 = vld [vmem:[%s10871_s4 + $0xb8] sm:$0xff] }
 0x8d3   : > { %v2919_v14 = vpop.f32.mrb[12].mxu1  ;;  %v7876_v17 = vpack.c.bf16 %v6883_v15, %v6882_v8  ;;  %v3492_v8 = vld [vmem:[%s10874_s7 + $0x80] sm:$0xff]  ;;  %v3494_v15 = vld [vmem:[%s10874_s7 + $0x90] sm:$0xff] }
 0x8d4   : > { %v7380_v48 = vpop.f32.mrb[13].mxu1  ;;  %v3003_v55 = vrot.slane %v2919_v14, %v9738_v53  ;;  %v6884_v14 = vld [vmem:[%s10871_s4 + $0xc0] sm:$0xff] }
 0x8d5   : > { %v6885_v48 = vld [vmem:[%s10871_s4 + $0xc8] sm:$0xff]  ;;  %s10880_s4 = sld [smem:[#allocation53_spill]] }
 0x8dc   : > { %v8542_v45 = vpop.eup %8541 }
 0x8dd   : > { %7384 = vmatmul.mubr.msk.f32.vlgmr.msra.gmra.mrb[14].mxu1 %vm1942_vm6, %v8542_v45  ;;  %v7879_v45 = vpack.c.bf16 %v6885_v48, %v6884_v14  ;;  %v7908_v14 = vpack.c.bf16 %v3494_v15, %v3492_v8  ;;  %v3497_v48 = vld [vmem:[%s10874_s7 + $0xa8] sm:$0xff] }
 0x8de   : > { %7479 = vmatprep.mubr.msk.f32.mxu1 %vm9101_vm1, %v9102_v9 }
 0x971   : > { %v2678_v61 = vpop.f32.mrb[6].mxu0 }
 0x972   : > { %v3004_v5 = vmul.f32 %v3003_v55, %v2678_v61  ;;  %v7353_v28 = vpop.f32.mrb[7].mxu0 }
 0x973   : > { %v6893_v28 = vld [vmem:[#allocation17] ss:$0 sm:$0xff] }
 0x974   : > { %v3011_v10 = vrot.slane %v3004_v5, 6 }
 0x976   : > { %v3018_v33 = vsel %vm3010_vm13, 0.0, %v3011_v10 }
 0x977   : > { %v3045_v36 = vrot.slane %v3018_v33, 1  ;;  %v3233_v23 = vrot.slane %v3018_v33, 2 }
 0x978   : > { %v2683_v62 = vpop.f32.mrb[8].mxu0 }
 0x979   : > { %v3005_v29 = vmul.f32 %v3003_v55, %v2683_v62  ;;  %v7356_v20 = vpop.f32.mrb[9].mxu0 }
 0x97b   : > { %v3012_v34 = vrot.slane %v3005_v29, 6 }
 0x97d   : > { %v3013_v12 = vsel %vm3010_vm13, %v3011_v10, %v3012_v34 }
 0x97e   : > { %v3046_v37 = vrot.slane %v3013_v12, 1  ;;  %v3234_v38 = vrot.slane %v3013_v12, 2 }
 0x980   : > { %v3047_v13 = vsel %vm3044_vm0, %v3045_v36, %v3046_v37  ;;  %v10010_v43 = vsel %vm3019_vm15, %v3233_v23, %v3234_v38  ;;  %v3479_v36 = vld [vmem:[%s10874_s7 + $0x18] sm:$0xff]  ;;  %v3476_v23 = vld [vmem:[%s10874_s7] sm:$0xff] }
 0x981   : > { %7407 = vmatmul.mubr.msk.f32.vlgmr.msra.gmra.mrb[12].mxu0 %vm2602_vm14, %v3047_v13 }
 0x982   : > { %7859 = vmatpush3.bf16.msra.mxu0 %v7858_v35  ;;  %7409 = vmatprep.mubr.msk.f32.mxu0 %vm9101_vm1, %v9102_v9  ;;  %v3477_v35 = vld [vmem:[%s10874_s7 + $0x8] sm:$0xff] }
 0x983   : > { %7860 = vmatprep.subr.bf16.mxu0 %v9100_v6  ;;  %v7890_v25 = vpack.c.bf16 %v3479_v36, %v3477_v35  ;;  %v3789_v35 = vld [vmem:[%s10876_s15 + $0x20] sm:$0xff]  ;;  %v3790_v36 = vld [vmem:[%s10876_s15 + $0x28] sm:$0xff] }
 0x986   : > { %7862 = vmatpush3.bf16.msra.mxu0 %v7861_v32  ;;  %v2688_v40 = vpop.f32.mrb[10].mxu0 }
 0x987   : > { %7863 = vmatprep.subr.bf16.mxu0 %v9100_v6  ;;  %v3006_v59 = vmul.f32 %v3003_v55, %v2688_v40  ;;  %v7359_v49 = vpop.f32.mrb[11].mxu0  ;;  %v3485_v40 = vld [vmem:[%s10874_s7 + $0x48] sm:$0xff] }
 0x988   : > { %v7898_v49 = vpack.c.bf16 %v3487_v42, %v3485_v40  ;;  %v3798_v40 = vld [vmem:[%s10876_s15 + $0x68] sm:$0xff] }
 0x989   : > { %v3014_v51 = vrot.slane %v3006_v59, 6 }
 0x98a   : > { %7865 = vmatpush3.bf16.msra.mxu0 %v7864_v16  ;;  %v3482_v16 = vld [vmem:[%s10874_s7 + $0x30] sm:$0xff] }
 0x98b   : > { %7866 = vmatprep.subr.bf16.mxu0 %v9100_v6  ;;  %v3015_v60 = vsel %vm3010_vm13, %v3012_v34, %v3014_v51  ;;  %v7896_v59 = vpack.c.bf16 %v3482_v16, %v3480_v58  ;;  %v3484_v51 = vld [vmem:[%s10874_s7 + $0x40] sm:$0xff] }
 0x98c   : > { %v3020_v57 = vsel %vm3019_vm15, %v3015_v60, 0.0  ;;  %v3346_v60 = vld [vmem:[%s10875_s1 + $0x10] sm:$0xff]  ;;  %v3797_v16 = vld [vmem:[%s10876_s15 + $0x60] sm:$0xff] }
 0x98d   : > { %v3048_v3 = vrot.slane %v3020_v57, 1  ;;  %v3236_v46 = vrot.slane %v3020_v57, 2  ;;  %v7941_v42 = vpack.c.bf16 %v3798_v40, %v3797_v16 }
 0x98e   : > { %7868 = vmatpush3.bf16.msra.mxu0 %v7867_v52  ;;  %v3486_v52 = vld [vmem:[%s10874_s7 + $0x50] sm:$0xff] }
 0x98f   : > { %7869 = vmatprep.subr.bf16.mxu0 %v9100_v6  ;;  %v3049_v63 = vsel %vm3044_vm0, %v3046_v37, %v3048_v3  ;;  %v3237_v0 = vsel %vm3019_vm15, %v3234_v38, %v3236_v46  ;;  %v3478_v37 = vld [vmem:[%s10874_s7 + $0x10] sm:$0xff]  ;;  %v3481_v38 = vld [vmem:[%s10874_s7 + $0x28] sm:$0xff] }
 0x990   : > { %7410 = vmatmul.mubr.msk.f32.gmra.mrb[14].mxu0 %vm2602_vm14, %v3049_v63  ;;  %v7892_v32 = vpack.c.bf16 %v3478_v37, %v3476_v23  ;;  %v7894_v54 = vpack.c.bf16 %v3483_v39, %v3481_v38  ;;  %v3493_v63 = vld [vmem:[%s10874_s7 + $0x88] sm:$0xff]  ;;  %v7929_v23 = vpack.c.bf16 %v3790_v36, %v3789_v35  ;;  %v3791_v37 = vld [vmem:[%s10876_s15 + $0x30] sm:$0xff]  ;;  %v3792_v38 = vld [vmem:[%s10876_s15 + $0x38] sm:$0xff] }
 0x991   : > { %7412 = vmatprep.mubr.msk.f32.mxu0 %vm9101_vm1, %v9102_v9  ;;  %v7932_v39 = vpack.c.bf16 %v3792_v38, %v3791_v37 }
 0x992   : > { %7871 = vmatpush3.bf16.msra.mxu0 %v7870_v44  ;;  %v3488_v44 = vld [vmem:[%s10874_s7 + $0x60] sm:$0xff] }
 0x993   : > { %7872 = vmatprep.subr.bf16.mxu0 %v9100_v6 }
 0x994   : > { %7413 = vmatmul.mubr.msk.f32.gmra.mrb[16].mxu0 %vm2602_vm14, %v3048_v3  ;;  %v7902_v3 = vpack.c.bf16 %v3491_v30, %v3489_v56  ;;  %v3803_v30 = vld [vmem:[%s10876_s15 + $0x90] sm:$0xff] }
 0x995   : > { %7435 = vmatprep.mubr.msk.f32.mxu0 %vm9101_vm1, %v9102_v9 }
 0x998   : > { %7436 = vmatmul.mubr.msk.f32.vlgmr.msra.gmra.mrb[12].mxu0 %vm2602_vm14, %v3018_v33 }
 0x999   : > { %7874 = vmatpush3.bf16.msra.mxu0 %v7873_v7  ;;  %7438 = vmatprep.mubr.msk.f32.mxu0 %vm9101_vm1, %v9102_v9 }
 0x99a   : > { %7875 = vmatprep.subr.bf16.mxu0 %v9100_v6 }
 0x99c   : > { %7439 = vmatmul.mubr.msk.f32.gmra.mrb[14].mxu0 %vm2602_vm14, %v3013_v12 }
 0x99d   : > { %7877 = vmatpush3.bf16.msra.mxu0 %v7876_v17  ;;  %7441 = vmatprep.mubr.msk.f32.mxu0 %vm9101_vm1, %v9102_v9  ;;  %v3348_v17 = vld [vmem:[%s10875_s1 + $0x20] sm:$0xff] }
 0x99e   : > { %7878 = vmatprep.subr.bf16.mxu0 %v9100_v6 }
 0x9a0   : > { %7442 = vmatmul.mubr.msk.f32.gmra.mrb[16].mxu0 %vm2602_vm14, %v3020_v57  ;;  %v7900_v57 = vpack.c.bf16 %v3486_v52, %v3484_v51  ;;  %v3801_v51 = vld [vmem:[%s10876_s15 + $0x80] sm:$0xff]  ;;  %v3802_v52 = vld [vmem:[%s10876_s15 + $0x88] sm:$0xff] }
 0x9a1   : > { %7880 = vmatpush3.bf16.msra.mxu0 %v7879_v45  ;;  %7464 = vmatprep.mubr.msk.f32.mxu0 %vm9101_vm1, %v9102_v9  ;;  %v3349_v45 = vld [vmem:[%s10875_s1 + $0x28] sm:$0xff]  ;;  %v7947_v56 = vpack.c.bf16 %v3802_v52, %v3801_v51 }
 0x9a2   : > { %7881 = vmatprep.subr.bf16.mxu0 %v9100_v6 }
 0x9a5   : > { %7883 = vmatpush3.bf16.msra.mxu0 %v7882_v50 }
 0x9a6   : > { %7884 = vmatprep.subr.bf16.mxu0 %v9100_v6 }
 0x9a9   : > { %7886 = vmatpush3.bf16.msra.mxu0 %v7885_v24 }
 0x9aa   : > { %7922 = vmatprep.subr.bf16.mxu0 %v9100_v6 }
 0x9ac   : > { %7465 = vmatmul.mubr.msk.f32.vlgmr.msra.gmra.mrb[12].mxu0 %vm2602_vm14, %v10010_v43  ;;  %v3344_v43 = vld [vmem:[%s10875_s1] sm:$0xff]  ;;  %s10879_s1 = sld [smem:[#allocation52_spill]] }
 0x9ad   : > { %7467 = vmatprep.mubr.msk.f32.mxu0 %vm9101_vm1, %v9102_v9 }
 0x9b0   : > { %v2996_v26 = vpop.f32.mrb[14].mxu1  ;;  %7468 = vmatmul.mubr.msk.f32.gmra.mrb[14].mxu0 %vm2602_vm14, %v3237_v0  ;;  %v3495_v0 = vld [vmem:[%s10874_s7 + $0x98] sm:$0xff] }
 0x9b1   : > { %v7385_v27 = vpop.f32.mrb[15].mxu1  ;;  %7470 = vmatprep.mubr.msk.f32.mxu0 %vm9101_vm1, %v9102_v9  ;;  %v3330_v2 = vrot.slane %v2996_v26, %v9738_v53  ;;  %v7906_v7 = vpack.c.bf16 %v3495_v0, %v3493_v63  ;;  %v3807_v63 = vld [vmem:[%s10876_s15 + $0xb0] sm:$0xff]  ;;  %v3808_v0 = vld [vmem:[%s10876_s15 + $0xb8] sm:$0xff] }
 0x9b4   : > { %7471 = vmatmul.mubr.msk.f32.gmra.mrb[16].mxu0 %vm2602_vm14, %v3236_v46  ;;  %v3490_v46 = vld [vmem:[%s10874_s7 + $0x70] sm:$0xff]  ;;  %s9119_s7 = smov 96  }
 0x9b5   : > { %v7904_v11 = vpack.c.bf16 %v3490_v46, %v3488_v44  ;;  %v3806_v44 = vld [vmem:[%s10876_s15 + $0xa8] sm:$0xff] }
 0xa7f   : > { %v3310_v55 = vpop.f32.mrb[12].mxu0 }
 0xa80   : > { %v3331_v61 = vmul.f32 %v3330_v2, %v3310_v55  ;;  %v7466_v5 = vpop.f32.mrb[13].mxu0 }
 0xa82   : > { %v3341_v20 = vadd.f32 %v6893_v28, %v3331_v61 }
 0xa83   : > { %v3315_v10 = vpop.f32.mrb[14].mxu0 }
 0xa84   : > { %v3332_v62 = vmul.f32 %v3330_v2, %v3315_v10  ;;  %v7469_v29 = vpop.f32.mrb[15].mxu0 }
 0xa86   : > { %v3342_v18 = vadd.f32 %v6893_v28, %v3332_v62 }
 0xa87   : > { %v3320_v31 = vpop.f32.mrb[16].mxu0 }
 0xa88   : > { %v7888_v33 = vpack.c.bf16 %v3342_v18, %v3341_v20  ;;  %v3333_v34 = vmul.f32 %v3330_v2, %v3320_v31  ;;  %v7472_v12 = vpop.f32.mrb[17].mxu0  ;;  %v3785_v20 = vld [vmem:[%s10876_s15] sm:$0xff]  ;;  %v3786_v18 = vld [vmem:[%s10876_s15 + $0x8] sm:$0xff]  ;;  %v3787_v31 = vld [vmem:[%s10876_s15 + $0x10] sm:$0xff] }
 0xa8a   : > { %7889 = vmatpush3.bf16.msra.mxu1 %v7888_v33  ;;  %v3343_v13 = vadd.f32 %v6893_v28, %v3333_v34  ;;  %v7923_v33 = vpack.c.bf16 %v3786_v18, %v3785_v20  ;;  %v3788_v34 = vld [vmem:[%s10876_s15 + $0x18] sm:$0xff] }
 0xa8b   : > { %7477 = vmatprep.subr.mxu1 %v9102_v9  ;;  %v7926_v12 = vpack.c.bf16 %v3788_v34, %v3787_v31 }
 0xa8c   : > { %7924 = vmatpush1.bf16.msra.mxu0 %v7923_v33 }
 0xa8d   : > { %7925 = vmatprep.subr.bf16.mxu0 %v9100_v6 }
 0xa8e   : > { %7478 = vmatpush3.msk.msra.mxu1 %vm3019_vm15, %v3343_v13  ;;  %v3794_v13 = vld [vmem:[%s10876_s15 + $0x48] sm:$0xff] }
 0xa8f   : > { %7480 = vmatmul.mubr.msk.f32.vlgmr.msra.gmra.mrb[16].mxu1 %vm10776_vm3, %v3344_v43  ;;  %7891 = vmatprep.subr.bf16.mxu1 %v7890_v25  ;;  %v3793_v25 = vld [vmem:[%s10876_s15 + $0x40] sm:$0xff] }
 0xa90   : > { %7482 = vmatprep.mubr.msk.f32.mxu1 %vm9101_vm1, %v9102_v9  ;;  %7893 = vmatpush1.bf16.msra.mxu1 %v7892_v32  ;;  %v7935_v43 = vpack.c.bf16 %v3794_v13, %v3793_v25  ;;  %v3795_v32 = vld [vmem:[%s10876_s15 + $0x50] sm:$0xff] }
 0xa91   : > { %7895 = vmatprep.subr.bf16.mxu1 %v7894_v54  ;;  %7927 = vmatpush1.bf16.msra.mxu0 %v7926_v12  ;;  %v3796_v54 = vld [vmem:[%s10876_s15 + $0x58] sm:$0xff] }
 0xa92   : > { %7928 = vmatprep.subr.bf16.mxu0 %v9100_v6  ;;  %v7938_v58 = vpack.c.bf16 %v3796_v54, %v3795_v32 }
 0xa93   : > { %7483 = vmatmul.mubr.msk.f32.gmra.mrb[18].mxu1 %vm10776_vm3, %v3345_v47  ;;  %v3799_v47 = vld [vmem:[%s10876_s15 + $0x70] sm:$0xff] }
 0xa94   : > { %7485 = vmatprep.mubr.msk.f32.mxu1 %vm9101_vm1, %v9102_v9  ;;  %7897 = vmatpush1.bf16.msra.mxu1 %v7896_v59  ;;  %v3800_v59 = vld [vmem:[%s10876_s15 + $0x78] sm:$0xff] }
 0xa95   : > { %7899 = vmatprep.subr.bf16.mxu1 %v7898_v49  ;;  %7930 = vmatpush1.bf16.msra.mxu0 %v7929_v23  ;;  %v7944_v49 = vpack.c.bf16 %v3800_v59, %v3799_v47 }
 0xa96   : > { %7931 = vmatprep.subr.bf16.mxu0 %v9100_v6 }
 0xa97   : > { %7486 = vmatmul.mubr.msk.f32.gmra.mrb[20].mxu1 %vm10776_vm3, %v3346_v60  ;;  %v3804_v60 = vld [vmem:[%s10876_s15 + $0x98] sm:$0xff] }
 0xa98   : > { %7488 = vmatprep.mubr.msk.f32.mxu1 %vm9101_vm1, %v9102_v9  ;;  %7901 = vmatpush1.bf16.msra.mxu1 %v7900_v57  ;;  %v7950_v57 = vpack.c.bf16 %v3804_v60, %v3803_v30 }
 0xa99   : > { %7903 = vmatprep.subr.bf16.mxu1 %v7902_v3  ;;  %7933 = vmatpush1.bf16.msra.mxu0 %v7932_v39  ;;  %v3805_v3 = vld [vmem:[%s10876_s15 + $0xa0] sm:$0xff] }
 0xa9a   : > { %7934 = vmatprep.subr.bf16.mxu0 %v9100_v6  ;;  %v7953_v46 = vpack.c.bf16 %v3806_v44, %v3805_v3 }
 0xa9b   : > { %7489 = vmatmul.mubr.msk.f32.gmra.mrb[22].mxu1 %vm10776_vm3, %v3347_v1  ;;  %v7956_v1 = vpack.c.bf16 %v3808_v0, %v3807_v63 }
 0xa9c   : > { %7491 = vmatprep.mubr.msk.f32.mxu1 %vm9101_vm1, %v9102_v9  ;;  %7905 = vmatpush1.bf16.msra.mxu1 %v7904_v11 }
 0xa9d   : > { %7907 = vmatprep.subr.bf16.mxu1 %v7906_v7  ;;  %7936 = vmatpush1.bf16.msra.mxu0 %v7935_v43 }
 0xa9e   : > { %7937 = vmatprep.subr.bf16.mxu0 %v9100_v6 }
 0xa9f   : > { %7492 = vmatmul.mubr.msk.f32.gmra.mrb[24].mxu1 %vm10776_vm3, %v3348_v17 }
 0xaa0   : > { %7494 = vmatprep.mubr.msk.f32.mxu1 %vm9101_vm1, %v9102_v9  ;;  %7909 = vmatpush1.bf16.msra.mxu1 %v7908_v14 }
 0xaa1   : > { %3540 = vmatprep.subr.mxu1 %v3497_v48  ;;  %7939 = vmatpush1.bf16.msra.mxu0 %v7938_v58 }
 0xaa2   : > { %7940 = vmatprep.subr.bf16.mxu0 %v9100_v6 }
 0xaa3   : > { %7495 = vmatmul.mubr.msk.f32.gmra.mrb[26].mxu1 %vm10776_vm3, %v3349_v45 }
 0xaa4   : > { %7497 = vmatprep.mubr.msk.f32.mxu1 %vm9101_vm1, %v9102_v9  ;;  %3541 = vmatpush1.msra.mxu1 %v3496_v19 }
 0xaa5   : > { %7942 = vmatpush1.bf16.msra.mxu0 %v7941_v42 }
 0xaa6   : > { %7943 = vmatprep.subr.bf16.mxu0 %v9100_v6 }
 0xaa7   : > { %7498 = vmatmul.mubr.msk.f32.gmra.mrb[28].mxu1 %vm10776_vm3, %v3350_v21 }
 0xaa8   : > { %3584 = vmatprep.mubr.f32.mxu1 %v9102_v9 }
 0xaa9   : > { %7945 = vmatpush1.bf16.msra.mxu0 %v7944_v49 }
 0xaaa   : > { %7946 = vmatprep.subr.bf16.mxu0 %v9100_v6 }
 0xaad   : > { %7948 = vmatpush1.bf16.msra.mxu0 %v7947_v56 }
 0xaae   : > { %7949 = vmatprep.subr.bf16.mxu0 %v9100_v6 }
 0xab1   : > { %7951 = vmatpush1.bf16.msra.mxu0 %v7950_v57 }
 0xab2   : > { %7952 = vmatprep.subr.bf16.mxu0 %v9100_v6 }
 0xab5   : > { %7954 = vmatpush1.bf16.msra.mxu0 %v7953_v46 }
 0xab6   : > { %7955 = vmatprep.subr.bf16.mxu0 %v9100_v6 }
 0xab9   : > { %7957 = vmatpush1.bf16.msra.mxu0 %v7956_v1 }
 0xaba   : > { %3868 = vmatprep.subr.mxu0 %v9102_v9 }
 0xb62   : > { %v3442_v50 = vpop.f32.mrb[16].mxu1 }
 0xb63   : > { %v7481_v4 = vpop.f32.mrb[17].mxu1  ;;  %6902 = vmatmul.mubr.msk.f32.vlgmr.msra.gmra.mrb[30].mxu1 %vm10775_vm4, %v3442_v50 }
 0xb64   : > { %3590 = vmatprep.mubr.f32.mxu1 %v9102_v9 }
 0xb66   : > { %v3447_v22 = vpop.f32.mrb[18].mxu1 }
 0xb67   : > { %v7484_v24 = vpop.f32.mrb[19].mxu1  ;;  %6903 = vmatmul.mubr.msk.f32.gmra.mrb[32].mxu1 %vm10775_vm4, %v3447_v22 }
 0xb68   : > { %3596 = vmatprep.mubr.f32.mxu1 %v9102_v9 }
 0xb6a   : > { %v3452_v26 = vpop.f32.mrb[20].mxu1 }
 0xb6b   : > { %v7487_v27 = vpop.f32.mrb[21].mxu1  ;;  %6904 = vmatmul.mubr.msk.f32.gmra.mrb[34].mxu1 %vm10775_vm4, %v3452_v26 }
 0xb6c   : > { %3602 = vmatprep.mubr.f32.mxu1 %v9102_v9 }
 0xb6e   : > { %v3457_v2 = vpop.f32.mrb[22].mxu1 }
 0xb6f   : > { %v7490_v55 = vpop.f32.mrb[23].mxu1  ;;  %6905 = vmatmul.mubr.msk.f32.gmra.mrb[36].mxu1 %vm10775_vm4, %v3457_v2 }
 0xb70   : > { %3608 = vmatprep.mubr.f32.mxu1 %v9102_v9 }
 0xb72   : > { %v3462_v61 = vpop.f32.mrb[24].mxu1 }
 0xb73   : > { %v7493_v5 = vpop.f32.mrb[25].mxu1  ;;  %6906 = vmatmul.mubr.msk.f32.gmra.mrb[38].mxu1 %vm10775_vm4, %v3462_v61 }
 0xb74   : > { %3614 = vmatprep.mubr.f32.mxu1 %v9102_v9 }
 0xb76   : > { %v3467_v28 = vpop.f32.mrb[26].mxu1 }
 0xb77   : > { %v7496_v10 = vpop.f32.mrb[27].mxu1  ;;  %6907 = vmatmul.mubr.msk.f32.gmra.mrb[40].mxu1 %vm10775_vm4, %v3467_v28 }
 0xb78   : > { %3620 = vmatprep.mubr.f32.mxu1 %v9102_v9 }
 0xb7a   : > { %v3472_v62 = vpop.f32.mrb[28].mxu1 }
 0xb7b   : > { %6908 = vmatmul.mubr.msk.f32.gmra.mrb[42].mxu1 %vm10775_vm4, %v3472_v62  ;;  %v7499_v29 = vpop.f32.mrb[29].mxu1 }
 0xb7c   : > { %3766 = vmatprep.mubr.f32.mxu1 %v9102_v9 }
 0xc36   : > { %v3586_v11 = vpop.f32.mrb[30].mxu1 }
 0xc37   : > { %vm3627_vm7 = vcmp.ge.f32.partialorder %v3586_v11, 0.0  ;;  %v3641_v7 = vmul.f32 0.2, %v3586_v11  ;;  %v3588_v8 = vpop.f32.mrb[31].mxu1 }
 0xc38   : > { %vm3628_vm8 = vcmp.ge.f32.partialorder %v3588_v8, 0.0  ;;  %v3642_v15 = vmul.f32 0.2, %v3588_v8 }
 0xc39   : > { %v3655_v17 = vsel %vm3627_vm7, %v3586_v11, %v3641_v7  ;;  %v3900_v7 = vld [vmem:[%s10877_s17] sm:$0xff] }
 0xc3a   : > { %v3592_v14 = vpop.f32.mrb[32].mxu1  ;;  %v3656_v48 = vsel %vm3628_vm8, %v3588_v8, %v3642_v15  ;;  %v3669_v50 = vmul.f32 1.4142135, %v3655_v17  ;;  %v3901_v8 = vld [vmem:[%s10877_s17 + $0x8] sm:$0xff]  ;;  %v3683_v17 = vld [vmem:[%s10878_s14] sm:$0xff] }
 0xc3b   : > { %vm3629_vm9 = vcmp.ge.f32.partialorder %v3592_v14, 0.0  ;;  %v3643_v45 = vmul.f32 0.2, %v3592_v14  ;;  %v3594_v21 = vpop.f32.mrb[33].mxu1  ;;  %v3670_v22 = vmul.f32 1.4142135, %v3656_v48 }
 0xc3c   : > { %vm3630_vm10 = vcmp.ge.f32.partialorder %v3594_v21, 0.0  ;;  %v3644_v19 = vmul.f32 0.2, %v3594_v21  ;;  %v3902_v48 = vld [vmem:[%s10877_s17 + $0x10] sm:$0xff] }
 0xc3d   : > { %v3657_v4 = vsel %vm3629_vm9, %v3592_v14, %v3643_v45  ;;  %v7959_v14 = vpack.c.bf16 %v3901_v8, %v3900_v7  ;;  %v3903_v45 = vld [vmem:[%s10877_s17 + $0x18] sm:$0xff] }
 0xc3e   : > { %v3671_v24 = vmul.f32 1.4142135, %v3657_v4  ;;  %v3658_v26 = vsel %vm3630_vm10, %v3594_v21, %v3644_v19  ;;  %v3598_v27 = vpop.f32.mrb[34].mxu1  ;;  %v3684_v21 = vld [vmem:[%s10878_s14 + $0x8] sm:$0xff]  ;;  %v7962_v19 = vpack.c.bf16 %v3903_v45, %v3902_v48  ;;  %v3809_v4 = vld [vmem:[%s10876_s15 + $0xc0] sm:$0xff] }
 0xc3f   : > { %v3672_v2 = vmul.f32 1.4142135, %v3658_v26  ;;  %vm3631_vm11 = vcmp.ge.f32.partialorder %v3598_v27, 0.0  ;;  %v3645_v55 = vmul.f32 0.2, %v3598_v27  ;;  %v3600_v61 = vpop.f32.mrb[35].mxu1  ;;  %3869 = vmatpush1.msra.mxu0 %v3809_v4 }
 0xc40   : > { %v7912_v5 = vpack.c.bf16 %v3671_v24, %v3669_v50  ;;  %vm3632_vm12 = vcmp.ge.f32.partialorder %v3600_v61, 0.0  ;;  %v3646_v28 = vmul.f32 0.2, %v3600_v61  ;;  %v3685_v50 = vld [vmem:[%s10878_s14 + $0x10] sm:$0xf]  ;;  %8009 = vmatprep.subr.bf16.mxu0 %v9100_v6 }
 0xc41   : > { %v7910_v10 = vpack.c.bf16 %v3672_v2, %v3670_v22  ;;  %v3659_v62 = vsel %vm3631_vm11, %v3598_v27, %v3645_v55  ;;  %v3976_v22 = vld [vmem:[#allocation20] sm:$0xf]  ;;  %v6932_v4 = vld [vmem:[%s10880_s4 + $0x90] sm:$0xff] }
 0xc42   : > { %v3604_v29 = vpop.f32.mrb[36].mxu1  ;;  %v3660_v20 = vsel %vm3632_vm12, %v3600_v61, %v3646_v28  ;;  %v3673_v34 = vmul.f32 1.4142135, %v3659_v62 }
 0xc43   : > { %vm3633_vm7 = vcmp.ge.f32.partialorder %v3604_v29, 0.0  ;;  %v3647_v18 = vmul.f32 0.2, %v3604_v29  ;;  %v3606_v31 = vpop.f32.mrb[37].mxu1  ;;  %7911 = vmatprep.subr.bf16.mxu1 %v7910_v10  ;;  %v3674_v35 = vmul.f32 1.4142135, %v3660_v20 }
 0xc44   : > { %vm3634_vm8 = vcmp.ge.f32.partialorder %v3606_v31, 0.0  ;;  %v3648_v33 = vmul.f32 0.2, %v3606_v31  ;;  %7913 = vmatpush1.bf16.msra.mxu1 %v7912_v5  ;;  %v3904_v5 = vld [vmem:[#allocation19] sm:$0x1] }
 0xc45   : > { %v3661_v12 = vsel %vm3633_vm7, %v3604_v29, %v3647_v18  ;;  %v4054_v20 = vld [vmem:[#allocation22] sm:$0xf]  ;;  %v4131_v18 = vld [vmem:[%s10879_s1] sm:$0xf]  ;;  %s10881_s1 = sld [smem:[#allocation54_spill]] }
 0xc46   : > { %v3675_v36 = vmul.f32 1.4142135, %v3661_v12  ;;  %v3662_v23 = vsel %vm3634_vm8, %v3606_v31, %v3648_v33  ;;  %v3610_v37 = vpop.f32.mrb[38].mxu1 }
 0xc47   : > { %v3676_v38 = vmul.f32 1.4142135, %v3662_v23  ;;  %vm3635_vm9 = vcmp.ge.f32.partialorder %v3610_v37, 0.0  ;;  %v3649_v39 = vmul.f32 0.2, %v3610_v37  ;;  %v3612_v25 = vpop.f32.mrb[39].mxu1 }
 0xc48   : > { %v7916_v13 = vpack.c.bf16 %v3675_v36, %v3673_v34  ;;  %vm3636_vm10 = vcmp.ge.f32.partialorder %v3612_v25, 0.0  ;;  %v3650_v43 = vmul.f32 0.2, %v3612_v25 }
 0xc49   : > { %v7914_v32 = vpack.c.bf16 %v3676_v38, %v3674_v35  ;;  %v3663_v54 = vsel %vm3635_vm9, %v3610_v37, %v3649_v39  ;;  %vm3686_vm9 = vcmask 408576  }
 0xc4a   : > { %v3616_v58 = vpop.f32.mrb[40].mxu1  ;;  %v3664_v16 = vsel %vm3636_vm10, %v3612_v25, %v3650_v43  ;;  %v3677_v59 = vmul.f32 1.4142135, %v3663_v54  ;;  %vm3810_vm10 = vcmask 588800  }
 0xc4b   : > { %vm3637_vm11 = vcmp.ge.f32.partialorder %v3616_v58, 0.0  ;;  %v3651_v40 = vmul.f32 0.2, %v3616_v58  ;;  %v3618_v42 = vpop.f32.mrb[41].mxu1  ;;  %7915 = vmatprep.subr.bf16.mxu1 %v7914_v32  ;;  %v3678_v51 = vmul.f32 1.4142135, %v3664_v16 }
 0xc4c   : > { %vm3638_vm12 = vcmp.ge.f32.partialorder %v3618_v42, 0.0  ;;  %v3652_v47 = vmul.f32 0.2, %v3618_v42  ;;  %7917 = vmatpush1.bf16.msra.mxu1 %v7916_v13  ;;  %v6925_v16 = vld [vmem:[%s10880_s4 + $0x58] sm:$0xff] }
 0xc4d   : > { %v3665_v49 = vsel %vm3637_vm11, %v3616_v58, %v3651_v40  ;;  %v6924_v58 = vld [vmem:[%s10880_s4 + $0x50] sm:$0xff] }
 0xc4e   : > { %v3679_v52 = vmul.f32 1.4142135, %v3665_v49  ;;  %v3666_v56 = vsel %vm3638_vm12, %v3618_v42, %v3652_v47  ;;  %v3622_v30 = vpop.f32.mrb[42].mxu1 }
 0xc4f   : > { %v3680_v60 = vmul.f32 1.4142135, %v3666_v56  ;;  %v3653_v57 = vmul.f32 0.2, %v3622_v30  ;;  %v3624_v3 = vpop.f32.mrb[43].mxu1  ;;  %vm3639_vm7 = vcmp.ge.f32.partialorder %v3622_v30, 0.0 }
 0xc50   : > { %v7920_v44 = vpack.c.bf16 %v3679_v52, %v3677_v59  ;;  %vm3640_vm8 = vcmp.ge.f32.partialorder %v3624_v3, 0.0  ;;  %v3654_v46 = vmul.f32 0.2, %v3624_v3  ;;  %v7965_v52 = vpack.c.bf16 %v6925_v16, %v6924_v58  ;;  %v6948_v58 = vld [vmem:[%s10880_s4 + $0xe0] sm:$0xff]  ;;  %v6949_v16 = vld [vmem:[%s10880_s4 + $0xe8] sm:$0xff] }
 0xc51   : > { %v7918_v63 = vpack.c.bf16 %v3680_v60, %v3678_v51  ;;  %v3667_v1 = vsel %vm3639_vm7, %v3622_v30, %v3653_v57  ;;  %v6926_v57 = vld [vmem:[%s10880_s4 + $0x60] sm:$0xff] }
 0xc52   : > { %v3668_v0 = vsel %vm3640_vm8, %v3624_v3, %v3654_v46  ;;  %v3681_v15 = vmul.f32 1.4142135, %v3667_v1  ;;  %v6927_v3 = vld [vmem:[%s10880_s4 + $0x68] sm:$0xff] }
 0xc53   : > { %v3682_v11 = vmul.f32 1.4142135, %v3668_v0  ;;  %7919 = vmatprep.subr.bf16.mxu1 %v7918_v63  ;;  %v7968_v8 = vpack.c.bf16 %v6927_v3, %v6926_v57 }
 0xc54   : > { %7921 = vmatpush1.bf16.msra.mxu1 %v7920_v44 }
 0xc55   : > { %6909 = vmatprep.subr.msk.mxu1 %vm3010_vm13, %v3682_v11 }
 0xc58   : > { %6910 = vmatpush1.msk.msra.mxu1 %vm3010_vm13, %v3681_v15  ;;  %v6928_v15 = vld [vmem:[%s10880_s4 + $0x70] sm:$0xff] }
 0xc59   : > { %6911 = vmatmul.mubr.msk.f32.vlgmr.msra.gmra.mrb[44].mxu1 %vm3686_vm9, %v3683_v17  ;;  %7958 = vmatprep.subr.bf16.mxu1 %v9100_v6  ;;  %v6929_v17 = vld [vmem:[%s10880_s4 + $0x78] sm:$0xff] }
 0xc5a   : > { %3772 = vmatprep.mubr.f32.mxu1 %v9102_v9  ;;  %7960 = vmatpush3.bf16.msra.mxu1 %v7959_v14  ;;  %v7971_v45 = vpack.c.bf16 %v6929_v17, %v6928_v15 }
 0xc5b   : > { %7961 = vmatprep.subr.bf16.mxu1 %v9100_v6 }
 0xc5d   : > { %6912 = vmatmul.mubr.msk.f32.gmra.mrb[46].mxu1 %vm3686_vm9, %v3684_v21  ;;  %v6930_v21 = vld [vmem:[%s10880_s4 + $0x80] sm:$0xff] }
 0xc5e   : > { %3778 = vmatprep.mubr.f32.mxu1 %v9102_v9  ;;  %7963 = vmatpush3.bf16.msra.mxu1 %v7962_v19  ;;  %v6931_v19 = vld [vmem:[%s10880_s4 + $0x88] sm:$0xff] }
 0xc5f   : > { %7511 = vmatprep.subr.mxu1 %v9102_v9 }
 0xc61   : > { %6913 = vmatmul.mubr.msk.f32.gmra.mrb[48].mxu1 %vm3686_vm9, %v3685_v50  ;;  %v7974_v50 = vpack.c.bf16 %v6931_v19, %v6930_v21  ;;  %v4549_v21 = vld [vmem:[%s10883_s5] sm:$0xff] }
 0xc62   : > { %7508 = vmatprep.mubr.msk.f32.mxu1 %vm9101_vm1, %v9102_v9 }
 0xc65   : > { %7509 = vmatmul.mubr.msk.f32.vlgmr.msra.gmra.mrb[50].mxu1 %vm1600_vm2, %v9697_v41 }
 0xc66   : > { %7513 = vmatprep.mubr.msk.f32.mxu1 %vm9101_vm1, %v9102_v9  ;;  %7512 = vmatpush3.msk.msra.mxu1 %vm1946_vm5, %v3976_v22  ;;  %v6933_v22 = vld [vmem:[%s10880_s4 + $0x98] sm:$0xff] }
 0xc67   : > { %7516 = vmatprep.subr.mxu1 %v9102_v9 }
 0xd2c   : > { %v3768_v24 = vpop.f32.mrb[44].mxu1 }
 0xd2d   : > { %v3770_v26 = vpop.f32.mrb[45].mxu1 }
 0xd2e   : > { %6914 = vmatprep.mubr.msk.f32.mxu0 %vm3810_vm10, %v3770_v26  ;;  %v4227_v26 = vld [vmem:[%s10880_s4] sm:$0xff] }
 0xd2f   : > { %3885 = vmatmul.mubr.f32.vlgmr.msra.gmra.mrb[18].mxu0 %v3768_v24  ;;  %v7977_v24 = vpack.c.bf16 %v6933_v22, %v6932_v4 }
 0xd30   : > { %v3774_v27 = vpop.f32.mrb[46].mxu1 }
 0xd31   : > { %v3776_v2 = vpop.f32.mrb[47].mxu1 }
 0xd32   : > { %6915 = vmatprep.mubr.msk.f32.mxu0 %vm3810_vm10, %v3776_v2 }
 0xd33   : > { %3890 = vmatmul.mubr.f32.gmra.mrb[20].mxu0 %v3774_v27  ;;  %v4228_v27 = vld [vmem:[%s10880_s4 + $0x8] sm:$0xff] }
 0xd34   : > { %v3780_v55 = vpop.f32.mrb[48].mxu1  ;;  %v7980_v2 = vpack.c.bf16 %v4228_v27, %v4227_v26  ;;  %v4550_v27 = vld [vmem:[%s10883_s5 + $0x8] sm:$0xff] }
 0xd35   : > { %v3782_v61 = vpop.f32.mrb[49].mxu1 }
 0xd36   : > { %6916 = vmatprep.mubr.msk.f32.mxu0 %vm3810_vm10, %v3782_v61  ;;  %v4230_v61 = vld [vmem:[%s10880_s4 + $0x18] sm:$0xff] }
 0xd37   : > { %3895 = vmatmul.mubr.f32.gmra.mrb[22].mxu0 %v3780_v55  ;;  %v4229_v55 = vld [vmem:[%s10880_s4 + $0x10] sm:$0xff] }
 0xd38   : > { %v3971_v28 = vpop.f32.mrb[50].mxu1  ;;  %7619 = vmatprep.mubr.msk.f32.mxu0 %vm9101_vm1, %v9102_v9 }
 0xd39   : > { %v3972_v10 = vadd.f32 %v3971_v28, %v3904_v5  ;;  %v7510_v62 = vpop.f32.mrb[51].mxu1  ;;  %v7983_v5 = vpack.c.bf16 %v4230_v61, %v4229_v55  ;;  %v4231_v28 = vld [vmem:[%s10880_s4 + $0x20] sm:$0xff] }
 0xd3b   : > { %v3975_v29 = vmul.f32 %v3972_v10, %v3972_v10 }
 0xd3d   : > { %7514 = vmatmul.mubr.msk.f32.vlgmr.msra.gmra.mrb[52].mxu1 %vm1942_vm6, %v3975_v29  ;;  %v4233_v29 = vld [vmem:[%s10880_s4 + $0x30] sm:$0xff] }
 0xd3e   : > { %7517 = vmatpush3.msk.msra.mxu1 %vm1946_vm5, %v4054_v20  ;;  %7518 = vmatprep.mubr.msk.f32.mxu1 %vm9101_vm1, %v9102_v9  ;;  %v4234_v20 = vld [vmem:[%s10880_s4 + $0x38] sm:$0xff] }
 0xd3f   : > { %7521 = vmatprep.subr.mxu1 %v9102_v9 }
 0xd41   : > { %7519 = vmatmul.mubr.msk.f32.vlgmr.msra.gmra.mrb[54].mxu1 %vm1942_vm6, %v3972_v10  ;;  %v4232_v10 = vld [vmem:[%s10880_s4 + $0x28] sm:$0xff] }
 0xd42   : > { %7523 = vmatprep.mubr.msk.f32.mxu1 %vm9101_vm1, %v9102_v9  ;;  %7522 = vmatpush3.msk.msra.mxu1 %vm1946_vm5, %v4131_v18  ;;  %v7986_v62 = vpack.c.bf16 %v4232_v10, %v4231_v28  ;;  %v7989_v18 = vpack.c.bf16 %v4234_v20, %v4233_v29 }
 0xd43   : > { %7964 = vmatprep.subr.bf16.mxu1 %v9100_v6 }
 0xe02   : > { %v3886_v31 = vpop.f32.mrb[18].mxu0 }
 0xe03   : > { %v3888_v33 = vpop.f32.mrb[19].mxu0 }
 0xe04   : > { %v4236_v33 = vld [vmem:[%s10880_s4 + $0x48] sm:$0xff] }
 0xe06   : > { %v3891_v34 = vpop.f32.mrb[20].mxu0 }
 0xe07   : > { %v3893_v12 = vpop.f32.mrb[21].mxu0 }
 0xe08   : > { %v6940_v12 = vld [vmem:[%s10880_s4 + $0xa0] sm:$0xff] }
 0xe0a   : > { %v3896_v35 = vpop.f32.mrb[22].mxu0 }
 0xe0b   : > { %v3898_v36 = vpop.f32.mrb[23].mxu0 }
 0xe10   : > { %v4049_v23 = vpop.f32.mrb[52].mxu1 }
 0xe11   : > { %v4050_v37 = vadd.f32 1e-08, %v4049_v23  ;;  %v7515_v38 = vpop.f32.mrb[53].mxu1  ;;  %v6942_v23 = vld [vmem:[%s10880_s4 + $0xb0] sm:$0xff] }
 0xe13   : > { %8543 = vrsqrt.f32 %v4050_v37  ;;  %v6943_v37 = vld [vmem:[%s10880_s4 + $0xb8] sm:$0xff] }
 0xe14   : > { %v4127_v39 = vpop.f32.mrb[54].mxu1  ;;  %v7998_v38 = vpack.c.bf16 %v6943_v37, %v6942_v23 }
 0xe15   : > { %v4211_v25 = vrot.slane %v4127_v39, %v9738_v53  ;;  %v7520_v13 = vpop.f32.mrb[55].mxu1  ;;  %v6944_v39 = vld [vmem:[%s10880_s4 + $0xc0] sm:$0xff] }
 0xe17   : > { %v4212_v43 = vmul.f32 %v4211_v25, %v3886_v31  ;;  %v4213_v32 = vmul.f32 %v4211_v25, %v3891_v34  ;;  %v4214_v54 = vmul.f32 %v4211_v25, %v3896_v35  ;;  %v4235_v31 = vld [vmem:[%s10880_s4 + $0x40] sm:$0xff]  ;;  %v6941_v35 = vld [vmem:[%s10880_s4 + $0xa8] sm:$0xff] }
 0xe18   : > { %v7992_v34 = vpack.c.bf16 %v4236_v33, %v4235_v31  ;;  %v7995_v36 = vpack.c.bf16 %v6941_v35, %v6940_v12  ;;  %v6945_v25 = vld [vmem:[%s10880_s4 + $0xc8] sm:$0xff]  ;;  %v4552_v12 = vld [vmem:[%s10883_s5 + $0x18] sm:$0xff] }
 0xe19   : > { %v4218_v40 = vrot.slane %v4212_v43, 6  ;;  %v4219_v42 = vrot.slane %v4213_v32, 6  ;;  %v4221_v47 = vrot.slane %v4214_v54, 6  ;;  %v8001_v13 = vpack.c.bf16 %v6945_v25, %v6944_v39  ;;  %v6946_v43 = vld [vmem:[%s10880_s4 + $0xd0] sm:$0xff]  ;;  %v6947_v32 = vld [vmem:[%s10880_s4 + $0xd8] sm:$0xff]  ;;  %s10882_s4 = sld [smem:[#allocation57_spill]] }
 0xe1a   : > { %v8004_v54 = vpack.c.bf16 %v6947_v32, %v6946_v43  ;;  %v4555_v43 = vld [vmem:[%s10883_s5 + $0x30] sm:$0x3] }
 0xe1b   : > { %v10217_v59 = vsel %vm3010_vm13, %v4218_v40, %v4219_v42  ;;  %v4222_v49 = vsel %vm3010_vm13, %v4219_v42, %v4221_v47  ;;  %v10221_v51 = vsel %vm3010_vm13, 0.0, %v4218_v40  ;;  %v8007_v40 = vpack.c.bf16 %v6949_v16, %v6948_v58 }
 0xe1c   : > { %v4250_v56 = vrot.slane %v10221_v51, 1  ;;  %v4438_v30 = vrot.slane %v10221_v51, 2  ;;  %v4439_v60 = vrot.slane %v10217_v59, 2  ;;  %v4251_v44 = vrot.slane %v10217_v59, 1 }
 0xe1d   : > { %v8544_v46 = vpop.eup %8543  ;;  %v10230_v63 = vsel %vm3019_vm15, %v4222_v49, 0.0 }
 0xe1e   : > { %7524 = vmatmul.mubr.msk.f32.vlgmr.msra.gmra.mrb[56].mxu1 %vm1942_vm6, %v8544_v46  ;;  %v4252_v0 = vsel %vm3044_vm0, %v4250_v56, %v4251_v44  ;;  %v4253_v1 = vrot.slane %v10230_v63, 1  ;;  %v10236_v11 = vsel %vm3019_vm15, %v4438_v30, %v4439_v60  ;;  %v4441_v7 = vrot.slane %v10230_v63, 2  ;;  %v6953_v56 = vld [vmem:[%s10881_s1] ss:$0 sm:$0xff]  ;;  %s10884_s1 = sld [smem:[#allocation58_spill]] }
 0xe1f   : > { %7966 = vmatpush3.bf16.msra.mxu1 %v7965_v52  ;;  %7546 = vmatprep.mubr.msk.f32.mxu1 %vm9101_vm1, %v9102_v9  ;;  %v4682_v15 = vld [vmem:[%s10882_s4 + $0x10] sm:$0xff]  ;;  %v4685_v17 = vld [vmem:[%s10882_s4 + $0x28] sm:$0xff]  ;;  %v4684_v4 = vld [vmem:[%s10882_s4 + $0x20] sm:$0xff] }
 0xe20   : > { %7967 = vmatprep.subr.bf16.mxu1 %v9100_v6  ;;  %v4254_v14 = vsel %vm3044_vm0, %v4251_v44, %v4253_v1  ;;  %v10248_v48 = vsel %vm3019_vm15, %v4439_v60, %v4441_v7  ;;  %v4686_v22 = vld [vmem:[%s10882_s4 + $0x30] sm:$0xff]  ;;  %v4691_v26 = vld [vmem:[%s10882_s4 + $0x58] sm:$0xff]  ;;  %v4688_v61 = vld [vmem:[%s10882_s4 + $0x40] sm:$0xff] }
 0xe21   : > { %v4693_v28 = vld [vmem:[%s10882_s4 + $0x68] sm:$0xff]  ;;  %v4695_v10 = vld [vmem:[%s10882_s4 + $0x78] sm:$0xff]  ;;  %v4694_v31 = vld [vmem:[%s10882_s4 + $0x70] sm:$0xff] }
 0xe22   : > { %v8024_v20 = vpack.c.bf16 %v4695_v10, %v4693_v28  ;;  %v4697_v33 = vld [vmem:[%s10882_s4 + $0x88] sm:$0xff]  ;;  %v4696_v23 = vld [vmem:[%s10882_s4 + $0x80] sm:$0xff]  ;;  %v4698_v37 = vld [vmem:[%s10882_s4 + $0x90] sm:$0xff] }
 0xe23   : > { %7969 = vmatpush3.bf16.msra.mxu1 %v7968_v8  ;;  %v4680_v8 = vld [vmem:[%s10882_s4] sm:$0xff]  ;;  %v8030_v39 = vpack.c.bf16 %v4698_v37, %v4696_v23  ;;  %v4701_v25 = vld [vmem:[%s10882_s4 + $0xa8] sm:$0xff] }
 0xe24   : > { %7970 = vmatprep.subr.bf16.mxu1 %v9100_v6  ;;  %v8014_v19 = vpack.c.bf16 %v4682_v15, %v4680_v8  ;;  %v4700_v32 = vld [vmem:[%s10882_s4 + $0xa0] sm:$0xff]  ;;  %v4993_v15 = vld [vmem:[%s10884_s1 + $0x30] sm:$0xff] }
 0xe25   : > { %v5005_v10 = vld [vmem:[%s10884_s1 + $0x90] sm:$0xff] }
 0xe27   : > { %7972 = vmatpush3.bf16.msra.mxu1 %v7971_v45 }
 0xe28   : > { %7973 = vmatprep.subr.bf16.mxu1 %v9100_v6 }
 0xe2b   : > { %7975 = vmatpush3.bf16.msra.mxu1 %v7974_v50 }
 0xe2c   : > { %7976 = vmatprep.subr.bf16.mxu1 %v9100_v6 }
 0xe2f   : > { %7978 = vmatpush3.bf16.msra.mxu1 %v7977_v24  ;;  %v4689_v24 = vld [vmem:[%s10882_s4 + $0x48] sm:$0xff] }
 0xe30   : > { %7979 = vmatprep.subr.bf16.mxu1 %v9100_v6  ;;  %v8020_v55 = vpack.c.bf16 %v4691_v26, %v4689_v24  ;;  %v5000_v24 = vld [vmem:[%s10884_s1 + $0x68] sm:$0xff] }
 0xe32   : > { %7547 = vmatmul.mubr.msk.f32.vlgmr.msra.gmra.mrb[58].mxu1 %vm2602_vm14, %v4252_v0 }
 0xe33   : > { %7981 = vmatpush3.bf16.msra.mxu1 %v7980_v2  ;;  %7549 = vmatprep.mubr.msk.f32.mxu1 %vm9101_vm1, %v9102_v9  ;;  %v8018_v2 = vpack.c.bf16 %v4686_v22, %v4684_v4  ;;  %v4999_v22 = vld [vmem:[%s10884_s1 + $0x60] sm:$0xff] }
 0xe34   : > { %7982 = vmatprep.subr.bf16.mxu1 %v9100_v6  ;;  %v8063_v26 = vpack.c.bf16 %v5000_v24, %v4999_v22 }
 0xe36   : > { %7550 = vmatmul.mubr.msk.f32.gmra.mrb[60].mxu1 %vm2602_vm14, %v4254_v14  ;;  %v4687_v14 = vld [vmem:[%s10882_s4 + $0x38] sm:$0xff] }
 0xe37   : > { %7984 = vmatpush3.bf16.msra.mxu1 %v7983_v5  ;;  %7552 = vmatprep.mubr.msk.f32.mxu1 %vm9101_vm1, %v9102_v9  ;;  %v8016_v50 = vpack.c.bf16 %v4687_v14, %v4685_v17  ;;  %v4690_v5 = vld [vmem:[%s10882_s4 + $0x50] sm:$0xff]  ;;  %v4994_v17 = vld [vmem:[%s10884_s1 + $0x38] sm:$0xff] }
 0xe38   : > { %7985 = vmatprep.subr.bf16.mxu1 %v9100_v6  ;;  %v8022_v29 = vpack.c.bf16 %v4690_v5, %v4688_v61  ;;  %v8054_v14 = vpack.c.bf16 %v4994_v17, %v4993_v15  ;;  %v5003_v61 = vld [vmem:[%s10884_s1 + $0x80] sm:$0xff]  ;;  %v5004_v5 = vld [vmem:[%s10884_s1 + $0x88] sm:$0xff] }
 0xe39   : > { %v8069_v28 = vpack.c.bf16 %v5004_v5, %v5003_v61 }
 0xe3a   : > { %7553 = vmatmul.mubr.msk.f32.gmra.mrb[62].mxu1 %vm2602_vm14, %v4253_v1 }
 0xe3b   : > { %7987 = vmatpush3.bf16.msra.mxu1 %v7986_v62  ;;  %7575 = vmatprep.mubr.msk.f32.mxu1 %vm9101_vm1, %v9102_v9  ;;  %v4551_v62 = vld [vmem:[%s10883_s5 + $0x10] sm:$0xff] }
 0xe3c   : > { %7988 = vmatprep.subr.bf16.mxu1 %v9100_v6 }
 0xe3f   : > { %7990 = vmatpush3.bf16.msra.mxu1 %v7989_v18  ;;  %v4692_v18 = vld [vmem:[%s10882_s4 + $0x60] sm:$0xff] }
 0xe40   : > { %7991 = vmatprep.subr.bf16.mxu1 %v9100_v6  ;;  %v8026_v35 = vpack.c.bf16 %v4694_v31, %v4692_v18  ;;  %v5008_v18 = vld [vmem:[%s10884_s1 + $0xa8] sm:$0xff] }
 0xe43   : > { %7993 = vmatpush3.bf16.msra.mxu1 %v7992_v34  ;;  %v4699_v34 = vld [vmem:[%s10882_s4 + $0x98] sm:$0xff] }
 0xe44   : > { %7994 = vmatprep.subr.bf16.mxu1 %v9100_v6 }
 0xe46   : > { %7576 = vmatmul.mubr.msk.f32.vlgmr.msra.gmra.mrb[58].mxu1 %vm2602_vm14, %v10221_v51 }
 0xe47   : > { %7996 = vmatpush3.bf16.msra.mxu1 %v7995_v36  ;;  %7578 = vmatprep.mubr.msk.f32.mxu1 %vm9101_vm1, %v9102_v9  ;;  %v8028_v36 = vpack.c.bf16 %v4699_v34, %v4697_v33  ;;  %v5009_v33 = vld [vmem:[%s10884_s1 + $0xb0] sm:$0xff]  ;;  %v5010_v34 = vld [vmem:[%s10884_s1 + $0xb8] sm:$0xff] }
 0xe48   : > { %7997 = vmatprep.subr.bf16.mxu1 %v9100_v6 }
 0xe4a   : > { %7579 = vmatmul.mubr.msk.f32.gmra.mrb[60].mxu1 %vm2602_vm14, %v10217_v59 }
 0xe4b   : > { %7999 = vmatpush3.bf16.msra.mxu1 %v7998_v38  ;;  %7581 = vmatprep.mubr.msk.f32.mxu1 %vm9101_vm1, %v9102_v9  ;;  %v4553_v38 = vld [vmem:[%s10883_s5 + $0x20] sm:$0xff] }
 0xe4c   : > { %8000 = vmatprep.subr.bf16.mxu1 %v9100_v6 }
 0xe4e   : > { %7582 = vmatmul.mubr.msk.f32.gmra.mrb[62].mxu1 %vm2602_vm14, %v10230_v63 }
 0xe4f   : > { %8002 = vmatpush3.bf16.msra.mxu1 %v8001_v13  ;;  %7604 = vmatprep.mubr.msk.f32.mxu1 %vm9101_vm1, %v9102_v9  ;;  %v4554_v13 = vld [vmem:[%s10883_s5 + $0x28] sm:$0xff]  ;;  %s10886_s5 = sld [smem:[#allocation56_spill]] }
 0xe50   : > { %8003 = vmatprep.subr.bf16.mxu1 %v9100_v6 }
 0xe53   : > { %8005 = vmatpush3.bf16.msra.mxu1 %v8004_v54 }
 0xe54   : > { %8006 = vmatprep.subr.bf16.mxu1 %v9100_v6 }
 0xe57   : > { %8008 = vmatpush3.bf16.msra.mxu1 %v8007_v40 }
 0xe5a   : > { %7605 = vmatmul.mubr.msk.f32.vlgmr.msra.gmra.mrb[58].mxu1 %vm2602_vm14, %v10236_v11  ;;  %v4681_v11 = vld [vmem:[%s10882_s4 + $0x8] sm:$0xff] }
 0xe5b   : > { %7607 = vmatprep.mubr.msk.f32.mxu1 %vm9101_vm1, %v9102_v9 }
 0xe5e   : > { %7608 = vmatmul.mubr.msk.f32.gmra.mrb[60].mxu1 %vm2602_vm14, %v10248_v48 }
 0xe5f   : > { %7610 = vmatprep.mubr.msk.f32.mxu1 %vm9101_vm1, %v9102_v9 }
 0xe62   : > { %7611 = vmatmul.mubr.msk.f32.gmra.mrb[62].mxu1 %vm2602_vm14, %v4441_v7  ;;  %v4683_v7 = vld [vmem:[%s10882_s4 + $0x18] sm:$0xff]  ;;  %s10885_s4 = sld [smem:[#allocation59_spill]] }
 0xe63   : > { %4968 = vmatprep.mubr.f32.mxu1 %v9102_v9  ;;  %v8012_v48 = vpack.c.bf16 %v4683_v7, %v4681_v11  ;;  %v4991_v11 = vld [vmem:[%s10884_s1 + $0x20] sm:$0xff]  ;;  %v4992_v7 = vld [vmem:[%s10884_s1 + $0x28] sm:$0xff] }
 0xe64   : > { %v8051_v8 = vpack.c.bf16 %v4992_v7, %v4991_v11 }
 0xef1   : > { %v4204_v42 = vpop.f32.mrb[56].mxu1 }
 0xef2   : > { %v7525_v47 = vpop.f32.mrb[57].mxu1  ;;  %v4535_v59 = vrot.slane %v4204_v42, %v9738_v53 }
 0xf2d   : > { %v4515_v49 = vpop.f32.mrb[58].mxu1 }
 0xf2e   : > { %v4536_v51 = vmul.f32 %v4535_v59, %v4515_v49  ;;  %v7606_v52 = vpop.f32.mrb[59].mxu1 }
 0xf30   : > { %v4546_v3 = vadd.f32 %v6953_v56, %v4536_v51 }
 0xf31   : > { %v4520_v30 = vpop.f32.mrb[60].mxu1 }
 0xf32   : > { %v4537_v60 = vmul.f32 %v4535_v59, %v4520_v30  ;;  %v7609_v57 = vpop.f32.mrb[61].mxu1 }
 0xf34   : > { %v4547_v44 = vadd.f32 %v6953_v56, %v4537_v60 }
 0xf35   : > { %v4525_v46 = vpop.f32.mrb[62].mxu1 }
 0xf36   : > { %v8010_v63 = vpack.c.bf16 %v4547_v44, %v4546_v3  ;;  %v4538_v0 = vmul.f32 %v4535_v59, %v4525_v46  ;;  %v7612_v1 = vpop.f32.mrb[63].mxu1  ;;  %v4987_v3 = vld [vmem:[%s10884_s1] sm:$0xff]  ;;  %v4988_v44 = vld [vmem:[%s10884_s1 + $0x8] sm:$0xff]  ;;  %v4989_v46 = vld [vmem:[%s10884_s1 + $0x10] sm:$0xff] }
 0xf38   : > { %8011 = vmatpush3.bf16.msra.mxu0 %v8010_v63  ;;  %v4548_v45 = vadd.f32 %v6953_v56, %v4538_v0  ;;  %v8045_v63 = vpack.c.bf16 %v4988_v44, %v4987_v3  ;;  %v4990_v0 = vld [vmem:[%s10884_s1 + $0x18] sm:$0xff] }
 0xf39   : > { %7617 = vmatprep.subr.mxu0 %v9102_v9  ;;  %v8048_v1 = vpack.c.bf16 %v4990_v0, %v4989_v46 }
 0xf3c   : > { %7618 = vmatpush3.msk.msra.mxu0 %vm3019_vm15, %v4548_v45  ;;  %v4996_v45 = vld [vmem:[%s10884_s1 + $0x48] sm:$0xff] }
 0xf3d   : > { %7620 = vmatmul.mubr.msk.f32.vlgmr.msra.gmra.mrb[24].mxu0 %vm10776_vm3, %v4549_v21  ;;  %8013 = vmatprep.subr.bf16.mxu0 %v8012_v48  ;;  %v4995_v48 = vld [vmem:[%s10884_s1 + $0x40] sm:$0xff] }
 0xf3e   : > { %7622 = vmatprep.mubr.msk.f32.mxu0 %vm9101_vm1, %v9102_v9  ;;  %8015 = vmatpush1.bf16.msra.mxu0 %v8014_v19  ;;  %v8057_v21 = vpack.c.bf16 %v4996_v45, %v4995_v48  ;;  %v4997_v19 = vld [vmem:[%s10884_s1 + $0x50] sm:$0xff] }
 0xf3f   : > { %8017 = vmatprep.subr.bf16.mxu0 %v8016_v50  ;;  %v4998_v50 = vld [vmem:[%s10884_s1 + $0x58] sm:$0xff] }
 0xf40   : > { %v8060_v4 = vpack.c.bf16 %v4998_v50, %v4997_v19 }
 0xf41   : > { %7623 = vmatmul.mubr.msk.f32.gmra.mrb[26].mxu0 %vm10776_vm3, %v4550_v27  ;;  %v5001_v27 = vld [vmem:[%s10884_s1 + $0x70] sm:$0xff] }
 0xf42   : > { %7625 = vmatprep.mubr.msk.f32.mxu0 %vm9101_vm1, %v9102_v9  ;;  %8019 = vmatpush1.bf16.msra.mxu0 %v8018_v2  ;;  %v5002_v2 = vld [vmem:[%s10884_s1 + $0x78] sm:$0xff] }
 0xf43   : > { %8021 = vmatprep.subr.bf16.mxu0 %v8020_v55  ;;  %v8066_v55 = vpack.c.bf16 %v5002_v2, %v5001_v27 }
 0xf45   : > { %7626 = vmatmul.mubr.msk.f32.gmra.mrb[28].mxu0 %vm10776_vm3, %v4551_v62  ;;  %v5006_v62 = vld [vmem:[%s10884_s1 + $0x98] sm:$0xff] }
 0xf46   : > { %7628 = vmatprep.mubr.msk.f32.mxu0 %vm9101_vm1, %v9102_v9  ;;  %8023 = vmatpush1.bf16.msra.mxu0 %v8022_v29  ;;  %v8072_v29 = vpack.c.bf16 %v5006_v62, %v5005_v10 }
 0xf47   : > { %8025 = vmatprep.subr.bf16.mxu0 %v8024_v20  ;;  %v5007_v20 = vld [vmem:[%s10884_s1 + $0xa0] sm:$0xff] }
 0xf48   : > { %v8075_v31 = vpack.c.bf16 %v5008_v18, %v5007_v20 }
 0xf49   : > { %7629 = vmatmul.mubr.msk.f32.gmra.mrb[30].mxu0 %vm10776_vm3, %v4552_v12  ;;  %v8078_v12 = vpack.c.bf16 %v5010_v34, %v5009_v33 }
 0xf4a   : > { %7631 = vmatprep.mubr.msk.f32.mxu0 %vm9101_vm1, %v9102_v9  ;;  %8027 = vmatpush1.bf16.msra.mxu0 %v8026_v35 }
 0xf4b   : > { %8029 = vmatprep.subr.bf16.mxu0 %v8028_v36 }
 0xf4d   : > { %7632 = vmatmul.mubr.msk.f32.gmra.mrb[32].mxu0 %vm10776_vm3, %v4553_v38 }
 0xf4e   : > { %7634 = vmatprep.mubr.msk.f32.mxu0 %vm9101_vm1, %v9102_v9  ;;  %8031 = vmatpush1.bf16.msra.mxu0 %v8030_v39 }
 0xf4f   : > { %4743 = vmatprep.subr.mxu0 %v4701_v25 }
 0xf51   : > { %7635 = vmatmul.mubr.msk.f32.gmra.mrb[34].mxu0 %vm10776_vm3, %v4554_v13 }
 0xf52   : > { %7637 = vmatprep.mubr.msk.f32.mxu0 %vm9101_vm1, %v9102_v9  ;;  %4744 = vmatpush1.msra.mxu0 %v4700_v32 }
 0xf53   : > { %8044 = vmatprep.subr.bf16.mxu0 %v9100_v6 }
 0xf55   : > { %7638 = vmatmul.mubr.msk.f32.gmra.mrb[36].mxu0 %vm10776_vm3, %v4555_v43 }
 0xf56   : > { %4787 = vmatprep.mubr.f32.mxu0 %v9102_v9 }
0x1010   : > { %v4646_v54 = vpop.f32.mrb[24].mxu0 }
0x1011   : > { %6962 = vmatmul.mubr.msk.f32.vlgmr.msra.gmra.mrb[38].mxu0 %vm10775_vm4, %v4646_v54  ;;  %v7621_v58 = vpop.f32.mrb[25].mxu0 }
0x1012   : > { %4793 = vmatprep.mubr.f32.mxu0 %v9102_v9  ;;  %8046 = vmatpush1.bf16.msra.mxu0 %v8045_v63 }
0x1013   : > { %8047 = vmatprep.subr.bf16.mxu0 %v9100_v6 }
0x1014   : > { %v4651_v16 = vpop.f32.mrb[26].mxu0 }
0x1015   : > { %6963 = vmatmul.mubr.msk.f32.gmra.mrb[40].mxu0 %vm10775_vm4, %v4651_v16  ;;  %v7624_v40 = vpop.f32.mrb[27].mxu0 }
0x1016   : > { %4799 = vmatprep.mubr.f32.mxu0 %v9102_v9  ;;  %8049 = vmatpush1.bf16.msra.mxu0 %v8048_v1 }
0x1017   : > { %8050 = vmatprep.subr.bf16.mxu0 %v9100_v6 }
0x1018   : > { %v4656_v42 = vpop.f32.mrb[28].mxu0 }
0x1019   : > { %6964 = vmatmul.mubr.msk.f32.gmra.mrb[42].mxu0 %vm10775_vm4, %v4656_v42  ;;  %v7627_v47 = vpop.f32.mrb[29].mxu0 }
0x101a   : > { %4805 = vmatprep.mubr.f32.mxu0 %v9102_v9  ;;  %8052 = vmatpush1.bf16.msra.mxu0 %v8051_v8 }
0x101b   : > { %8053 = vmatprep.subr.bf16.mxu0 %v9100_v6 }
0x101c   : > { %v4661_v59 = vpop.f32.mrb[30].mxu0 }
0x101d   : > { %6965 = vmatmul.mubr.msk.f32.gmra.mrb[44].mxu0 %vm10775_vm4, %v4661_v59  ;;  %v7630_v49 = vpop.f32.mrb[31].mxu0 }
0x101e   : > { %4811 = vmatprep.mubr.f32.mxu0 %v9102_v9  ;;  %8055 = vmatpush1.bf16.msra.mxu0 %v8054_v14 }
0x101f   : > { %8056 = vmatprep.subr.bf16.mxu0 %v9100_v6 }
0x1020   : > { %v4666_v51 = vpop.f32.mrb[32].mxu0 }
0x1021   : > { %6966 = vmatmul.mubr.msk.f32.gmra.mrb[46].mxu0 %vm10775_vm4, %v4666_v51  ;;  %v7633_v52 = vpop.f32.mrb[33].mxu0 }
0x1022   : > { %4817 = vmatprep.mubr.f32.mxu0 %v9102_v9  ;;  %8058 = vmatpush1.bf16.msra.mxu0 %v8057_v21 }
0x1023   : > { %8059 = vmatprep.subr.bf16.mxu0 %v9100_v6 }
0x1024   : > { %v4671_v56 = vpop.f32.mrb[34].mxu0 }
0x1025   : > { %6967 = vmatmul.mubr.msk.f32.gmra.mrb[48].mxu0 %vm10775_vm4, %v4671_v56  ;;  %v7636_v30 = vpop.f32.mrb[35].mxu0 }
0x1026   : > { %4823 = vmatprep.mubr.f32.mxu0 %v9102_v9  ;;  %8061 = vmatpush1.bf16.msra.mxu0 %v8060_v4 }
0x1027   : > { %8062 = vmatprep.subr.bf16.mxu0 %v9100_v6 }
0x1028   : > { %v4676_v60 = vpop.f32.mrb[36].mxu0 }
0x1029   : > { %6968 = vmatmul.mubr.msk.f32.gmra.mrb[50].mxu0 %vm10775_vm4, %v4676_v60  ;;  %v7639_v57 = vpop.f32.mrb[37].mxu0 }
0x102a   : > { %8064 = vmatpush1.bf16.msra.mxu0 %v8063_v26 }
0x102b   : > { %8065 = vmatprep.subr.bf16.mxu0 %v9100_v6 }
0x102e   : > { %8067 = vmatpush1.bf16.msra.mxu0 %v8066_v55 }
0x102f   : > { %8068 = vmatprep.subr.bf16.mxu0 %v9100_v6 }
0x1032   : > { %8070 = vmatpush1.bf16.msra.mxu0 %v8069_v28 }
0x1033   : > { %8071 = vmatprep.subr.bf16.mxu0 %v9100_v6 }
0x1036   : > { %8073 = vmatpush1.bf16.msra.mxu0 %v8072_v29 }
0x1037   : > { %8074 = vmatprep.subr.bf16.mxu0 %v9100_v6 }
0x103a   : > { %8076 = vmatpush1.bf16.msra.mxu0 %v8075_v31 }
0x103b   : > { %8077 = vmatprep.subr.bf16.mxu0 %v9100_v6 }
0x103e   : > { %8079 = vmatpush1.bf16.msra.mxu0 %v8078_v12 }
0x103f   : > { %5069 = vmatprep.subr.mxu0 %v9102_v9 }
0x10e4   : > { %v4789_v35 = vpop.f32.mrb[38].mxu0 }
0x10e5   : > { %vm4830_vm11 = vcmp.ge.f32.partialorder %v4789_v35, 0.0  ;;  %v4844_v36 = vmul.f32 0.2, %v4789_v35  ;;  %v4791_v23 = vpop.f32.mrb[39].mxu0 }
0x10e6   : > { %vm4831_vm12 = vcmp.ge.f32.partialorder %v4791_v23, 0.0  ;;  %v4845_v37 = vmul.f32 0.2, %v4791_v23 }
0x10e7   : > { %v4858_v38 = vsel %vm4830_vm11, %v4789_v35, %v4844_v36  ;;  %v5101_v36 = vld [vmem:[%s10885_s4] sm:$0xff] }
0x10e8   : > { %v4795_v39 = vpop.f32.mrb[40].mxu0  ;;  %v4859_v25 = vsel %vm4831_vm12, %v4791_v23, %v4845_v37  ;;  %v4872_v54 = vmul.f32 1.4142135, %v4858_v38  ;;  %v5102_v23 = vld [vmem:[%s10885_s4 + $0x8] sm:$0xff]  ;;  %v4886_v38 = vld [vmem:[%s10886_s5] sm:$0xff] }
0x10e9   : > { %vm4832_vm7 = vcmp.ge.f32.partialorder %v4795_v39, 0.0  ;;  %v4846_v13 = vmul.f32 0.2, %v4795_v39  ;;  %v4797_v43 = vpop.f32.mrb[41].mxu0  ;;  %v4873_v16 = vmul.f32 1.4142135, %v4859_v25 }
0x10ea   : > { %vm4833_vm8 = vcmp.ge.f32.partialorder %v4797_v43, 0.0  ;;  %v4847_v32 = vmul.f32 0.2, %v4797_v43  ;;  %v5103_v25 = vld [vmem:[%s10885_s4 + $0x10] sm:$0xff] }
0x10eb   : > { %v4860_v58 = vsel %vm4832_vm7, %v4795_v39, %v4846_v13  ;;  %v8081_v39 = vpack.c.bf16 %v5102_v23, %v5101_v36  ;;  %v5104_v13 = vld [vmem:[%s10885_s4 + $0x18] sm:$0xff]  ;;  %s10888_s4 = sld [smem:[#allocation61_spill]] }
0x10ec   : > { %v4874_v40 = vmul.f32 1.4142135, %v4860_v58  ;;  %v4861_v42 = vsel %vm4833_vm8, %v4797_v43, %v4847_v32  ;;  %v4801_v47 = vpop.f32.mrb[42].mxu0  ;;  %v4887_v43 = vld [vmem:[%s10886_s5 + $0x8] sm:$0xff]  ;;  %v8084_v32 = vpack.c.bf16 %v5104_v13, %v5103_v25  ;;  %v5011_v58 = vld [vmem:[%s10884_s1 + $0xc0] sm:$0xff]  ;;  %s10894_s1 = sld [smem:[#allocation67_spill]] }
0x10ed   : > { %v4875_v59 = vmul.f32 1.4142135, %v4861_v42  ;;  %vm4834_vm4 = vcmp.ge.f32.partialorder %v4801_v47, 0.0  ;;  %v4848_v49 = vmul.f32 0.2, %v4801_v47  ;;  %v4803_v51 = vpop.f32.mrb[43].mxu0  ;;  %5070 = vmatpush1.msra.mxu0 %v5011_v58 }
0x10ee   : > { %v8034_v52 = vpack.c.bf16 %v4874_v40, %v4872_v54  ;;  %vm4835_vm3 = vcmp.ge.f32.partialorder %v4803_v51, 0.0  ;;  %v4849_v56 = vmul.f32 0.2, %v4803_v51  ;;  %v4888_v54 = vld [vmem:[%s10886_s5 + $0x10] sm:$0xf]  ;;  %s10889_s5 = sld [smem:[#allocation62_spill]] }
0x10ef   : > { %v8032_v30 = vpack.c.bf16 %v4875_v59, %v4873_v16  ;;  %v4862_v60 = vsel %vm4834_vm4, %v4801_v47, %v4848_v49  ;;  %v5177_v16 = vld [vmem:[%s10887_s6] sm:$0xf]  ;;  %s10890_s6 = sld [smem:[#allocation63_spill]] }
0x10f0   : > { %v4807_v57 = vpop.f32.mrb[44].mxu0  ;;  %v4863_v3 = vsel %vm4835_vm3, %v4803_v51, %v4849_v56  ;;  %v4876_v0 = vmul.f32 1.4142135, %v4862_v60 }
0x10f1   : > { %vm4836_vm11 = vcmp.ge.f32.partialorder %v4807_v57, 0.0  ;;  %v4850_v44 = vmul.f32 0.2, %v4807_v57  ;;  %v4809_v46 = vpop.f32.mrb[45].mxu0  ;;  %8033 = vmatprep.subr.bf16.mxu1 %v8032_v30  ;;  %v4877_v11 = vmul.f32 1.4142135, %v4863_v3 }
0x10f2   : > { %vm4837_vm12 = vcmp.ge.f32.partialorder %v4809_v46, 0.0  ;;  %v4851_v63 = vmul.f32 0.2, %v4809_v46  ;;  %8035 = vmatpush1.bf16.msra.mxu1 %v8034_v52  ;;  %v5105_v52 = vld [vmem:[#allocation23] sm:$0x1] }
0x10f3   : > { %v4864_v1 = vsel %vm4836_vm11, %v4807_v57, %v4850_v44  ;;  %v5255_v3 = vld [vmem:[%s10888_s4] sm:$0xf]  ;;  %s10892_s4 = sld [smem:[#allocation64_spill]] }
0x10f4   : > { %v4878_v7 = vmul.f32 1.4142135, %v4864_v1  ;;  %v4865_v8 = vsel %vm4837_vm12, %v4809_v46, %v4851_v63  ;;  %v4813_v15 = vpop.f32.mrb[46].mxu0  ;;  %v5332_v44 = vld [vmem:[%s10889_s5] sm:$0xf]  ;;  %s10891_s5 = sld [smem:[#allocation65_spill]] }
0x10f5   : > { %v4879_v17 = vmul.f32 1.4142135, %v4865_v8  ;;  %vm4838_vm7 = vcmp.ge.f32.partialorder %v4813_v15, 0.0  ;;  %v4852_v14 = vmul.f32 0.2, %v4813_v15  ;;  %v4815_v48 = vpop.f32.mrb[47].mxu0 }
0x10f6   : > { %v8038_v45 = vpack.c.bf16 %v4878_v7, %v4876_v0  ;;  %vm4839_vm4 = vcmp.ge.f32.partialorder %v4815_v48, 0.0  ;;  %v4853_v21 = vmul.f32 0.2, %v4815_v48  ;;  %v6992_v58 = vld [vmem:[%s10890_s6 + $0x90] sm:$0xff] }
0x10f7   : > { %v8036_v19 = vpack.c.bf16 %v4879_v17, %v4877_v11  ;;  %v4866_v50 = vsel %vm4838_vm7, %v4813_v15, %v4852_v14 }
0x10f8   : > { %v4819_v4 = vpop.f32.mrb[48].mxu0  ;;  %v4867_v22 = vsel %vm4839_vm4, %v4815_v48, %v4853_v21  ;;  %v4880_v2 = vmul.f32 1.4142135, %v4866_v50  ;;  %vm10900_vm4 = vcmask 719872  }
0x10f9   : > { %vm4840_vm3 = vcmp.ge.f32.partialorder %v4819_v4, 0.0  ;;  %v4854_v24 = vmul.f32 0.2, %v4819_v4  ;;  %v4821_v26 = vpop.f32.mrb[49].mxu0  ;;  %8037 = vmatprep.subr.bf16.mxu1 %v8036_v19  ;;  %v4881_v61 = vmul.f32 1.4142135, %v4867_v22 }
0x10fa   : > { %vm4841_vm8 = vcmp.ge.f32.partialorder %v4821_v26, 0.0  ;;  %v4855_v27 = vmul.f32 0.2, %v4821_v26  ;;  %8039 = vmatpush1.bf16.msra.mxu1 %v8038_v45  ;;  %v6985_v22 = vld [vmem:[%s10890_s6 + $0x58] sm:$0xff] }
0x10fb   : > { %v4868_v55 = vsel %vm4840_vm3, %v4819_v4, %v4854_v24  ;;  %v6984_v4 = vld [vmem:[%s10890_s6 + $0x50] sm:$0xff]  ;;  %vm10902_vm3 = vmmov %vm10900_vm4 }
0x10fc   : > { %v4882_v5 = vmul.f32 1.4142135, %v4868_v55  ;;  %v4869_v28 = vsel %vm4841_vm8, %v4821_v26, %v4855_v27  ;;  %v4825_v10 = vpop.f32.mrb[50].mxu0  ;;  %vm10903_vm8 = vmmov %vm10902_vm3 }
0x10fd   : > { %v4883_v62 = vmul.f32 1.4142135, %v4869_v28  ;;  %v4856_v29 = vmul.f32 0.2, %v4825_v10  ;;  %v4827_v20 = vpop.f32.mrb[51].mxu0  ;;  %vm4842_vm11 = vcmp.ge.f32.partialorder %v4825_v10, 0.0 }
0x10fe   : > { %v8042_v18 = vpack.c.bf16 %v4882_v5, %v4880_v2  ;;  %vm4843_vm12 = vcmp.ge.f32.partialorder %v4827_v20, 0.0  ;;  %v4857_v31 = vmul.f32 0.2, %v4827_v20  ;;  %v8087_v5 = vpack.c.bf16 %v6985_v22, %v6984_v4  ;;  %v7008_v4 = vld [vmem:[%s10890_s6 + $0xe0] sm:$0xff]  ;;  %v7009_v22 = vld [vmem:[%s10890_s6 + $0xe8] sm:$0xff] }
0x10ff   : > { %v8040_v33 = vpack.c.bf16 %v4883_v62, %v4881_v61  ;;  %v4870_v12 = vsel %vm4842_vm11, %v4825_v10, %v4856_v29  ;;  %v6986_v29 = vld [vmem:[%s10890_s6 + $0x60] sm:$0xff]  ;;  %vm10904_vm11 = vmmov %vm10902_vm3 }
0x1100   : > { %v4871_v34 = vsel %vm4843_vm12, %v4827_v20, %v4857_v31  ;;  %v4884_v37 = vmul.f32 1.4142135, %v4870_v12  ;;  %v6987_v20 = vld [vmem:[%s10890_s6 + $0x68] sm:$0xff]  ;;  %vm10905_vm12 = vmmov %vm10902_vm3 }
0x1101   : > { %v4885_v35 = vmul.f32 1.4142135, %v4871_v34  ;;  %8041 = vmatprep.subr.bf16.mxu1 %v8040_v33  ;;  %v8090_v23 = vpack.c.bf16 %v6987_v20, %v6986_v29 }
0x1102   : > { %8043 = vmatpush1.bf16.msra.mxu1 %v8042_v18 }
0x1103   : > { %6969 = vmatprep.subr.msk.mxu1 %vm3010_vm13, %v4885_v35 }
0x1106   : > { %6970 = vmatpush1.msk.msra.mxu1 %vm3010_vm13, %v4884_v37  ;;  %v6988_v37 = vld [vmem:[%s10890_s6 + $0x70] sm:$0xff] }
0x1107   : > { %6971 = vmatmul.mubr.msk.f32.vlgmr.msra.gmra.mrb[64].mxu1 %vm3686_vm9, %v4886_v38  ;;  %8080 = vmatprep.subr.bf16.mxu1 %v9100_v6  ;;  %v6989_v38 = vld [vmem:[%s10890_s6 + $0x78] sm:$0xff] }
0x1108   : > { %4974 = vmatprep.mubr.f32.mxu1 %v9102_v9  ;;  %8082 = vmatpush3.bf16.msra.mxu1 %v8081_v39  ;;  %v8093_v13 = vpack.c.bf16 %v6989_v38, %v6988_v37  ;;  %v5872_v38 = vld [vmem:[%s10894_s1] sm:$0xff] }
0x1109   : > { %8083 = vmatprep.subr.bf16.mxu1 %v9100_v6 }
0x110b   : > { %6972 = vmatmul.mubr.msk.f32.gmra.mrb[66].mxu1 %vm3686_vm9, %v4887_v43  ;;  %v6990_v43 = vld [vmem:[%s10890_s6 + $0x80] sm:$0xff] }
0x110c   : > { %4980 = vmatprep.mubr.f32.mxu1 %v9102_v9  ;;  %8085 = vmatpush3.bf16.msra.mxu1 %v8084_v32  ;;  %v6991_v32 = vld [vmem:[%s10890_s6 + $0x88] sm:$0xff] }
0x110d   : > { %7651 = vmatprep.subr.mxu1 %v9102_v9 }
0x110f   : > { %6973 = vmatmul.mubr.msk.f32.gmra.mrb[68].mxu1 %vm3686_vm9, %v4888_v54  ;;  %v8096_v54 = vpack.c.bf16 %v6991_v32, %v6990_v43  ;;  %v5751_v32 = vld [vmem:[%s10891_s5 + $0x8] sm:$0xff] }
0x1110   : > { %7648 = vmatprep.mubr.msk.f32.mxu1 %vm9101_vm1, %v9102_v9 }
0x1113   : > { %7649 = vmatmul.mubr.msk.f32.vlgmr.msra.gmra.mrb[70].mxu1 %vm1600_vm2, %v9697_v41 }
0x1114   : > { %7653 = vmatprep.mubr.msk.f32.mxu1 %vm9101_vm1, %v9102_v9  ;;  %7652 = vmatpush3.msk.msra.mxu1 %vm1946_vm5, %v5177_v16  ;;  %v6993_v16 = vld [vmem:[%s10890_s6 + $0x98] sm:$0xff] }
0x1115   : > { %7656 = vmatprep.subr.mxu1 %v9102_v9 }
0x11da   : > { %v4970_v40 = vpop.f32.mrb[64].mxu1 }
0x11db   : > { %v4972_v42 = vpop.f32.mrb[65].mxu1 }
0x11dc   : > { %6974 = vmatprep.mubr.msk.f32.mxu0 %vm3810_vm10, %v4972_v42  ;;  %v5428_v42 = vld [vmem:[%s10890_s6] sm:$0xff] }
0x11dd   : > { %5086 = vmatmul.mubr.f32.vlgmr.msra.gmra.mrb[52].mxu0 %v4970_v40  ;;  %v8099_v40 = vpack.c.bf16 %v6993_v16, %v6992_v58  ;;  %v5752_v58 = vld [vmem:[%s10891_s5 + $0x10] sm:$0xff] }
0x11de   : > { %v4976_v47 = vpop.f32.mrb[66].mxu1 }
0x11df   : > { %v4978_v59 = vpop.f32.mrb[67].mxu1 }
0x11e0   : > { %6975 = vmatprep.mubr.msk.f32.mxu0 %vm3810_vm10, %v4978_v59 }
0x11e1   : > { %5091 = vmatmul.mubr.f32.gmra.mrb[54].mxu0 %v4976_v47  ;;  %v5429_v47 = vld [vmem:[%s10890_s6 + $0x8] sm:$0xff] }
0x11e2   : > { %v4982_v49 = vpop.f32.mrb[68].mxu1  ;;  %v8102_v59 = vpack.c.bf16 %v5429_v47, %v5428_v42  ;;  %v5878_v42 = vld [vmem:[%s10894_s1 + $0x30] sm:$0xff]  ;;  %v5881_v47 = vld [vmem:[%s10894_s1 + $0x48] sm:$0xff] }
0x11e3   : > { %v4984_v51 = vpop.f32.mrb[69].mxu1 }
0x11e4   : > { %6976 = vmatprep.mubr.msk.f32.mxu0 %vm3810_vm10, %v4984_v51  ;;  %v5431_v51 = vld [vmem:[%s10890_s6 + $0x18] sm:$0xff] }
0x11e5   : > { %5096 = vmatmul.mubr.f32.gmra.mrb[56].mxu0 %v4982_v49  ;;  %v5430_v49 = vld [vmem:[%s10890_s6 + $0x10] sm:$0xff] }
0x11e6   : > { %v5172_v56 = vpop.f32.mrb[70].mxu1 }
0x11e7   : > { %v5173_v30 = vadd.f32 %v5172_v56, %v5105_v52  ;;  %v7650_v60 = vpop.f32.mrb[71].mxu1  ;;  %v8105_v52 = vpack.c.bf16 %v5431_v51, %v5430_v49  ;;  %v5432_v56 = vld [vmem:[%s10890_s6 + $0x20] sm:$0xff]  ;;  %v5753_v49 = vld [vmem:[%s10891_s5 + $0x18] sm:$0xff] }
0x11e9   : > { %v5176_v57 = vmul.f32 %v5173_v30, %v5173_v30 }
0x11eb   : > { %7654 = vmatmul.mubr.msk.f32.vlgmr.msra.gmra.mrb[72].mxu1 %vm1942_vm6, %v5176_v57  ;;  %v5434_v57 = vld [vmem:[%s10890_s6 + $0x30] sm:$0xff] }
0x11ec   : > { %7657 = vmatpush3.msk.msra.mxu1 %vm1946_vm5, %v5255_v3  ;;  %7658 = vmatprep.mubr.msk.f32.mxu1 %vm9101_vm1, %v9102_v9  ;;  %v5435_v3 = vld [vmem:[%s10890_s6 + $0x38] sm:$0xff] }
0x11ed   : > { %7661 = vmatprep.subr.mxu1 %v9102_v9 }
0x11ef   : > { %7659 = vmatmul.mubr.msk.f32.vlgmr.msra.gmra.mrb[74].mxu1 %vm1942_vm6, %v5173_v30  ;;  %v5433_v30 = vld [vmem:[%s10890_s6 + $0x28] sm:$0xff] }
0x11f0   : > { %7663 = vmatprep.mubr.msk.f32.mxu1 %vm9101_vm1, %v9102_v9  ;;  %7662 = vmatpush3.msk.msra.mxu1 %vm1946_vm5, %v5332_v44  ;;  %v8108_v60 = vpack.c.bf16 %v5433_v30, %v5432_v56  ;;  %v8111_v44 = vpack.c.bf16 %v5435_v3, %v5434_v57  ;;  %v5880_v30 = vld [vmem:[%s10894_s1 + $0x40] sm:$0xff]  ;;  %v5885_v57 = vld [vmem:[%s10894_s1 + $0x68] sm:$0xff]  ;;  %v5887_v3 = vld [vmem:[%s10894_s1 + $0x78] sm:$0xff] }
0x11f1   : > { %8086 = vmatprep.subr.bf16.mxu1 %v9100_v6 }
0x12b0   : > { %v5087_v46 = vpop.f32.mrb[52].mxu0 }
0x12b1   : > { %v5089_v63 = vpop.f32.mrb[53].mxu0 }
0x12b2   : > { %v5437_v63 = vld [vmem:[%s10890_s6 + $0x48] sm:$0xff] }
0x12b4   : > { %v5092_v0 = vpop.f32.mrb[54].mxu0 }
0x12b5   : > { %v5094_v1 = vpop.f32.mrb[55].mxu0 }
0x12b6   : > { %v7000_v1 = vld [vmem:[%s10890_s6 + $0xa0] sm:$0xff] }
0x12b8   : > { %v5097_v11 = vpop.f32.mrb[56].mxu0 }
0x12b9   : > { %v5099_v7 = vpop.f32.mrb[57].mxu0 }
0x12be   : > { %v5250_v8 = vpop.f32.mrb[72].mxu1 }
0x12bf   : > { %v5251_v15 = vadd.f32 1e-08, %v5250_v8  ;;  %v7655_v17 = vpop.f32.mrb[73].mxu1  ;;  %v7002_v8 = vld [vmem:[%s10890_s6 + $0xb0] sm:$0xff] }
0x12c1   : > { %8545 = vrsqrt.f32 %v5251_v15  ;;  %v7003_v15 = vld [vmem:[%s10890_s6 + $0xb8] sm:$0xff] }
0x12c2   : > { %v5328_v14 = vpop.f32.mrb[74].mxu1  ;;  %v8120_v17 = vpack.c.bf16 %v7003_v15, %v7002_v8 }
0x12c3   : > { %v5412_v48 = vrot.slane %v5328_v14, %v9738_v53  ;;  %v7660_v45 = vpop.f32.mrb[75].mxu1  ;;  %v7004_v14 = vld [vmem:[%s10890_s6 + $0xc0] sm:$0xff] }
0x12c5   : > { %v5413_v21 = vmul.f32 %v5412_v48, %v5087_v46  ;;  %v5414_v19 = vmul.f32 %v5412_v48, %v5092_v0  ;;  %v5415_v50 = vmul.f32 %v5412_v48, %v5097_v11  ;;  %v5436_v46 = vld [vmem:[%s10890_s6 + $0x40] sm:$0xff]  ;;  %v7001_v11 = vld [vmem:[%s10890_s6 + $0xa8] sm:$0xff] }
0x12c6   : > { %v8114_v0 = vpack.c.bf16 %v5437_v63, %v5436_v46  ;;  %v8117_v7 = vpack.c.bf16 %v7001_v11, %v7000_v1  ;;  %v7005_v48 = vld [vmem:[%s10890_s6 + $0xc8] sm:$0xff]  ;;  %v8147_v63 = vpack.c.bf16 %v5887_v3, %v5885_v57  ;;  %v5886_v1 = vld [vmem:[%s10894_s1 + $0x70] sm:$0xff] }
0x12c7   : > { %v5419_v24 = vrot.slane %v5413_v21, 6  ;;  %v5420_v26 = vrot.slane %v5414_v19, 6  ;;  %v5422_v27 = vrot.slane %v5415_v50, 6  ;;  %v8123_v45 = vpack.c.bf16 %v7005_v48, %v7004_v14  ;;  %v7006_v21 = vld [vmem:[%s10890_s6 + $0xd0] sm:$0xff]  ;;  %v7007_v19 = vld [vmem:[%s10890_s6 + $0xd8] sm:$0xff]  ;;  %v5889_v11 = vld [vmem:[%s10894_s1 + $0x88] sm:$0xff] }
0x12c8   : > { %v8126_v50 = vpack.c.bf16 %v7007_v19, %v7006_v21  ;;  %v5890_v14 = vld [vmem:[%s10894_s1 + $0x90] sm:$0xff]  ;;  %v5892_v21 = vld [vmem:[%s10894_s1 + $0xa0] sm:$0xff]  ;;  %s10912_s6 = sld [smem:[#allocation74_spill]] }
0x12c9   : > { %v10469_v2 = vsel %vm3010_vm13, %v5419_v24, %v5420_v26  ;;  %v5423_v55 = vsel %vm3010_vm13, %v5420_v26, %v5422_v27  ;;  %v10473_v61 = vsel %vm3010_vm13, 0.0, %v5419_v24  ;;  %v8129_v24 = vpack.c.bf16 %v7009_v22, %v7008_v4  ;;  %v5750_v26 = vld [vmem:[%s10891_s5] sm:$0xff] }
0x12ca   : > { %v5451_v28 = vrot.slane %v10473_v61, 1  ;;  %v5639_v10 = vrot.slane %v10473_v61, 2  ;;  %v5640_v62 = vrot.slane %v10469_v2, 2  ;;  %v5452_v18 = vrot.slane %v10469_v2, 1 }
0x12cb   : > { %v8546_v31 = vpop.eup %8545  ;;  %v10482_v33 = vsel %vm3019_vm15, %v5423_v55, 0.0 }
0x12cc   : > { %7664 = vmatmul.mubr.msk.f32.vlgmr.msra.gmra.mrb[76].mxu1 %vm1942_vm6, %v8546_v31  ;;  %v5453_v34 = vsel %vm3044_vm0, %v5451_v28, %v5452_v18  ;;  %v5454_v12 = vrot.slane %v10482_v33, 1  ;;  %v10488_v35 = vsel %vm3019_vm15, %v5639_v10, %v5640_v62  ;;  %v5642_v36 = vrot.slane %v10482_v33, 2  ;;  %v7013_v10 = vld [vmem:[%s10892_s4] ss:$0 sm:$0xff]  ;;  %s10901_s4 = sld [smem:[#allocation68_spill]] }
0x12cd   : > { %8088 = vmatpush3.bf16.msra.mxu1 %v8087_v5  ;;  %7686 = vmatprep.mubr.msk.f32.mxu1 %vm9101_vm1, %v9102_v9 }
0x12ce   : > { %8089 = vmatprep.subr.bf16.mxu1 %v9100_v6  ;;  %v5455_v39 = vsel %vm3044_vm0, %v5452_v18, %v5454_v12  ;;  %v10500_v25 = vsel %vm3019_vm15, %v5640_v62, %v5642_v36  ;;  %vm10893_vm0 = vcmask 179200  }
0x12cf   : > { %7759 = vmatprep.mubr.msk.f32.mxu0 %vm10893_vm0, %v5750_v26  ;;  %vm10896_vm9 = vmmov %vm10893_vm0 }
0x12d0   : > { %vm10898_vm10 = vmmov %vm10893_vm0 }
0x12d1   : > { %8091 = vmatpush3.bf16.msra.mxu1 %v8090_v23  ;;  %v5875_v23 = vld [vmem:[%s10894_s1 + $0x18] sm:$0xff]  ;;  %vm10899_vm7 = vmmov %vm10893_vm0 }
0x12d2   : > { %8092 = vmatprep.subr.bf16.mxu1 %v9100_v6 }
0x12d5   : > { %8094 = vmatpush3.bf16.msra.mxu1 %v8093_v13  ;;  %v5879_v13 = vld [vmem:[%s10894_s1 + $0x38] sm:$0xff] }
0x12d6   : > { %8095 = vmatprep.subr.bf16.mxu1 %v9100_v6 }
0x12d9   : > { %8097 = vmatpush3.bf16.msra.mxu1 %v8096_v54 }
0x12da   : > { %8098 = vmatprep.subr.bf16.mxu1 %v9100_v6 }
0x12dd   : > { %8100 = vmatpush3.bf16.msra.mxu1 %v8099_v40  ;;  %v5876_v40 = vld [vmem:[%s10894_s1 + $0x20] sm:$0xff] }
0x12de   : > { %8101 = vmatprep.subr.bf16.mxu1 %v9100_v6  ;;  %v8141_v51 = vpack.c.bf16 %v5878_v42, %v5876_v40 }
0x12e0   : > { %7687 = vmatmul.mubr.msk.f32.vlgmr.msra.gmra.mrb[78].mxu1 %vm2602_vm14, %v5453_v34 }
0x12e1   : > { %8103 = vmatpush3.bf16.msra.mxu1 %v8102_v59  ;;  %7689 = vmatprep.mubr.msk.f32.mxu1 %vm9101_vm1, %v9102_v9  ;;  %v5883_v59 = vld [vmem:[%s10894_s1 + $0x58] sm:$0xff] }
0x12e2   : > { %8104 = vmatprep.subr.bf16.mxu1 %v9100_v6  ;;  %v8143_v56 = vpack.c.bf16 %v5883_v59, %v5881_v47 }
0x12e4   : > { %7690 = vmatmul.mubr.msk.f32.gmra.mrb[80].mxu1 %vm2602_vm14, %v5455_v39  ;;  %v5874_v39 = vld [vmem:[%s10894_s1 + $0x10] sm:$0xff] }
0x12e5   : > { %8106 = vmatpush3.bf16.msra.mxu1 %v8105_v52  ;;  %7692 = vmatprep.mubr.msk.f32.mxu1 %vm9101_vm1, %v9102_v9  ;;  %v8137_v54 = vpack.c.bf16 %v5874_v39, %v5872_v38  ;;  %v5754_v52 = vld [vmem:[%s10891_s5 + $0x20] sm:$0xff]  ;;  %v6166_v38 = vld [vmem:[%s10901_s4 + $0x68] sm:$0xff] }
0x12e6   : > { %8107 = vmatprep.subr.bf16.mxu1 %v9100_v6 }
0x12e8   : > { %7693 = vmatmul.mubr.msk.f32.gmra.mrb[82].mxu1 %vm2602_vm14, %v5454_v12 }
0x12e9   : > { %8109 = vmatpush3.bf16.msra.mxu1 %v8108_v60  ;;  %7715 = vmatprep.mubr.msk.f32.mxu1 %vm9101_vm1, %v9102_v9  ;;  %v5882_v60 = vld [vmem:[%s10894_s1 + $0x50] sm:$0xff] }
0x12ea   : > { %8110 = vmatprep.subr.bf16.mxu1 %v9100_v6  ;;  %v8145_v46 = vpack.c.bf16 %v5882_v60, %v5880_v30 }
0x12ed   : > { %8112 = vmatpush3.bf16.msra.mxu1 %v8111_v44  ;;  %v5755_v44 = vld [vmem:[%s10891_s5 + $0x28] sm:$0x3]  ;;  %s10908_s5 = sld [smem:[#allocation66_spill]] }
0x12ee   : > { %8113 = vmatprep.subr.bf16.mxu1 %v9100_v6 }
0x12f1   : > { %8115 = vmatpush3.bf16.msra.mxu1 %v8114_v0  ;;  %v5884_v0 = vld [vmem:[%s10894_s1 + $0x60] sm:$0xff] }
0x12f2   : > { %8116 = vmatprep.subr.bf16.mxu1 %v9100_v6  ;;  %v8149_v8 = vpack.c.bf16 %v5886_v1, %v5884_v0 }
0x12f4   : > { %7716 = vmatmul.mubr.msk.f32.vlgmr.msra.gmra.mrb[78].mxu1 %vm2602_vm14, %v10473_v61 }
0x12f5   : > { %8118 = vmatpush3.bf16.msra.mxu1 %v8117_v7  ;;  %7718 = vmatprep.mubr.msk.f32.mxu1 %vm9101_vm1, %v9102_v9  ;;  %v5891_v7 = vld [vmem:[%s10894_s1 + $0x98] sm:$0xff] }
0x12f6   : > { %8119 = vmatprep.subr.bf16.mxu1 %v9100_v6  ;;  %v8151_v15 = vpack.c.bf16 %v5891_v7, %v5889_v11 }
0x12f8   : > { %7719 = vmatmul.mubr.msk.f32.gmra.mrb[80].mxu1 %vm2602_vm14, %v10469_v2 }
0x12f9   : > { %8121 = vmatpush3.bf16.msra.mxu1 %v8120_v17  ;;  %7721 = vmatprep.mubr.msk.f32.mxu1 %vm9101_vm1, %v9102_v9  ;;  %v5888_v17 = vld [vmem:[%s10894_s1 + $0x80] sm:$0xff] }
0x12fa   : > { %8122 = vmatprep.subr.bf16.mxu1 %v9100_v6  ;;  %v8153_v48 = vpack.c.bf16 %v5890_v14, %v5888_v17 }
0x12fc   : > { %7722 = vmatmul.mubr.msk.f32.gmra.mrb[82].mxu1 %vm2602_vm14, %v10482_v33 }
0x12fd   : > { %8124 = vmatpush3.bf16.msra.mxu1 %v8123_v45  ;;  %7744 = vmatprep.mubr.msk.f32.mxu1 %vm9101_vm1, %v9102_v9  ;;  %v5893_v45 = vld [vmem:[%s10894_s1 + $0xa8] sm:$0xff] }
0x12fe   : > { %8125 = vmatprep.subr.bf16.mxu1 %v9100_v6 }
0x1301   : > { %8127 = vmatpush3.bf16.msra.mxu1 %v8126_v50 }
0x1302   : > { %8128 = vmatprep.subr.bf16.mxu1 %v9100_v6 }
0x1305   : > { %8130 = vmatpush3.bf16.msra.mxu1 %v8129_v24 }
0x1308   : > { %7745 = vmatmul.mubr.msk.f32.vlgmr.msra.gmra.mrb[78].mxu1 %vm2602_vm14, %v10488_v35 }
0x1309   : > { %7747 = vmatprep.mubr.msk.f32.mxu1 %vm9101_vm1, %v9102_v9 }
0x130c   : > { %7748 = vmatmul.mubr.msk.f32.gmra.mrb[80].mxu1 %vm2602_vm14, %v10500_v25  ;;  %v5877_v25 = vld [vmem:[%s10894_s1 + $0x28] sm:$0xff] }
0x130d   : > { %7750 = vmatprep.mubr.msk.f32.mxu1 %vm9101_vm1, %v9102_v9  ;;  %v8139_v16 = vpack.c.bf16 %v5879_v13, %v5877_v25  ;;  %v6167_v25 = vld [vmem:[%s10901_s4 + $0x70] sm:$0xff]  ;;  %v6168_v13 = vld [vmem:[%s10901_s4 + $0x78] sm:$0xff] }
0x1310   : > { %7751 = vmatmul.mubr.msk.f32.gmra.mrb[82].mxu1 %vm2602_vm14, %v5642_v36  ;;  %v5873_v36 = vld [vmem:[%s10894_s1 + $0x8] sm:$0xff]  ;;  %vm10895_vm14 = vmmov %vm10893_vm0  ;;  %s10907_s1 = sld [smem:[#allocation69_spill]] }
0x1311   : > { %6140 = vmatprep.mubr.f32.mxu1 %v9102_v9  ;;  %v8135_v43 = vpack.c.bf16 %v5875_v23, %v5873_v36  ;;  %v6164_v36 = vld [vmem:[%s10901_s4 + $0x58] sm:$0xff] }
0x139f   : > { %v5405_v27 = vpop.f32.mrb[76].mxu1 }
0x13a0   : > { %v7665_v2 = vpop.f32.mrb[77].mxu1  ;;  %v5736_v55 = vrot.slane %v5405_v27, %v9738_v53  ;;  %v6153_v27 = vld [vmem:[%s10901_s4] sm:$0xff] }
0x13a1   : > { %v6154_v2 = vld [vmem:[%s10901_s4 + $0x8] sm:$0xff] }
0x13db   : > { %v5716_v61 = vpop.f32.mrb[78].mxu1 }
0x13dc   : > { %v5737_v5 = vmul.f32 %v5736_v55, %v5716_v61  ;;  %v7746_v28 = vpop.f32.mrb[79].mxu1  ;;  %v8170_v61 = vpack.c.bf16 %v6154_v2, %v6153_v27 }
0x13de   : > { %v5747_v18 = vadd.f32 %v7013_v10, %v5737_v5  ;;  %v6156_v5 = vld [vmem:[%s10901_s4 + $0x18] sm:$0xff] }
0x13df   : > { %v5721_v62 = vpop.f32.mrb[80].mxu1 }
0x13e0   : > { %v5738_v29 = vmul.f32 %v5736_v55, %v5721_v62  ;;  %v7749_v20 = vpop.f32.mrb[81].mxu1  ;;  %v6158_v62 = vld [vmem:[%s10901_s4 + $0x28] sm:$0xff] }
0x13e1   : > { %v6159_v20 = vld [vmem:[%s10901_s4 + $0x30] sm:$0xff] }
0x13e2   : > { %v5748_v31 = vadd.f32 %v7013_v10, %v5738_v29 }
0x13e3   : > { %v5726_v33 = vpop.f32.mrb[82].mxu1 }
0x13e4   : > { %v5739_v34 = vmul.f32 %v5736_v55, %v5726_v33  ;;  %v7752_v12 = vpop.f32.mrb[83].mxu1  ;;  %v8131_v35 = vpack.c.bf16 %v5748_v31, %v5747_v18  ;;  %v6155_v55 = vld [vmem:[%s10901_s4 + $0x10] sm:$0xff]  ;;  %v6160_v18 = vld [vmem:[%s10901_s4 + $0x38] sm:$0xff]  ;;  %v6161_v33 = vld [vmem:[%s10901_s4 + $0x40] sm:$0xff] }
0x13e5   : > { %v8173_v28 = vpack.c.bf16 %v6156_v5, %v6155_v55  ;;  %v8179_v31 = vpack.c.bf16 %v6160_v18, %v6159_v20 }
0x13e6   : > { %v5749_v37 = vadd.f32 %v7013_v10, %v5739_v34  ;;  %8132 = vmatprep.subr.bf16.mxu0 %v8131_v35  ;;  %v6157_v10 = vld [vmem:[%s10901_s4 + $0x20] sm:$0xff]  ;;  %v6162_v34 = vld [vmem:[%s10901_s4 + $0x48] sm:$0xff] }
0x13e7   : > { %8134 = vmatpush3.bf16.msra.mxu0 %v8131_v35  ;;  %v8176_v29 = vpack.c.bf16 %v6158_v62, %v6157_v10  ;;  %v8182_v12 = vpack.c.bf16 %v6162_v34, %v6161_v33  ;;  %v6163_v35 = vld [vmem:[%s10901_s4 + $0x50] sm:$0xff] }
0x13e8   : > { %7757 = vmatprep.subr.msk.mxu0 %vm3019_vm15, %v5749_v37  ;;  %v8185_v23 = vpack.c.bf16 %v6164_v36, %v6163_v35 }
0x13eb   : > { %7758 = vmatpush3.msk.msra.mxu0 %vm3019_vm15, %v5749_v37  ;;  %vm10897_vm15 = vmmov %vm10893_vm0  ;;  %v6165_v37 = vld [vmem:[%s10901_s4 + $0x60] sm:$0xff] }
0x13ec   : > { %7760 = vmatmul.mubr.msk.f32.vlgmr.msra.gmra.mrb[58].mxu0 %vm10895_vm14, %v5751_v32  ;;  %8136 = vmatprep.subr.bf16.mxu0 %v8135_v43  ;;  %vm10906_vm0 = vmmov %vm10902_vm3  ;;  %v8188_v39 = vpack.c.bf16 %v6166_v38, %v6165_v37  ;;  %v8191_v43 = vpack.c.bf16 %v6168_v13, %v6167_v25  ;;  %v6169_v32 = vld [vmem:[%s10901_s4 + $0x80] sm:$0xff]  ;;  %v6257_v13 = vld [vmem:[%s10907_s1 + $0x8] sm:$0xff] }
0x13ed   : > { %7762 = vmatprep.mubr.msk.f32.mxu0 %vm10896_vm9, %v5752_v58  ;;  %8138 = vmatpush1.bf16.msra.mxu0 %v8137_v54  ;;  %v6170_v54 = vld [vmem:[%s10901_s4 + $0x88] sm:$0xff]  ;;  %v6256_v25 = vld [vmem:[%s10907_s1] sm:$0xff] }
0x13ee   : > { %8140 = vmatprep.subr.bf16.mxu0 %v8139_v16  ;;  %v8194_v58 = vpack.c.bf16 %v6170_v54, %v6169_v32  ;;  %v8200_v32 = vpack.c.bf16 %v6257_v13, %v6256_v25  ;;  %v6258_v54 = vld [vmem:[%s10907_s1 + $0x10] sm:$0xff] }
0x13f0   : > { %7763 = vmatmul.mubr.msk.f32.gmra.mrb[60].mxu0 %vm10897_vm15, %v5753_v49 }
0x13f1   : > { %7765 = vmatprep.mubr.msk.f32.mxu0 %vm10898_vm10, %v5754_v52  ;;  %8142 = vmatpush1.bf16.msra.mxu0 %v8141_v51 }
0x13f2   : > { %8144 = vmatprep.subr.bf16.mxu0 %v8143_v56 }
0x13f4   : > { %7766 = vmatmul.mubr.msk.f32.gmra.mrb[62].mxu0 %vm10899_vm7, %v5755_v44 }
0x13f5   : > { %8146 = vmatpush1.bf16.msra.mxu0 %v8145_v46  ;;  %5976 = vmatprep.mubr.f32.mxu0 %v9102_v9 }
0x13f6   : > { %8148 = vmatprep.subr.bf16.mxu0 %v8147_v63 }
0x13f9   : > { %8150 = vmatpush1.bf16.msra.mxu0 %v8149_v8 }
0x13fa   : > { %8152 = vmatprep.subr.bf16.mxu0 %v8151_v15 }
0x13fd   : > { %8154 = vmatpush1.bf16.msra.mxu0 %v8153_v48 }
0x13fe   : > { %5932 = vmatprep.subr.mxu0 %v5893_v45 }
0x1401   : > { %5933 = vmatpush1.msra.mxu0 %v5892_v21 }
0x1402   : > { %8169 = vmatprep.subr.bf16.mxu0 %v9100_v6 }
0x14bf   : > { %v7761_v19 = vpop.f32.mrb[58].mxu0 }
0x14c0   : > { %v5843_v50 = vpop.f32.mrb[59].mxu0 }
0x14c1   : > { %7021 = vmatmul.mubr.msk.f32.vlgmr.msra.gmra.mrb[64].mxu0 %vm10900_vm4, %v5843_v50 }
0x14c2   : > { %5982 = vmatprep.mubr.f32.mxu0 %v9102_v9  ;;  %8171 = vmatpush1.bf16.msra.mxu0 %v8170_v61 }
0x14c3   : > { %v7764_v4 = vpop.f32.mrb[60].mxu0  ;;  %8172 = vmatprep.subr.bf16.mxu0 %v9100_v6 }
0x14c4   : > { %v5853_v22 = vpop.f32.mrb[61].mxu0 }
0x14c5   : > { %7022 = vmatmul.mubr.msk.f32.gmra.mrb[66].mxu0 %vm10902_vm3, %v7761_v19 }
0x14c6   : > { %5988 = vmatprep.mubr.f32.mxu0 %v9102_v9  ;;  %8174 = vmatpush1.bf16.msra.mxu0 %v8173_v28 }
0x14c7   : > { %v7767_v24 = vpop.f32.mrb[62].mxu0  ;;  %8175 = vmatprep.subr.bf16.mxu0 %v9100_v6 }
0x14c8   : > { %v5863_v26 = vpop.f32.mrb[63].mxu0 }
0x14c9   : > { %7023 = vmatmul.mubr.msk.f32.gmra.mrb[68].mxu0 %vm10903_vm8, %v5853_v22 }
0x14ca   : > { %5994 = vmatprep.mubr.f32.mxu0 %v9102_v9  ;;  %8177 = vmatpush1.bf16.msra.mxu0 %v8176_v29 }
0x14cb   : > { %8178 = vmatprep.subr.bf16.mxu0 %v9100_v6 }
0x14cd   : > { %7024 = vmatmul.mubr.msk.f32.gmra.mrb[70].mxu0 %vm10904_vm11, %v7764_v4 }
0x14ce   : > { %6000 = vmatprep.mubr.f32.mxu0 %v9102_v9  ;;  %8180 = vmatpush1.bf16.msra.mxu0 %v8179_v31 }
0x14cf   : > { %8181 = vmatprep.subr.bf16.mxu0 %v9100_v6 }
0x14d1   : > { %7025 = vmatmul.mubr.msk.f32.gmra.mrb[72].mxu0 %vm10905_vm12, %v5863_v26 }
0x14d2   : > { %6006 = vmatprep.mubr.f32.mxu0 %v9102_v9  ;;  %8183 = vmatpush1.bf16.msra.mxu0 %v8182_v12 }
0x14d3   : > { %8184 = vmatprep.subr.bf16.mxu0 %v9100_v6 }
0x14d5   : > { %7026 = vmatmul.mubr.msk.f32.gmra.mrb[74].mxu0 %vm10906_vm0, %v7767_v24 }
0x14d6   : > { %8186 = vmatpush1.bf16.msra.mxu0 %v8185_v23 }
0x14d7   : > { %8187 = vmatprep.subr.bf16.mxu0 %v9100_v6 }
0x14da   : > { %8189 = vmatpush1.bf16.msra.mxu0 %v8188_v39 }
0x14db   : > { %8190 = vmatprep.subr.bf16.mxu0 %v9100_v6 }
0x14de   : > { %8192 = vmatpush1.bf16.msra.mxu0 %v8191_v43  ;;  %v6061_v43 = vld [vmem:[%s10908_s5] sm:$0xff] }
0x14df   : > { %8193 = vmatprep.subr.bf16.mxu0 %v9100_v6 }
0x14e2   : > { %8195 = vmatpush1.bf16.msra.mxu0 %v8194_v58  ;;  %v6259_v58 = vld [vmem:[%s10907_s1 + $0x18] sm:$0xff]  ;;  %s10910_s1 = sld [smem:[#allocation70_spill]] }
0x14e3   : > { %8196 = vmatprep.subr.bf16.mxu0 %v9100_v6 }
0x1594   : > { %v5978_v16 = vpop.f32.mrb[64].mxu0 }
0x1595   : > { %vm6013_vm14 = vcmp.ge.f32.partialorder %v5978_v16, 0.0  ;;  %v6025_v40 = vmul.f32 0.2, %v5978_v16  ;;  %v5980_v42 = vpop.f32.mrb[65].mxu0 }
0x1596   : > { %vm6014_vm9 = vcmp.ge.f32.partialorder %v5980_v42, 0.0  ;;  %v6026_v47 = vmul.f32 0.2, %v5980_v42 }
0x1597   : > { %v6037_v59 = vsel %vm6013_vm14, %v5978_v16, %v6025_v40  ;;  %v6062_v16 = vld [vmem:[%s10908_s5 + $0x8] sm:$0xff]  ;;  %v8203_v40 = vpack.c.bf16 %v6259_v58, %v6258_v54  ;;  %s9118_s5 = smov 112  }
0x1598   : > { %v5984_v49 = vpop.f32.mrb[66].mxu0  ;;  %v6038_v51 = vsel %vm6014_vm9, %v5980_v42, %v6026_v47  ;;  %v6049_v60 = vmul.f32 1.4142135, %v6037_v59  ;;  %vm9117_vm9 = vmmov 1   ;;  %v6171_v42 = vld [vmem:[%s10901_s4 + $0x90] sm:$0xff]  ;;  %v6172_v47 = vld [vmem:[%s10901_s4 + $0x98] sm:$0xff] }
0x1599   : > { %vm6015_vm15 = vcmp.ge.f32.partialorder %v5984_v49, 0.0  ;;  %v6027_v52 = vmul.f32 0.2, %v5984_v49  ;;  %v5986_v56 = vpop.f32.mrb[67].mxu0  ;;  %v6050_v3 = vmul.f32 1.4142135, %v6038_v51  ;;  %v8197_v59 = vpack.c.bf16 %v6172_v47, %v6171_v42 }
0x159a   : > { %vm6016_vm10 = vcmp.ge.f32.partialorder %v5986_v56, 0.0  ;;  %v6028_v30 = vmul.f32 0.2, %v5986_v56  ;;  %v6415_v51 = vld [vmem:[%s10833_s3] sm:$0xff] }
0x159b   : > { %v6039_v57 = vsel %vm6015_vm15, %v5984_v49, %v6027_v52  ;;  %vm8164_vm15 = vmpackc.low %vm3010_vm13, %vm9117_vm9  ;;  %8198 = vmatpush1.bf16.msra.mxu0 %v8197_v59  ;;  %v6332_v49 = vld [vmem:[%s10909_s9] sm:$0xf]  ;;  %v6416_v52 = vld [vmem:[%s10833_s3 + $0x8] sm:$0xff] }
0x159c   : > { %v6051_v44 = vmul.f32 1.4142135, %v6039_v57  ;;  %v6040_v46 = vsel %vm6016_vm10, %v5986_v56, %v6028_v30  ;;  %v5990_v63 = vpop.f32.mrb[68].mxu0  ;;  %vm6063_vm10 = vcmask 343040   ;;  %6221 = vmatprep.subr.mxu0 %v9102_v9  ;;  %v6260_v57 = vld [vmem:[%s10910_s1] sm:$0x1] }
0x159d   : > { %v6052_v0 = vmul.f32 1.4142135, %v6040_v46  ;;  %vm6017_vm7 = vcmp.ge.f32.partialorder %v5990_v63, 0.0  ;;  %v6029_v1 = vmul.f32 0.2, %v5990_v63  ;;  %v5992_v11 = vpop.f32.mrb[69].mxu0 }
0x159e   : > { %v8157_v7 = vpack.c.bf16 %v6051_v44, %v6049_v60  ;;  %vm6018_vm4 = vcmp.ge.f32.partialorder %v5992_v11, 0.0  ;;  %v6030_v8 = vmul.f32 0.2, %v5992_v11  ;;  %v6417_v44 = vld [vmem:[%s10833_s3 + $0x10] sm:$0xff]  ;;  %v6418_v46 = vld [vmem:[%s10833_s3 + $0x18] sm:$0xff]  ;;  %s10911_s1 = sld [smem:[#allocation73_spill]] }
0x159f   : > { %v8155_v15 = vpack.c.bf16 %v6052_v0, %v6050_v3  ;;  %v6041_v17 = vsel %vm6017_vm7, %v5990_v63, %v6029_v1 }
0x15a0   : > { %v5996_v14 = vpop.f32.mrb[70].mxu0  ;;  %v6042_v48 = vsel %vm6018_vm4, %v5992_v11, %v6030_v8  ;;  %v6053_v50 = vmul.f32 1.4142135, %v6041_v17  ;;  %v8209_v11 = vpack.c.bf16 %v6418_v46, %v6417_v44  ;;  %v6420_v8 = vld [vmem:[%s10833_s3 + $0x28] sm:$0xff]  ;;  %v6421_v17 = vld [vmem:[%s10833_s3 + $0x30] sm:$0xff] }
0x15a1   : > { %vm6019_vm3 = vcmp.ge.f32.partialorder %v5996_v14, 0.0  ;;  %v6031_v45 = vmul.f32 0.2, %v5996_v14  ;;  %v5998_v21 = vpop.f32.mrb[71].mxu0  ;;  %8156 = vmatprep.subr.bf16.mxu1 %v8155_v15  ;;  %v6054_v22 = vmul.f32 1.4142135, %v6042_v48 }
0x15a2   : > { %vm6020_vm8 = vcmp.ge.f32.partialorder %v5998_v21, 0.0  ;;  %v6032_v19 = vmul.f32 0.2, %v5998_v21  ;;  %8158 = vmatpush1.bf16.msra.mxu1 %v8157_v7  ;;  %v6419_v7 = vld [vmem:[%s10833_s3 + $0x20] sm:$0xff] }
0x15a3   : > { %v6043_v4 = vsel %vm6019_vm3, %v5996_v14, %v6031_v45  ;;  %v8213_v15 = vpack.c.bf16 %v6420_v8, %v6419_v7  ;;  %v6422_v14 = vld [vmem:[%s10833_s3 + $0x38] sm:$0xff] }
0x15a4   : > { %v6055_v24 = vmul.f32 1.4142135, %v6043_v4  ;;  %v6044_v26 = vsel %vm6020_vm8, %v5998_v21, %v6032_v19  ;;  %v6002_v27 = vpop.f32.mrb[72].mxu0  ;;  %v8217_v48 = vpack.c.bf16 %v6422_v14, %v6421_v17 }
0x15a5   : > { %v6056_v2 = vmul.f32 1.4142135, %v6044_v26  ;;  %v6033_v55 = vmul.f32 0.2, %v6002_v27  ;;  %v6004_v61 = vpop.f32.mrb[73].mxu0  ;;  %vm6021_vm11 = vcmp.ge.f32.partialorder %v6002_v27, 0.0 }
0x15a6   : > { %v8161_v5 = vpack.c.bf16 %v6055_v24, %v6053_v50  ;;  %v6034_v28 = vmul.f32 0.2, %v6004_v61  ;;  %vm6022_vm12 = vcmp.ge.f32.partialorder %v6004_v61, 0.0 }
0x15a7   : > { %v8159_v10 = vpack.c.bf16 %v6056_v2, %v6054_v22  ;;  %v6045_v29 = vsel %vm6021_vm11, %v6002_v27, %v6033_v55  ;;  %v7036_v2 = vld [vmem:[%s10911_s1] ss:$0 sm:$0xff] }
0x15a8   : > { %v6008_v62 = vpop.f32.mrb[74].mxu0  ;;  %v6046_v31 = vsel %vm6022_vm12, %v6004_v61, %v6034_v28  ;;  %v6057_v12 = vmul.f32 1.4142135, %v6045_v29 }
0x15a9   : > { %vm6023_vm0 = vcmp.ge.f32.partialorder %v6008_v62, 0.0  ;;  %v6035_v20 = vmul.f32 0.2, %v6008_v62  ;;  %v6010_v18 = vpop.f32.mrb[75].mxu0  ;;  %8160 = vmatprep.subr.bf16.mxu1 %v8159_v10  ;;  %v6058_v23 = vmul.f32 1.4142135, %v6046_v31 }
0x15aa   : > { %vm6024_vm14 = vcmp.ge.f32.partialorder %v6010_v18, 0.0  ;;  %v6036_v33 = vmul.f32 0.2, %v6010_v18  ;;  %8162 = vmatpush1.bf16.msra.mxu1 %v8161_v5 }
0x15ab   : > { %v6047_v34 = vsel %vm6023_vm0, %v6008_v62, %v6035_v20 }
0x15ac   : > { %v6059_v35 = vmul.f32 1.4142135, %v6047_v34  ;;  %v6048_v36 = vsel %vm6024_vm14, %v6010_v18, %v6036_v33 }
0x15ad   : > { %v6060_v37 = vmul.f32 1.4142135, %v6048_v36 }
0x15ae   : > { %v8166_v38 = vpack.c.bf16 %v6059_v35, %v6057_v12 }
0x15af   : > { %v8163_v39 = vpack.c.bf16 %v6060_v37, %v6058_v23 }
0x15b1   : > { %8165 = vmatprep.subr.msk.bf16.mxu1 %vm8164_vm15, %v8163_v39 }
0x15b2   : > { %8168 = vmatpush1.bf16.msk.msra.mxu1 %vm8164_vm15, %v8166_v38 }
0x15b3   : > { %8199 = vmatprep.subr.bf16.mxu1 %v9100_v6 }
0x15b5   : > { %7029 = vmatmul.mubr.msk.f32.vlgmr.msra.gmra.mrb[84].mxu1 %vm6063_vm10, %v6061_v43 }
0x15b6   : > { %8201 = vmatpush3.bf16.msra.mxu1 %v8200_v32  ;;  %6146 = vmatprep.mubr.f32.mxu1 %v9102_v9 }
0x15b7   : > { %8202 = vmatprep.subr.bf16.mxu1 %v9100_v6  ;;  %v6173_v6 = vld [vmem:[%s10901_s4 + $0xa0] sm:$0xff]  ;;  %s8257_s4 = smul.u32 48, %s9631_s8 }
0x15b8   : > { %6222 = vmatpush1.msra.mxu0 %v6173_v6 }
0x15b9   : > { %7030 = vmatmul.mubr.msk.f32.gmra.mrb[86].mxu1 %vm6063_vm10, %v6062_v16  ;;  %s1583_s3 = scalar_lea.vmem [#allocation25], %s8257_s4  ;;  %s8270_s4 = smul.u32 768, %s9389_s2 }
0x15ba   : > { %8204 = vmatpush3.bf16.msra.mxu1 %v8203_v40  ;;  %7776 = vmatprep.mubr.msk.f32.mxu1 %vm9101_vm1, %v9102_v9  ;;  %s6551_s1 = sshll.u32 %s1583_s3, 4  ;;  %s9120_s2 = smov [#allocation25]   ;;  %s10691_s1 = int_to_ptr.vmem [resolvable:$true] %s6551_s1 }
0x15bb   : > { %7779 = vmatprep.subr.mxu1 %v9102_v9  ;;  %s10695_s9 = scalar_lea.hbm %s10912_s6, %s8270_s4  ;;  %s8945_s10 = sshll.u32 %s9120_s2, 4  ;;  %s8946_s10 = int_to_ptr.vmem [resolvable:$false] %s8945_s10 }
0x15bc   : > { %s8947_s12 = scalar_lea.vmem %s8946_s10, 1536  ;;  %p8948_p1 = scmp.lt.s32.totalorder %s10691_s1, %s8946_s10 }
0x15bd   : > { %7777 = vmatmul.mubr.msk.f32.vlgmr.msra.gmra.mrb[88].mxu1 %vm1600_vm2, %v9697_v41  ;;  %v8205_v41 = vpack.c.bf16 %v6416_v52, %v6415_v51  ;;  %vm6174_vm2 = vcmask 326656  }
0x15be   : > { %7781 = vmatprep.mubr.msk.f32.mxu1 %vm9101_vm1, %v9102_v9  ;;  %7780 = vmatpush3.msk.msra.mxu1 %vm1946_vm5, %v6332_v49  ;;  %vm6430_vm1 = vcmask 523264   ;;  %vm6514_vm5 = vcmask 130048  }
0x15bf   : > { %8206 = vmatprep.subr.bf16.mxu1 %v8205_v41 }
0x1688   : > { %v6142_v56 = vpop.f32.mrb[84].mxu1 }
0x1689   : > { %v6144_v30 = vpop.f32.mrb[85].mxu1 }
0x168a   : > { %7031 = vmatprep.mubr.msk.f32.mxu0 %vm6174_vm2, %v6144_v30 }
0x168b   : > { %6246 = vmatmul.mubr.f32.vlgmr.msra.gmra.mrb[76].mxu0 %v6142_v56 }
0x168c   : > { %v6148_v60 = vpop.f32.mrb[86].mxu1 }
0x168d   : > { %v6150_v9 = vpop.f32.mrb[87].mxu1 }
0x168e   : > { %7032 = vmatprep.mubr.msk.f32.mxu0 %vm6174_vm2, %v6150_v9 }
0x168f   : > { %6251 = vmatmul.mubr.f32.gmra.mrb[78].mxu0 %v6148_v60 }
0x1690   : > { %v6327_v3 = vpop.f32.mrb[88].mxu1 }
0x1691   : > { %v6328_v63 = vadd.f32 %v6327_v3, %v6260_v57  ;;  %v7778_v0 = vpop.f32.mrb[89].mxu1 }
0x1693   : > { %v6331_v1 = vmul.f32 0.5, %v6328_v63 }
0x1695   : > { %7782 = vmatmul.mubr.msk.f32.vlgmr.msra.gmra.mrb[90].mxu1 %vm1942_vm6, %v6331_v1 }
0x1696   : > { %8208 = vmatpush3.bf16.msra.mxu1 %v8205_v41 }
0x1697   : > { %8210 = vmatprep.subr.bf16.mxu1 %v8209_v11 }
0x169a   : > { %8212 = vmatpush3.bf16.msra.mxu1 %v8209_v11 }
0x169b   : > { %8214 = vmatprep.subr.bf16.mxu1 %v8213_v15 }
0x169e   : > { %8216 = vmatpush3.bf16.msra.mxu1 %v8213_v15 }
0x169f   : > { %8218 = vmatprep.subr.bf16.mxu1 %v8217_v48 }
0x16a2   : > { %8220 = vmatpush3.bf16.msra.mxu1 %v8217_v48 }
0x175e   : > { %v6247_v45 = vpop.f32.mrb[76].mxu0 }
0x175f   : > { %v6249_v21 = vpop.f32.mrb[77].mxu0 }
0x1762   : > { %v6252_v19 = vpop.f32.mrb[78].mxu0 }
0x1763   : > { %v6254_v50 = vpop.f32.mrb[79].mxu0 }
0x1768   : > { %v6405_v4 = vpop.f32.mrb[90].mxu1 }
0x1769   : > { %v6412_v22 = vrot.slane %v6405_v4, %v9738_v53  ;;  %v7783_v24 = vpop.f32.mrb[91].mxu1 }
0x176b   : > { %v6413_v26 = vmul.f32 %v6412_v22, %v6247_v45  ;;  %v6414_v27 = vmul.f32 %v6412_v22, %v6252_v19 }
0x176d   : > { %7800 = vmatprep.mubr.msk.f32.mxu1 %vm6430_vm1, %v6413_v26 }
0x176e   : > { %7801 = vmatmul.mubr.msk.f32.vlgmr.msra.gmra.mrb[92].mxu1 %vm6430_vm1, %v6414_v27 }
0x1841   : > { %v7802_v55 = vpop.f32.mrb[92].mxu1 }
0x1842   : > { %v6509_v61 = vadd.f32 %v7802_v55, %v7036_v2  ;;  %v6503_v5 = vpop.f32.mrb[93].mxu1 }
0x1843   : > { %v6504_v28 = vadd.f32 %v7036_v2, %v6503_v5 }
0x1844   : > { %v6513_v10 = vmul.f32 0.25, %v6509_v61 }
0x1845   : > { %v6512_v62 = vmul.f32 0.25, %v6504_v28 }
0x1846   : > { %6516 = vst.msk [vmem:[%s1583_s3 + $0x8] sm:$0xff] %vm6514_vm5, %v6513_v10  ;;  %6521 = vrot.lane.b32.xlu1 %v6513_v10, %s9118_s5 }
0x1847   : > { %6515 = vst.msk [vmem:[%s1583_s3] sm:$0xff] %vm6514_vm5, %v6512_v62  ;;  %6528 = vrot.lane.b32.xlu0 %v6512_v62, %s9119_s7 }
0x184a   : > { %6519 = vrot.lane.b32.xlu1 %v6512_v62, %s9118_s5  ;;  %s8941_s5 = scalar_lea.vmem %s10691_s1, 768 }
0x184b   : > { %p8942_p3 = scmp.ne.s32.totalorder %s10691_s1, %s8941_s5  ;;  %p8949_p12 = scmp.lt.s32.totalorder %s8947_s12, %s8941_s5 }
0x184d   : > { %p8943_p2 = pnand %p8942_p3, %p10913_p0  ;;  %p8950_p4 = por %p8949_p12, %p8948_p1 }
0x184e   : > { %6530 = vrot.lane.b32.xlu1 %v6513_v10, %s9119_s7  ;;  %s6538_s7 = scalar_lea.sflag [#allocation4], %s9631_s8 }
0x184f   : > { %p8944_p8 = pneg %p8943_p2 }
0x1851   : > { %p8951_p13 = pnand %p8950_p4, %p8944_p8 }
0x18b8   : > { %v6522_v53 = vpop.permute.xlu1 %6521 }
0x18b9   : > { %7040 = vst.msk [vmem:[%s1583_s3 + $0x18] sm:$0xff] %vm6514_vm5, %v6522_v53  ;;  %v6529_v29 = vpop.permute.xlu0 %6528 }
0x18ba   : > { %7041 = vst.msk [vmem:[%s1583_s3 + $0x20] sm:$0xff] %vm6514_vm5, %v6529_v29 }
0x18bc   : > { %v6520_v20 = vpop.permute.xlu1 %6519 }
0x18bd   : > { %7039 = vst.msk [vmem:[%s1583_s3 + $0x10] sm:$0xff] %vm6514_vm5, %v6520_v20 }
0x18c0   : > { %v6531_v18 = vpop.permute.xlu1 %6530 }
0x18c1   : > { %7042 = vst.msk [vmem:[%s1583_s3 + $0x28] sm:$0xff] %vm6514_vm5, %v6531_v18 }
0x18c2   : > { %8954 = shalt.err (!%p8951_p13)
}
0x18c3   : > { %s8955_s3 = scalar_lea.hbm %s10695_s9, 768  ;;  %s8959_s4 = scalar_lea.hbm %s10912_s6, 1536 }
0x18c4   : > { %p8956_p5 = scmp.ne.s32.totalorder %s10695_s9, %s8955_s3  ;;  %p8960_p11 = scmp.lt.u32.totalorder %s10695_s9, %s10912_s6 }
0x18c5   : > { %p8961_p9 = scmp.lt.u32.totalorder %s8959_s4, %s8955_s3  ;;  %p8963_p3 = scmp.lt.u32.totalorder %s8955_s3, %s10695_s9 }
0x18c6   : > { %p8957_p7 = pnand %p8956_p5, %p10913_p0 }
0x18c7   : > { %p8962_p6 = por %p8961_p9, %p8960_p11 }
0x18c8   : > { %p8958_p10 = pneg %p8957_p7 }
0x18c9   : > { %p8964_p2 = por %p8963_p3, %p8962_p6 }
0x18cb   : > { %p8965_p8 = pnand %p8964_p2, %p8958_p10 }
0x18cd   : > { %8968 = shalt.err (!%p8965_p8)
}
0x18ce   : > { %s9121_s10 = smov 128   ;;  %s9122_s12 = smov 8  }
0x18cf   : > { %8325 = dma.vmem_to_hbm [thread:$0]  (%p10913_p0), %s10691_s1, 768, %s10695_s9, %s6538_s7, %s9121_s10, %s9121_s10, %s9122_s12  }
0x18d0 PF: > { %s6566_s5 = sand.u32 1, %s9023_s22   ;;  %p10914_p1 = scmp.ne.s32.totalorder %s10846_s0, 0 }
0x18d1   : > { %p10915_p12 = scmp.ge.s32.totalorder %s9035_s28, 2  ;;  %s6567_s2 = scalar_lea.sflag [#allocation4], %s6566_s5 }
0x18d3   : > { %p8372_p4 = pnand %p10915_p12, %p10914_p1 }
0x18d5   : > { %9018 = dma.done.wait (!%p8372_p4), %s6567_s2, 768  }
0x18d6   : > { %9020 = vsyncadd (!%p8372_p4), %s6567_s2, 4294966528  ;;  %p115_p13 = scmp.ge.s32.totalorder %s9567_s13, 4   ;;  %s10916_s22 = smov %s9027_s23 }
0x18d7   : > { %s10917_s23 = smov %s9031_s26  ;;  %s10918_s26 = smov %s9579_s18 }
0x18d8   : > { %s10919_s28 = smov %s9567_s13  ;;  %117 = sbr.rel (!%p115_p13) target bundleno = 104 (0x68), region = 363 }
0x18df   :  { %6572 = vsyncpa [#allocation3], 1 }
0x18e0   :  { %6574 = vsyncpa [#allocation3 + $0x1], 1 }
0x18e1   :  { %6575 = vsyncpa [#allocation6], 1 }
0x18e2   :  { %6576 = vsyncpa [#allocation9], 1 }
0x18e3   :  { %6577 = vsyncpa [#allocation12], 1 }
0x18e4   :  { %6578 = vsyncpa [#allocation15], 1 }
0x18e5   :  { %6579 = vsyncpa [#allocation18], 1 }
0x18e6   :  { %6580 = vsyncpa [#allocation21], 1 }
0x18e7   :  { %6581 = vsyncpa [#allocation24], 1 }
0x18e8   :  { %6582 = vsyncpa [#allocation4], 1 }
0x18e9   :  { %6584 = vsyncpa [#allocation4 + $0x1], 1 }

</bundles_post_ra>
